<compile_context>
chip_gen: v6e
topology: v6e:2x2x1
jax: 0.10.0
libtpu: 0.0.40
codegen_flags: <defaults>
</compile_context>

<pallas_src>
import jax
import jax.numpy as jnp
import numpy as np
from jax.experimental import pallas as pl
from jax.experimental.pallas import tpu as pltpu

_TAPS = tuple((dy, dx) for dy in range(3) for dx in range(3))


def _round_up(v, m):
    return (v + m - 1) // m * m


# ----------------------------------------------------------------------------
# Fused forward pass (single pallas_call)
# ----------------------------------------------------------------------------
@jax.jit
def audio_classifier_forward(params, x):
    """x: (B, H, W) float32 (same as the torch input before unsqueeze(1))."""
    batch, h1, w1 = x.shape
    assert h1 % 4 == 0 and w1 % 4 == 0, "two 2x2 maxpools need H, W % 4 == 0"
    h2, w2 = h1 // 2, w1 // 2
    h3, w3 = h2 // 2, w2 // 2

    w1m, sc1, sh1 = params["conv1"]
    w2m, sc2, sh2 = params["conv2"]
    w3m, sc3, sh3 = params["conv3"]
    fw1, fb1, fw2, fb2 = params["fc"]
    c1, c2, c3 = w1m.shape[1], w2m.shape[1], w3m.shape[1]
    ncls = fw2.shape[1]

    # ---- padded-flat geometry for layers 2 and 3 ("pad-at-end" layout) ------
    # Each padded image row stores W valid cols followed by (Wp - W) zero pad
    # cols; one zero row above / below each image.  Wp and the slice margin D
    # are multiples of 8 so +/-Wp tap slices and pooled-row writes are
    # sublane aligned.
    wp2 = _round_up(w2 + 2, 8); hp2 = h2 + 2; lp2 = hp2 * wp2
    wp3 = _round_up(w3 + 2, 8); hp3 = h3 + 2; lp3 = hp3 * wp3
    d2 = _round_up(wp2 + 1, 8)
    d3 = _round_up(wp3 + 1, 8)
    nv1 = batch * h1 * w1            # conv1 output rows (valid positions only)
    nq = batch * h2 * w2             # rows per pool-quad block of conv1 output
    n2 = batch * lp2                 # conv2 output rows (all padded positions)
    n3 = batch * lp3                 # conv3 output rows (all padded positions)
    # pool2: number of stride-2 rows needed to cover the last valid 2x2 anchor
    q2 = (batch - 1) * (lp2 // 2) + (2 * (h3 - 1) + 1) * (wp2 // 2) + w3
    assert 2 * (q2 - 1) + wp2 + 1 < n2

    # ---- host-side conv1 im2col, quad-major row order ------------------------
    # Row order: (quad, b, ip, jp) with quad = 2*ii + jj, i = 2*ip+ii,
    # j = 2*jp+jj, so maxpool1 becomes the max of 4 contiguous row blocks.
    xp = jnp.pad(x, ((0, 0), (1, 1), (1, 1)))
    cols = jnp.stack([xp[:, dy:dy + h1, dx:dx + w1] for dy, dx in _TAPS],
                     axis=-1)                                     # (B, H, W, 9)
    p1 = jnp.concatenate(
        [cols[:, ii::2, jj::2, :].reshape(batch * h2 * w2, 9)
         for ii in range(2) for jj in range(2)], axis=0)          # (4*nq, 9)

    def kernel(p1_ref, w1_ref, sc1_ref, sh1_ref,
               w2_ref, sc2_ref, sh2_ref,
               w3_ref, sc3_ref, sh3_ref,
               fw1_ref, fb1_ref, fw2_ref, fb2_ref,
               out_ref,
               x2_s, p2_s, y2_s, x3_s, p3_s):
        f32 = jnp.float32

        # Zero-filled padded-flat buffers: the zero rows / trailing zero pad
        # columns provide the SAME-conv padding, the D-row margins keep every
        # tap slice in bounds.
        x2_s[...] = jnp.zeros_like(x2_s)
        x3_s[...] = jnp.zeros_like(x3_s)

        # ---- conv1 + BN + ReLU: one (nv1, 9) x (9, c1) MXU matmul -----------
        y1 = jnp.dot(p1_ref[...], w1_ref[...], preferred_element_type=f32)
        y1 = jnp.maximum(y1 * sc1_ref[...] + sh1_ref[...], 0.0)

        # ---- maxpool1 (2x2): max of the 4 quad blocks, then aligned copies
        # into the layer-2 padded-flat buffer (row (ip+1)*wp2, cols [0, w2)).
        m1 = jnp.maximum(jnp.maximum(y1[0:nq], y1[nq:2 * nq]),
                         jnp.maximum(y1[2 * nq:3 * nq], y1[3 * nq:4 * nq]))
        for b in range(batch):
            for ip in range(h2):
                src = b * h2 * w2 + ip * w2          # multiple of 8
                dst = d2 + b * lp2 + (ip + 1) * wp2  # multiple of 8
                x2_s[dst:dst + w2, :] = m1[src:src + w2]

        # ---- conv2: (n2, 9*c1) im2col from 9 shifted slices, one matmul -----
        for k, (dy, dx) in enumerate(_TAPS):
            s = (dy - 1) * wp2 + (dx - 1)
            p2_s[:, k * c1:(k + 1) * c1] = x2_s[d2 + s:d2 + s + n2, :]
        z2 = jnp.dot(p2_s[...], w2_ref[...], preferred_element_type=f32)
        y2_s[...] = jnp.maximum(z2 * sc2_ref[...] + sh2_ref[...], 0.0)

        # ---- maxpool2 (2x2): 4 stride-2 row reads of the 2x2 window corners;
        # valid anchors then sit on contiguous, 8-aligned runs of rows.
        mc2 = jnp.maximum(
            jnp.maximum(y2_s[pl.ds(0, q2, stride=2), :],
                        y2_s[pl.ds(1, q2, stride=2), :]),
            jnp.maximum(y2_s[pl.ds(wp2, q2, stride=2), :],
                        y2_s[pl.ds(wp2 + 1, q2, stride=2), :]))
        for b in range(batch):
            for ip in range(h3):
                src = b * (lp2 // 2) + (2 * ip + 1) * (wp2 // 2)  # mult of 8
                dst = d3 + b * lp3 + (ip + 1) * wp3               # mult of 8
                x3_s[dst:dst + w3, :] = mc2[src:src + w3]

        # ---- conv3: (n3, 9*c2) im2col, one matmul, BN + ReLU ----------------
        for k, (dy, dx) in enumerate(_TAPS):
            s = (dy - 1) * wp3 + (dx - 1)
            p3_s[:, k * c2:(k + 1) * c2] = x3_s[d3 + s:d3 + s + n3, :]
        y3 = jnp.dot(p3_s[...], w3_ref[...], preferred_element_type=f32)
        y3 = jnp.maximum(y3 * sc3_ref[...] + sh3_ref[...], 0.0)    # (n3, c3)

        # ---- AdaptiveAvgPool2d((1,1)): mean over the h3*w3 valid rows per
        # image (per-image static slices - no dense GAP constant, O(B) work).
        inv = 1.0 / (h3 * w3)
        pooled_rows = []
        for b in range(batch):
            base = b * lp3
            acc = y3[base + wp3:base + wp3 + w3]
            for i in range(1, h3):
                acc = acc + y3[base + (i + 1) * wp3:base + (i + 1) * wp3 + w3]
            pooled_rows.append(jnp.sum(acc, axis=0, keepdims=True) * inv)
        pooled = jnp.concatenate(pooled_rows, axis=0)              # (B, c3)

        # ---- fc1 -> ReLU -> (Dropout = identity at inference) -> fc2 --------
        hid = jnp.maximum(
            jnp.dot(pooled, fw1_ref[...], preferred_element_type=f32)
            + fb1_ref[...], 0.0)
        out = (jnp.dot(hid, fw2_ref[...], preferred_element_type=f32)
               + fb2_ref[...])
        out_ref[...] = out.astype(out_ref.dtype)

    operands = (p1, w1m, sc1, sh1, w2m, sc2, sh2, w3m, sc3, sh3,
                fw1, fb1, fw2, fb2)
    flops = 2 * (nv1 * 9 * c1 + n2 * 9 * c1 * c2 + n3 * 9 * c2 * c3
                 + batch * (c3 * fw1.shape[1] + fw1.shape[1] * ncls))
    bytes_accessed = int(sum(int(np.prod(o.shape)) for o in operands) * 4
                         + batch * ncls * 4)

    return pl.pallas_call(
        kernel,
        out_shape=jax.ShapeDtypeStruct((batch, ncls), jnp.float32),
        # No grid: one invocation, everything VMEM-resident (<1 MiB scratch).
        scratch_shapes=[
            pltpu.VMEM((batch * lp2 + 2 * d2, c1), jnp.float32),   # x2_s
            pltpu.VMEM((n2, 9 * c1), jnp.float32),                 # p2_s
            pltpu.VMEM((n2, c2), jnp.float32),                     # y2_s
            pltpu.VMEM((batch * lp3 + 2 * d3, c2), jnp.float32),   # x3_s
            pltpu.VMEM((n3, 9 * c2), jnp.float32),                 # p3_s
        ],
        cost_estimate=pl.CostEstimate(flops=flops, transcendentals=0,
                                      bytes_accessed=bytes_accessed),
    )(*operands)


# ----------------------------------------------------------------------------
# Deterministic parameter construction (shapes match the torch module)
# ----------------------------------------------------------------------------
def init_params(key, num_classes=2):
    ks = iter(jax.random.split(key, 32))

    def conv_layer(cin, cout):
        w = 0.1 * jax.random.normal(next(ks), (3, 3, cin, cout), jnp.float32)
        b = 0.1 * jax.random.normal(next(ks), (cout,), jnp.float32)
        gamma = 1.0 + 0.1 * jax.random.normal(next(ks), (cout,), jnp.float32)
        beta = 0.1 * jax.random.normal(next(ks), (cout,), jnp.float32)
        mean = jnp.zeros((cout,), jnp.float32)   # running_mean at init
        var = jnp.ones((cout,), jnp.float32)     # running_var  at init
        eps = 1e-5
        scale = gamma / jnp.sqrt(var + eps)
        shift = beta + scale * (b - mean)        # conv bias folded into BN shift
        w_mat = w.reshape(9 * cin, cout)         # tap-major, cin-minor rows
        return (w_mat, scale.reshape(1, cout), shift.reshape(1, cout))

    def linear(cin, cout):
        w = 0.1 * jax.random.normal(next(ks), (cin, cout), jnp.float32)
        b = 0.1 * jax.random.normal(next(ks), (cout,), jnp.float32)
        return w, b.reshape(1, cout)

    params = {
        "conv1": conv_layer(1, 16),
        "conv2": conv_layer(16, 32),
        "conv3": conv_layer(32, 64),
    }
    w1, b1 = linear(64, 32)
    w2, b2 = linear(32, num_classes)
    params["fc"] = (w1, b1, w2, b2)
    return params


# ----------------------------------------------------------------------------
# Pure-JAX reference with identical math, for correctness checking
# ----------------------------------------------------------------------------
def _im2col_3x3(x):
    B, H, W, C = x.shape
    xp = jnp.pad(x, ((0, 0), (1, 1), (1, 1), (0, 0)))
    cols = [xp[:, dy:dy + H, dx:dx + W, :] for dy in range(3) for dx in range(3)]
    return jnp.concatenate(cols, axis=-1).reshape(B, H * W, 9 * C)


def _maxpool2(x):
    B, H, W, C = x.shape
    return jnp.max(x.reshape(B, H // 2, 2, W // 2, 2, C), axis=(2, 4))


def reference_forward(params, x):
    x = x[..., None]
    for i, name in enumerate(("conv1", "conv2", "conv3")):
        w_mat, scale, shift = params[name]
        B, H, W, _ = x.shape
        p = _im2col_3x3(x)
        y = jnp.einsum("bpk,kc->bpc", p, w_mat,
                       precision=jax.lax.Precision.HIGHEST)
        y = jnp.maximum(y * scale + shift, 0.0)
        x = y.reshape(B, H, W, w_mat.shape[1])
        if i < 2:
            x = _maxpool2(x)
    w1, b1, w2, b2 = params["fc"]
    pooled = jnp.mean(x.reshape(x.shape[0], -1, x.shape[-1]), axis=1)
    h = jnp.maximum(pooled @ w1 + b1, 0.0)
    return h @ w2 + b2


# ----------------------------------------------------------------------------
if __name__ == "__main__":
    key = jax.random.PRNGKey(0)
    k_param, k_x = jax.random.split(key)

    B, H, W = 2, 16, 16                          # spectrogram-like input
    x = jax.random.normal(k_x, (B, H, W), jnp.float32)
    params = init_params(k_param, num_classes=2)

    out = audio_classifier_forward(params, x)
    out = jax.block_until_ready(out)             # (2, 2)
    assert out.shape == (B, 2)

    ref = reference_forward(params, x)
    np.testing.assert_allclose(np.asarray(out), np.asarray(ref),
                               atol=2e-3, rtol=2e-3)

    print("KERNEL_OK")
</pallas_src>

<mosaic_0001>
module attributes {stable_mosaic.version = 11 : i64} {
  func.func @kernel(%arg0: memref<512x9xf32, #tpu.memory_space<vmem>>, %arg1: memref<9x16xf32, #tpu.memory_space<vmem>>, %arg2: memref<1x16xf32, #tpu.memory_space<vmem>>, %arg3: memref<1x16xf32, #tpu.memory_space<vmem>>, %arg4: memref<144x32xf32, #tpu.memory_space<vmem>>, %arg5: memref<1x32xf32, #tpu.memory_space<vmem>>, %arg6: memref<1x32xf32, #tpu.memory_space<vmem>>, %arg7: memref<288x64xf32, #tpu.memory_space<vmem>>, %arg8: memref<1x64xf32, #tpu.memory_space<vmem>>, %arg9: memref<1x64xf32, #tpu.memory_space<vmem>>, %arg10: memref<64x32xf32, #tpu.memory_space<vmem>>, %arg11: memref<1x32xf32, #tpu.memory_space<vmem>>, %arg12: memref<32x2xf32, #tpu.memory_space<vmem>>, %arg13: memref<1x2xf32, #tpu.memory_space<vmem>>, %arg14: memref<2x2xf32, #tpu.memory_space<vmem>>, %arg15: memref<368x16xf32, #tpu.memory_space<vmem>>, %arg16: memref<320x144xf32, #tpu.memory_space<vmem>>, %arg17: memref<320x32xf32, #tpu.memory_space<vmem>>, %arg18: memref<128x32xf32, #tpu.memory_space<vmem>>, %arg19: memref<96x288xf32, #tpu.memory_space<vmem>>) attributes {dimension_semantics = [], scalar_prefetch = 0 : i64, scratch_operands = 5 : i64, tpu.core_type = #tpu.core_type<tc>} {
    %cst = arith.constant 0.000000e+00 : f32
    %0 = vector.broadcast %cst : f32 to vector<368x16xf32>
    %c0 = arith.constant 0 : index
    %c0_0 = arith.constant 0 : index
    %1 = vector.load %arg15[%c0, %c0_0] : memref<368x16xf32, #tpu.memory_space<vmem>>, vector<368x16xf32>
    tpu.vector_store %arg15[%c0, %c0_0], %0 {strides = array<i32>} : memref<368x16xf32, #tpu.memory_space<vmem>>, vector<368x16xf32>,
    %cst_1 = arith.constant 0.000000e+00 : f32
    %2 = vector.broadcast %cst_1 : f32 to vector<128x32xf32>
    %c0_2 = arith.constant 0 : index
    %c0_3 = arith.constant 0 : index
    %3 = vector.load %arg18[%c0_2, %c0_3] : memref<128x32xf32, #tpu.memory_space<vmem>>, vector<128x32xf32>
    tpu.vector_store %arg18[%c0_2, %c0_3], %2 {strides = array<i32>} : memref<128x32xf32, #tpu.memory_space<vmem>>, vector<128x32xf32>,
    %c0_4 = arith.constant 0 : index
    %c0_5 = arith.constant 0 : index
    %4 = vector.load %arg0[%c0_4, %c0_5] : memref<512x9xf32, #tpu.memory_space<vmem>>, vector<512x9xf32>
    %c0_6 = arith.constant 0 : index
    %c0_7 = arith.constant 0 : index
    %5 = vector.load %arg1[%c0_6, %c0_7] : memref<9x16xf32, #tpu.memory_space<vmem>>, vector<9x16xf32>
    %cst_8 = arith.constant dense<0.000000e+00> : vector<512x16xf32>
    %6 = tpu.matmul %4, %5, %cst_8 {dimension_numbers = #tpu.dot_dimension_numbers<[1], [0], [0], [1], [0, 0, 1, 1], [], []>} : vector<512x9xf32>, vector<9x16xf32>, vector<512x16xf32> -> vector<512x16xf32>
    %c0_9 = arith.constant 0 : index
    %c0_10 = arith.constant 0 : index
    %7 = vector.load %arg2[%c0_9, %c0_10] : memref<1x16xf32, #tpu.memory_space<vmem>>, vector<1x16xf32>
    %8 = vector.broadcast %7 : vector<1x16xf32> to vector<512x16xf32>
    %9 = arith.mulf %6, %8 : vector<512x16xf32>
    %c0_11 = arith.constant 0 : index
    %c0_12 = arith.constant 0 : index
    %10 = vector.load %arg3[%c0_11, %c0_12] : memref<1x16xf32, #tpu.memory_space<vmem>>, vector<1x16xf32>
    %11 = vector.broadcast %10 : vector<1x16xf32> to vector<512x16xf32>
    %12 = arith.addf %9, %11 : vector<512x16xf32>
    %cst_13 = arith.constant 0.000000e+00 : f32
    %13 = vector.broadcast %cst_13 : f32 to vector<512x16xf32>
    %14 = arith.maximumf %12, %13 : vector<512x16xf32>
    %15 = vector.extract_strided_slice %14 {offsets = [0, 0], sizes = [128, 16], strides = [1, 1]} : vector<512x16xf32> to vector<128x16xf32>
    %16 = vector.extract_strided_slice %14 {offsets = [128, 0], sizes = [128, 16], strides = [1, 1]} : vector<512x16xf32> to vector<128x16xf32>
    %17 = arith.maximumf %15, %16 : vector<128x16xf32>
    %18 = vector.extract_strided_slice %14 {offsets = [256, 0], sizes = [128, 16], strides = [1, 1]} : vector<512x16xf32> to vector<128x16xf32>
    %19 = vector.extract_strided_slice %14 {offsets = [384, 0], sizes = [128, 16], strides = [1, 1]} : vector<512x16xf32> to vector<128x16xf32>
    %20 = arith.maximumf %18, %19 : vector<128x16xf32>
    %21 = arith.maximumf %17, %20 : vector<128x16xf32>
    %22 = vector.extract_strided_slice %21 {offsets = [0, 0], sizes = [8, 16], strides = [1, 1]} : vector<128x16xf32> to vector<8x16xf32>
    %c40 = arith.constant 40 : index
    %c0_14 = arith.constant 0 : index
    %23 = vector.load %arg15[%c40, %c0_14] : memref<368x16xf32, #tpu.memory_space<vmem>>, vector<8x16xf32>
    tpu.vector_store %arg15[%c40, %c0_14], %22 {strides = array<i32>} : memref<368x16xf32, #tpu.memory_space<vmem>>, vector<8x16xf32>,
    %24 = vector.extract_strided_slice %21 {offsets = [8, 0], sizes = [8, 16], strides = [1, 1]} : vector<128x16xf32> to vector<8x16xf32>
    %c56 = arith.constant 56 : index
    %c0_15 = arith.constant 0 : index
    %25 = vector.load %arg15[%c56, %c0_15] : memref<368x16xf32, #tpu.memory_space<vmem>>, vector<8x16xf32>
    tpu.vector_store %arg15[%c56, %c0_15], %24 {strides = array<i32>} : memref<368x16xf32, #tpu.memory_space<vmem>>, vector<8x16xf32>,
    %26 = vector.extract_strided_slice %21 {offsets = [16, 0], sizes = [8, 16], strides = [1, 1]} : vector<128x16xf32> to vector<8x16xf32>
    %c72 = arith.constant 72 : index
    %c0_16 = arith.constant 0 : index
    %27 = vector.load %arg15[%c72, %c0_16] : memref<368x16xf32, #tpu.memory_space<vmem>>, vector<8x16xf32>
    tpu.vector_store %arg15[%c72, %c0_16], %26 {strides = array<i32>} : memref<368x16xf32, #tpu.memory_space<vmem>>, vector<8x16xf32>,
    %28 = vector.extract_strided_slice %21 {offsets = [24, 0], sizes = [8, 16], strides = [1, 1]} : vector<128x16xf32> to vector<8x16xf32>
    %c88 = arith.constant 88 : index
    %c0_17 = arith.constant 0 : index
    %29 = vector.load %arg15[%c88, %c0_17] : memref<368x16xf32, #tpu.memory_space<vmem>>, vector<8x16xf32>
    tpu.vector_store %arg15[%c88, %c0_17], %28 {strides = array<i32>} : memref<368x16xf32, #tpu.memory_space<vmem>>, vector<8x16xf32>,
    %30 = vector.extract_strided_slice %21 {offsets = [32, 0], sizes = [8, 16], strides = [1, 1]} : vector<128x16xf32> to vector<8x16xf32>
    %c104 = arith.constant 104 : index
    %c0_18 = arith.constant 0 : index
    %31 = vector.load %arg15[%c104, %c0_18] : memref<368x16xf32, #tpu.memory_space<vmem>>, vector<8x16xf32>
    tpu.vector_store %arg15[%c104, %c0_18], %30 {strides = array<i32>} : memref<368x16xf32, #tpu.memory_space<vmem>>, vector<8x16xf32>,
    %32 = vector.extract_strided_slice %21 {offsets = [40, 0], sizes = [8, 16], strides = [1, 1]} : vector<128x16xf32> to vector<8x16xf32>
    %c120 = arith.constant 120 : index
    %c0_19 = arith.constant 0 : index
    %33 = vector.load %arg15[%c120, %c0_19] : memref<368x16xf32, #tpu.memory_space<vmem>>, vector<8x16xf32>
    tpu.vector_store %arg15[%c120, %c0_19], %32 {strides = array<i32>} : memref<368x16xf32, #tpu.memory_space<vmem>>, vector<8x16xf32>,
    %34 = vector.extract_strided_slice %21 {offsets = [48, 0], sizes = [8, 16], strides = [1, 1]} : vector<128x16xf32> to vector<8x16xf32>
    %c136 = arith.constant 136 : index
    %c0_20 = arith.constant 0 : index
    %35 = vector.load %arg15[%c136, %c0_20] : memref<368x16xf32, #tpu.memory_space<vmem>>, vector<8x16xf32>
    tpu.vector_store %arg15[%c136, %c0_20], %34 {strides = array<i32>} : memref<368x16xf32, #tpu.memory_space<vmem>>, vector<8x16xf32>,
    %36 = vector.extract_strided_slice %21 {offsets = [56, 0], sizes = [8, 16], strides = [1, 1]} : vector<128x16xf32> to vector<8x16xf32>
    %c152 = arith.constant 152 : index
    %c0_21 = arith.constant 0 : index
    %37 = vector.load %arg15[%c152, %c0_21] : memref<368x16xf32, #tpu.memory_space<vmem>>, vector<8x16xf32>
    tpu.vector_store %arg15[%c152, %c0_21], %36 {strides = array<i32>} : memref<368x16xf32, #tpu.memory_space<vmem>>, vector<8x16xf32>,
    %38 = vector.extract_strided_slice %21 {offsets = [64, 0], sizes = [8, 16], strides = [1, 1]} : vector<128x16xf32> to vector<8x16xf32>
    %c200 = arith.constant 200 : index
    %c0_22 = arith.constant 0 : index
    %39 = vector.load %arg15[%c200, %c0_22] : memref<368x16xf32, #tpu.memory_space<vmem>>, vector<8x16xf32>
    tpu.vector_store %arg15[%c200, %c0_22], %38 {strides = array<i32>} : memref<368x16xf32, #tpu.memory_space<vmem>>, vector<8x16xf32>,
    %40 = vector.extract_strided_slice %21 {offsets = [72, 0], sizes = [8, 16], strides = [1, 1]} : vector<128x16xf32> to vector<8x16xf32>
    %c216 = arith.constant 216 : index
    %c0_23 = arith.constant 0 : index
    %41 = vector.load %arg15[%c216, %c0_23] : memref<368x16xf32, #tpu.memory_space<vmem>>, vector<8x16xf32>
    tpu.vector_store %arg15[%c216, %c0_23], %40 {strides = array<i32>} : memref<368x16xf32, #tpu.memory_space<vmem>>, vector<8x16xf32>,
    %42 = vector.extract_strided_slice %21 {offsets = [80, 0], sizes = [8, 16], strides = [1, 1]} : vector<128x16xf32> to vector<8x16xf32>
    %c232 = arith.constant 232 : index
    %c0_24 = arith.constant 0 : index
    %43 = vector.load %arg15[%c232, %c0_24] : memref<368x16xf32, #tpu.memory_space<vmem>>, vector<8x16xf32>
    tpu.vector_store %arg15[%c232, %c0_24], %42 {strides = array<i32>} : memref<368x16xf32, #tpu.memory_space<vmem>>, vector<8x16xf32>,
    %44 = vector.extract_strided_slice %21 {offsets = [88, 0], sizes = [8, 16], strides = [1, 1]} : vector<128x16xf32> to vector<8x16xf32>
    %c248 = arith.constant 248 : index
    %c0_25 = arith.constant 0 : index
    %45 = vector.load %arg15[%c248, %c0_25] : memref<368x16xf32, #tpu.memory_space<vmem>>, vector<8x16xf32>
    tpu.vector_store %arg15[%c248, %c0_25], %44 {strides = array<i32>} : memref<368x16xf32, #tpu.memory_space<vmem>>, vector<8x16xf32>,
    %46 = vector.extract_strided_slice %21 {offsets = [96, 0], sizes = [8, 16], strides = [1, 1]} : vector<128x16xf32> to vector<8x16xf32>
    %c264 = arith.constant 264 : index
    %c0_26 = arith.constant 0 : index
    %47 = vector.load %arg15[%c264, %c0_26] : memref<368x16xf32, #tpu.memory_space<vmem>>, vector<8x16xf32>
    tpu.vector_store %arg15[%c264, %c0_26], %46 {strides = array<i32>} : memref<368x16xf32, #tpu.memory_space<vmem>>, vector<8x16xf32>,
    %48 = vector.extract_strided_slice %21 {offsets = [104, 0], sizes = [8, 16], strides = [1, 1]} : vector<128x16xf32> to vector<8x16xf32>
    %c280 = arith.constant 280 : index
    %c0_27 = arith.constant 0 : index
    %49 = vector.load %arg15[%c280, %c0_27] : memref<368x16xf32, #tpu.memory_space<vmem>>, vector<8x16xf32>
    tpu.vector_store %arg15[%c280, %c0_27], %48 {strides = array<i32>} : memref<368x16xf32, #tpu.memory_space<vmem>>, vector<8x16xf32>,
    %50 = vector.extract_strided_slice %21 {offsets = [112, 0], sizes = [8, 16], strides = [1, 1]} : vector<128x16xf32> to vector<8x16xf32>
    %c296 = arith.constant 296 : index
    %c0_28 = arith.constant 0 : index
    %51 = vector.load %arg15[%c296, %c0_28] : memref<368x16xf32, #tpu.memory_space<vmem>>, vector<8x16xf32>
    tpu.vector_store %arg15[%c296, %c0_28], %50 {strides = array<i32>} : memref<368x16xf32, #tpu.memory_space<vmem>>, vector<8x16xf32>,
    %52 = vector.extract_strided_slice %21 {offsets = [120, 0], sizes = [8, 16], strides = [1, 1]} : vector<128x16xf32> to vector<8x16xf32>
    %c312 = arith.constant 312 : index
    %c0_29 = arith.constant 0 : index
    %53 = vector.load %arg15[%c312, %c0_29] : memref<368x16xf32, #tpu.memory_space<vmem>>, vector<8x16xf32>
    tpu.vector_store %arg15[%c312, %c0_29], %52 {strides = array<i32>} : memref<368x16xf32, #tpu.memory_space<vmem>>, vector<8x16xf32>,
    %c7 = arith.constant 7 : index
    %c0_30 = arith.constant 0 : index
    %54 = vector.load %arg15[%c7, %c0_30] : memref<368x16xf32, #tpu.memory_space<vmem>>, vector<320x16xf32>
    %c0_31 = arith.constant 0 : index
    %c0_32 = arith.constant 0 : index
    %55 = vector.load %arg16[%c0_31, %c0_32] : memref<320x144xf32, #tpu.memory_space<vmem>>, vector<320x16xf32>
    tpu.vector_store %arg16[%c0_31, %c0_32], %54 {strides = array<i32>} : memref<320x144xf32, #tpu.memory_space<vmem>>, vector<320x16xf32>,
    %c8 = arith.constant 8 : index
    %c0_33 = arith.constant 0 : index
    %56 = vector.load %arg15[%c8, %c0_33] : memref<368x16xf32, #tpu.memory_space<vmem>>, vector<320x16xf32>
    %c0_34 = arith.constant 0 : index
    %c16 = arith.constant 16 : index
    %57 = vector.load %arg16[%c0_34, %c16] : memref<320x144xf32, #tpu.memory_space<vmem>>, vector<320x16xf32>
    tpu.vector_store %arg16[%c0_34, %c16], %56 {strides = array<i32>} : memref<320x144xf32, #tpu.memory_space<vmem>>, vector<320x16xf32>,
    %c9 = arith.constant 9 : index
    %c0_35 = arith.constant 0 : index
    %58 = vector.load %arg15[%c9, %c0_35] : memref<368x16xf32, #tpu.memory_space<vmem>>, vector<320x16xf32>
    %c0_36 = arith.constant 0 : index
    %c32 = arith.constant 32 : index
    %59 = vector.load %arg16[%c0_36, %c32] : memref<320x144xf32, #tpu.memory_space<vmem>>, vector<320x16xf32>
    tpu.vector_store %arg16[%c0_36, %c32], %58 {strides = array<i32>} : memref<320x144xf32, #tpu.memory_space<vmem>>, vector<320x16xf32>,
    %c23 = arith.constant 23 : index
    %c0_37 = arith.constant 0 : index
    %60 = vector.load %arg15[%c23, %c0_37] : memref<368x16xf32, #tpu.memory_space<vmem>>, vector<320x16xf32>
    %c0_38 = arith.constant 0 : index
    %c48 = arith.constant 48 : index
    %61 = vector.load %arg16[%c0_38, %c48] : memref<320x144xf32, #tpu.memory_space<vmem>>, vector<320x16xf32>
    tpu.vector_store %arg16[%c0_38, %c48], %60 {strides = array<i32>} : memref<320x144xf32, #tpu.memory_space<vmem>>, vector<320x16xf32>,
    %c24 = arith.constant 24 : index
    %c0_39 = arith.constant 0 : index
    %62 = vector.load %arg15[%c24, %c0_39] : memref<368x16xf32, #tpu.memory_space<vmem>>, vector<320x16xf32>
    %c0_40 = arith.constant 0 : index
    %c64 = arith.constant 64 : index
    %63 = vector.load %arg16[%c0_40, %c64] : memref<320x144xf32, #tpu.memory_space<vmem>>, vector<320x16xf32>
    tpu.vector_store %arg16[%c0_40, %c64], %62 {strides = array<i32>} : memref<320x144xf32, #tpu.memory_space<vmem>>, vector<320x16xf32>,
    %c25 = arith.constant 25 : index
    %c0_41 = arith.constant 0 : index
    %64 = vector.load %arg15[%c25, %c0_41] : memref<368x16xf32, #tpu.memory_space<vmem>>, vector<320x16xf32>
    %c0_42 = arith.constant 0 : index
    %c80 = arith.constant 80 : index
    %65 = vector.load %arg16[%c0_42, %c80] : memref<320x144xf32, #tpu.memory_space<vmem>>, vector<320x16xf32>
    tpu.vector_store %arg16[%c0_42, %c80], %64 {strides = array<i32>} : memref<320x144xf32, #tpu.memory_space<vmem>>, vector<320x16xf32>,
    %c39 = arith.constant 39 : index
    %c0_43 = arith.constant 0 : index
    %66 = vector.load %arg15[%c39, %c0_43] : memref<368x16xf32, #tpu.memory_space<vmem>>, vector<320x16xf32>
    %c0_44 = arith.constant 0 : index
    %c96 = arith.constant 96 : index
    %67 = vector.load %arg16[%c0_44, %c96] : memref<320x144xf32, #tpu.memory_space<vmem>>, vector<320x16xf32>
    tpu.vector_store %arg16[%c0_44, %c96], %66 {strides = array<i32>} : memref<320x144xf32, #tpu.memory_space<vmem>>, vector<320x16xf32>,
    %c40_45 = arith.constant 40 : index
    %c0_46 = arith.constant 0 : index
    %68 = vector.load %arg15[%c40_45, %c0_46] : memref<368x16xf32, #tpu.memory_space<vmem>>, vector<320x16xf32>
    %c0_47 = arith.constant 0 : index
    %c112 = arith.constant 112 : index
    %69 = vector.load %arg16[%c0_47, %c112] : memref<320x144xf32, #tpu.memory_space<vmem>>, vector<320x16xf32>
    tpu.vector_store %arg16[%c0_47, %c112], %68 {strides = array<i32>} : memref<320x144xf32, #tpu.memory_space<vmem>>, vector<320x16xf32>,
    %c41 = arith.constant 41 : index
    %c0_48 = arith.constant 0 : index
    %70 = vector.load %arg15[%c41, %c0_48] : memref<368x16xf32, #tpu.memory_space<vmem>>, vector<320x16xf32>
    %c0_49 = arith.constant 0 : index
    %c128 = arith.constant 128 : index
    %71 = vector.load %arg16[%c0_49, %c128] : memref<320x144xf32, #tpu.memory_space<vmem>>, vector<320x16xf32>
    tpu.vector_store %arg16[%c0_49, %c128], %70 {strides = array<i32>} : memref<320x144xf32, #tpu.memory_space<vmem>>, vector<320x16xf32>,
    %c0_50 = arith.constant 0 : index
    %c0_51 = arith.constant 0 : index
    %72 = vector.load %arg16[%c0_50, %c0_51] : memref<320x144xf32, #tpu.memory_space<vmem>>, vector<320x144xf32>
    %c0_52 = arith.constant 0 : index
    %c0_53 = arith.constant 0 : index
    %73 = vector.load %arg4[%c0_52, %c0_53] : memref<144x32xf32, #tpu.memory_space<vmem>>, vector<144x32xf32>
    %cst_54 = arith.constant dense<0.000000e+00> : vector<320x32xf32>
    %74 = tpu.matmul %72, %73, %cst_54 {dimension_numbers = #tpu.dot_dimension_numbers<[1], [0], [0], [1], [0, 0, 1, 1], [], []>} : vector<320x144xf32>, vector<144x32xf32>, vector<320x32xf32> -> vector<320x32xf32>
    %c0_55 = arith.constant 0 : index
    %c0_56 = arith.constant 0 : index
    %75 = vector.load %arg5[%c0_55, %c0_56] : memref<1x32xf32, #tpu.memory_space<vmem>>, vector<1x32xf32>
    %76 = vector.broadcast %75 : vector<1x32xf32> to vector<320x32xf32>
    %77 = arith.mulf %74, %76 : vector<320x32xf32>
    %c0_57 = arith.constant 0 : index
    %c0_58 = arith.constant 0 : index
    %78 = vector.load %arg6[%c0_57, %c0_58] : memref<1x32xf32, #tpu.memory_space<vmem>>, vector<1x32xf32>
    %79 = vector.broadcast %78 : vector<1x32xf32> to vector<320x32xf32>
    %80 = arith.addf %77, %79 : vector<320x32xf32>
    %cst_59 = arith.constant 0.000000e+00 : f32
    %81 = vector.broadcast %cst_59 : f32 to vector<320x32xf32>
    %82 = arith.maximumf %80, %81 : vector<320x32xf32>
    %c0_60 = arith.constant 0 : index
    %c0_61 = arith.constant 0 : index
    %83 = vector.load %arg17[%c0_60, %c0_61] : memref<320x32xf32, #tpu.memory_space<vmem>>, vector<320x32xf32>
    tpu.vector_store %arg17[%c0_60, %c0_61], %82 {strides = array<i32>} : memref<320x32xf32, #tpu.memory_space<vmem>>, vector<320x32xf32>,
    %c0_62 = arith.constant 0 : index
    %c0_63 = arith.constant 0 : index
    %84 = tpu.strided_load %arg17[%c0_62, %c0_63] {strides = array<i32: 2, 1>} : memref<320x32xf32, #tpu.memory_space<vmem>>, vector<140x32xf32>
    %c1 = arith.constant 1 : index
    %c0_64 = arith.constant 0 : index
    %85 = tpu.strided_load %arg17[%c1, %c0_64] {strides = array<i32: 2, 1>} : memref<320x32xf32, #tpu.memory_space<vmem>>, vector<140x32xf32>
    %86 = arith.maximumf %84, %85 : vector<140x32xf32>
    %c16_65 = arith.constant 16 : index
    %c0_66 = arith.constant 0 : index
    %87 = tpu.strided_load %arg17[%c16_65, %c0_66] {strides = array<i32: 2, 1>} : memref<320x32xf32, #tpu.memory_space<vmem>>, vector<140x32xf32>
    %c17 = arith.constant 17 : index
    %c0_67 = arith.constant 0 : index
    %88 = tpu.strided_load %arg17[%c17, %c0_67] {strides = array<i32: 2, 1>} : memref<320x32xf32, #tpu.memory_space<vmem>>, vector<140x32xf32>
    %89 = arith.maximumf %87, %88 : vector<140x32xf32>
    %90 = arith.maximumf %86, %89 : vector<140x32xf32>
    %91 = vector.extract_strided_slice %90 {offsets = [8, 0], sizes = [4, 32], strides = [1, 1]} : vector<140x32xf32> to vector<4x32xf32>
    %c24_68 = arith.constant 24 : index
    %c0_69 = arith.constant 0 : index
    %92 = vector.load %arg18[%c24_68, %c0_69] : memref<128x32xf32, #tpu.memory_space<vmem>>, vector<4x32xf32>
    tpu.vector_store %arg18[%c24_68, %c0_69], %91 {strides = array<i32>} : memref<128x32xf32, #tpu.memory_space<vmem>>, vector<4x32xf32>,
    %93 = vector.extract_strided_slice %90 {offsets = [24, 0], sizes = [4, 32], strides = [1, 1]} : vector<140x32xf32> to vector<4x32xf32>
    %c32_70 = arith.constant 32 : index
    %c0_71 = arith.constant 0 : index
    %94 = vector.load %arg18[%c32_70, %c0_71] : memref<128x32xf32, #tpu.memory_space<vmem>>, vector<4x32xf32>
    tpu.vector_store %arg18[%c32_70, %c0_71], %93 {strides = array<i32>} : memref<128x32xf32, #tpu.memory_space<vmem>>, vector<4x32xf32>,
    %95 = vector.extract_strided_slice %90 {offsets = [40, 0], sizes = [4, 32], strides = [1, 1]} : vector<140x32xf32> to vector<4x32xf32>
    %c40_72 = arith.constant 40 : index
    %c0_73 = arith.constant 0 : index
    %96 = vector.load %arg18[%c40_72, %c0_73] : memref<128x32xf32, #tpu.memory_space<vmem>>, vector<4x32xf32>
    tpu.vector_store %arg18[%c40_72, %c0_73], %95 {strides = array<i32>} : memref<128x32xf32, #tpu.memory_space<vmem>>, vector<4x32xf32>,
    %97 = vector.extract_strided_slice %90 {offsets = [56, 0], sizes = [4, 32], strides = [1, 1]} : vector<140x32xf32> to vector<4x32xf32>
    %c48_74 = arith.constant 48 : index
    %c0_75 = arith.constant 0 : index
    %98 = vector.load %arg18[%c48_74, %c0_75] : memref<128x32xf32, #tpu.memory_space<vmem>>, vector<4x32xf32>
    tpu.vector_store %arg18[%c48_74, %c0_75], %97 {strides = array<i32>} : memref<128x32xf32, #tpu.memory_space<vmem>>, vector<4x32xf32>,
    %99 = vector.extract_strided_slice %90 {offsets = [88, 0], sizes = [4, 32], strides = [1, 1]} : vector<140x32xf32> to vector<4x32xf32>
    %c72_76 = arith.constant 72 : index
    %c0_77 = arith.constant 0 : index
    %100 = vector.load %arg18[%c72_76, %c0_77] : memref<128x32xf32, #tpu.memory_space<vmem>>, vector<4x32xf32>
    tpu.vector_store %arg18[%c72_76, %c0_77], %99 {strides = array<i32>} : memref<128x32xf32, #tpu.memory_space<vmem>>, vector<4x32xf32>,
    %101 = vector.extract_strided_slice %90 {offsets = [104, 0], sizes = [4, 32], strides = [1, 1]} : vector<140x32xf32> to vector<4x32xf32>
    %c80_78 = arith.constant 80 : index
    %c0_79 = arith.constant 0 : index
    %102 = vector.load %arg18[%c80_78, %c0_79] : memref<128x32xf32, #tpu.memory_space<vmem>>, vector<4x32xf32>
    tpu.vector_store %arg18[%c80_78, %c0_79], %101 {strides = array<i32>} : memref<128x32xf32, #tpu.memory_space<vmem>>, vector<4x32xf32>,
    %103 = vector.extract_strided_slice %90 {offsets = [120, 0], sizes = [4, 32], strides = [1, 1]} : vector<140x32xf32> to vector<4x32xf32>
    %c88_80 = arith.constant 88 : index
    %c0_81 = arith.constant 0 : index
    %104 = vector.load %arg18[%c88_80, %c0_81] : memref<128x32xf32, #tpu.memory_space<vmem>>, vector<4x32xf32>
    tpu.vector_store %arg18[%c88_80, %c0_81], %103 {strides = array<i32>} : memref<128x32xf32, #tpu.memory_space<vmem>>, vector<4x32xf32>,
    %105 = vector.extract_strided_slice %90 {offsets = [136, 0], sizes = [4, 32], strides = [1, 1]} : vector<140x32xf32> to vector<4x32xf32>
    %c96_82 = arith.constant 96 : index
    %c0_83 = arith.constant 0 : index
    %106 = vector.load %arg18[%c96_82, %c0_83] : memref<128x32xf32, #tpu.memory_space<vmem>>, vector<4x32xf32>
    tpu.vector_store %arg18[%c96_82, %c0_83], %105 {strides = array<i32>} : memref<128x32xf32, #tpu.memory_space<vmem>>, vector<4x32xf32>,
    %c7_84 = arith.constant 7 : index
    %c0_85 = arith.constant 0 : index
    %107 = vector.load %arg18[%c7_84, %c0_85] : memref<128x32xf32, #tpu.memory_space<vmem>>, vector<96x32xf32>
    %c0_86 = arith.constant 0 : index
    %c0_87 = arith.constant 0 : index
    %108 = vector.load %arg19[%c0_86, %c0_87] : memref<96x288xf32, #tpu.memory_space<vmem>>, vector<96x32xf32>
    tpu.vector_store %arg19[%c0_86, %c0_87], %107 {strides = array<i32>} : memref<96x288xf32, #tpu.memory_space<vmem>>, vector<96x32xf32>,
    %c8_88 = arith.constant 8 : index
    %c0_89 = arith.constant 0 : index
    %109 = vector.load %arg18[%c8_88, %c0_89] : memref<128x32xf32, #tpu.memory_space<vmem>>, vector<96x32xf32>
    %c0_90 = arith.constant 0 : index
    %c32_91 = arith.constant 32 : index
    %110 = vector.load %arg19[%c0_90, %c32_91] : memref<96x288xf32, #tpu.memory_space<vmem>>, vector<96x32xf32>
    tpu.vector_store %arg19[%c0_90, %c32_91], %109 {strides = array<i32>} : memref<96x288xf32, #tpu.memory_space<vmem>>, vector<96x32xf32>,
    %c9_92 = arith.constant 9 : index
    %c0_93 = arith.constant 0 : index
    %111 = vector.load %arg18[%c9_92, %c0_93] : memref<128x32xf32, #tpu.memory_space<vmem>>, vector<96x32xf32>
    %c0_94 = arith.constant 0 : index
    %c64_95 = arith.constant 64 : index
    %112 = vector.load %arg19[%c0_94, %c64_95] : memref<96x288xf32, #tpu.memory_space<vmem>>, vector<96x32xf32>
    tpu.vector_store %arg19[%c0_94, %c64_95], %111 {strides = array<i32>} : memref<96x288xf32, #tpu.memory_space<vmem>>, vector<96x32xf32>,
    %c15 = arith.constant 15 : index
    %c0_96 = arith.constant 0 : index
    %113 = vector.load %arg18[%c15, %c0_96] : memref<128x32xf32, #tpu.memory_space<vmem>>, vector<96x32xf32>
    %c0_97 = arith.constant 0 : index
    %c96_98 = arith.constant 96 : index
    %114 = vector.load %arg19[%c0_97, %c96_98] : memref<96x288xf32, #tpu.memory_space<vmem>>, vector<96x32xf32>
    tpu.vector_store %arg19[%c0_97, %c96_98], %113 {strides = array<i32>} : memref<96x288xf32, #tpu.memory_space<vmem>>, vector<96x32xf32>,
    %c16_99 = arith.constant 16 : index
    %c0_100 = arith.constant 0 : index
    %115 = vector.load %arg18[%c16_99, %c0_100] : memref<128x32xf32, #tpu.memory_space<vmem>>, vector<96x32xf32>
    %c0_101 = arith.constant 0 : index
    %c128_102 = arith.constant 128 : index
    %116 = vector.load %arg19[%c0_101, %c128_102] : memref<96x288xf32, #tpu.memory_space<vmem>>, vector<96x32xf32>
    tpu.vector_store %arg19[%c0_101, %c128_102], %115 {strides = array<i32>} : memref<96x288xf32, #tpu.memory_space<vmem>>, vector<96x32xf32>,
    %c17_103 = arith.constant 17 : index
    %c0_104 = arith.constant 0 : index
    %117 = vector.load %arg18[%c17_103, %c0_104] : memref<128x32xf32, #tpu.memory_space<vmem>>, vector<96x32xf32>
    %c0_105 = arith.constant 0 : index
    %c160 = arith.constant 160 : index
    %118 = vector.load %arg19[%c0_105, %c160] : memref<96x288xf32, #tpu.memory_space<vmem>>, vector<96x32xf32>
    tpu.vector_store %arg19[%c0_105, %c160], %117 {strides = array<i32>} : memref<96x288xf32, #tpu.memory_space<vmem>>, vector<96x32xf32>,
    %c23_106 = arith.constant 23 : index
    %c0_107 = arith.constant 0 : index
    %119 = vector.load %arg18[%c23_106, %c0_107] : memref<128x32xf32, #tpu.memory_space<vmem>>, vector<96x32xf32>
    %c0_108 = arith.constant 0 : index
    %c192 = arith.constant 192 : index
    %120 = vector.load %arg19[%c0_108, %c192] : memref<96x288xf32, #tpu.memory_space<vmem>>, vector<96x32xf32>
    tpu.vector_store %arg19[%c0_108, %c192], %119 {strides = array<i32>} : memref<96x288xf32, #tpu.memory_space<vmem>>, vector<96x32xf32>,
    %c24_109 = arith.constant 24 : index
    %c0_110 = arith.constant 0 : index
    %121 = vector.load %arg18[%c24_109, %c0_110] : memref<128x32xf32, #tpu.memory_space<vmem>>, vector<96x32xf32>
    %c0_111 = arith.constant 0 : index
    %c224 = arith.constant 224 : index
    %122 = vector.load %arg19[%c0_111, %c224] : memref<96x288xf32, #tpu.memory_space<vmem>>, vector<96x32xf32>
    tpu.vector_store %arg19[%c0_111, %c224], %121 {strides = array<i32>} : memref<96x288xf32, #tpu.memory_space<vmem>>, vector<96x32xf32>,
    %c25_112 = arith.constant 25 : index
    %c0_113 = arith.constant 0 : index
    %123 = vector.load %arg18[%c25_112, %c0_113] : memref<128x32xf32, #tpu.memory_space<vmem>>, vector<96x32xf32>
    %c0_114 = arith.constant 0 : index
    %c256 = arith.constant 256 : index
    %124 = vector.load %arg19[%c0_114, %c256] : memref<96x288xf32, #tpu.memory_space<vmem>>, vector<96x32xf32>
    tpu.vector_store %arg19[%c0_114, %c256], %123 {strides = array<i32>} : memref<96x288xf32, #tpu.memory_space<vmem>>, vector<96x32xf32>,
    %c0_115 = arith.constant 0 : index
    %c0_116 = arith.constant 0 : index
    %125 = vector.load %arg19[%c0_115, %c0_116] : memref<96x288xf32, #tpu.memory_space<vmem>>, vector<96x288xf32>
    %c0_117 = arith.constant 0 : index
    %c0_118 = arith.constant 0 : index
    %126 = vector.load %arg7[%c0_117, %c0_118] : memref<288x64xf32, #tpu.memory_space<vmem>>, vector<288x64xf32>
    %cst_119 = arith.constant dense<0.000000e+00> : vector<96x64xf32>
    %127 = tpu.matmul %125, %126, %cst_119 {dimension_numbers = #tpu.dot_dimension_numbers<[1], [0], [0], [1], [0, 0, 1, 1], [], []>} : vector<96x288xf32>, vector<288x64xf32>, vector<96x64xf32> -> vector<96x64xf32>
    %c0_120 = arith.constant 0 : index
    %c0_121 = arith.constant 0 : index
    %128 = vector.load %arg8[%c0_120, %c0_121] : memref<1x64xf32, #tpu.memory_space<vmem>>, vector<1x64xf32>
    %129 = vector.broadcast %128 : vector<1x64xf32> to vector<96x64xf32>
    %130 = arith.mulf %127, %129 : vector<96x64xf32>
    %c0_122 = arith.constant 0 : index
    %c0_123 = arith.constant 0 : index
    %131 = vector.load %arg9[%c0_122, %c0_123] : memref<1x64xf32, #tpu.memory_space<vmem>>, vector<1x64xf32>
    %132 = vector.broadcast %131 : vector<1x64xf32> to vector<96x64xf32>
    %133 = arith.addf %130, %132 : vector<96x64xf32>
    %cst_124 = arith.constant 0.000000e+00 : f32
    %134 = vector.broadcast %cst_124 : f32 to vector<96x64xf32>
    %135 = arith.maximumf %133, %134 : vector<96x64xf32>
    %136 = vector.extract_strided_slice %135 {offsets = [8, 0], sizes = [4, 64], strides = [1, 1]} : vector<96x64xf32> to vector<4x64xf32>
    %137 = vector.extract_strided_slice %135 {offsets = [16, 0], sizes = [4, 64], strides = [1, 1]} : vector<96x64xf32> to vector<4x64xf32>
    %138 = arith.addf %136, %137 : vector<4x64xf32>
    %139 = vector.extract_strided_slice %135 {offsets = [24, 0], sizes = [4, 64], strides = [1, 1]} : vector<96x64xf32> to vector<4x64xf32>
    %140 = arith.addf %138, %139 : vector<4x64xf32>
    %141 = vector.extract_strided_slice %135 {offsets = [32, 0], sizes = [4, 64], strides = [1, 1]} : vector<96x64xf32> to vector<4x64xf32>
    %142 = arith.addf %140, %141 : vector<4x64xf32>
    %cst_125 = arith.constant dense<0.000000e+00> : vector<64xf32>
    %143 = vector.multi_reduction <add>, %142, %cst_125 [0] : vector<4x64xf32> to vector<64xf32>
    %144 = vector.shape_cast %143 : vector<64xf32> to vector<1x64xf32>
    %cst_126 = arith.constant 6.250000e-02 : f32
    %145 = vector.broadcast %cst_126 : f32 to vector<1x64xf32>
    %146 = arith.mulf %144, %145 : vector<1x64xf32>
    %147 = vector.extract_strided_slice %135 {offsets = [56, 0], sizes = [4, 64], strides = [1, 1]} : vector<96x64xf32> to vector<4x64xf32>
    %148 = vector.extract_strided_slice %135 {offsets = [64, 0], sizes = [4, 64], strides = [1, 1]} : vector<96x64xf32> to vector<4x64xf32>
    %149 = arith.addf %147, %148 : vector<4x64xf32>
    %150 = vector.extract_strided_slice %135 {offsets = [72, 0], sizes = [4, 64], strides = [1, 1]} : vector<96x64xf32> to vector<4x64xf32>
    %151 = arith.addf %149, %150 : vector<4x64xf32>
    %152 = vector.extract_strided_slice %135 {offsets = [80, 0], sizes = [4, 64], strides = [1, 1]} : vector<96x64xf32> to vector<4x64xf32>
    %153 = arith.addf %151, %152 : vector<4x64xf32>
    %cst_127 = arith.constant dense<0.000000e+00> : vector<64xf32>
    %154 = vector.multi_reduction <add>, %153, %cst_127 [0] : vector<4x64xf32> to vector<64xf32>
    %155 = vector.shape_cast %154 : vector<64xf32> to vector<1x64xf32>
    %cst_128 = arith.constant 6.250000e-02 : f32
    %156 = vector.broadcast %cst_128 : f32 to vector<1x64xf32>
    %157 = arith.mulf %155, %156 : vector<1x64xf32>
    %158 = tpu.concatenate %146, %157 in 0 : vector<1x64xf32>, vector<1x64xf32> -> vector<2x64xf32>
    %c0_129 = arith.constant 0 : index
    %c0_130 = arith.constant 0 : index
    %159 = vector.load %arg10[%c0_129, %c0_130] : memref<64x32xf32, #tpu.memory_space<vmem>>, vector<64x32xf32>
    %cst_131 = arith.constant dense<0.000000e+00> : vector<2x32xf32>
    %160 = tpu.matmul %158, %159, %cst_131 {dimension_numbers = #tpu.dot_dimension_numbers<[1], [0], [0], [1], [0, 0, 1, 1], [], []>} : vector<2x64xf32>, vector<64x32xf32>, vector<2x32xf32> -> vector<2x32xf32>
    %c0_132 = arith.constant 0 : index
    %c0_133 = arith.constant 0 : index
    %161 = vector.load %arg11[%c0_132, %c0_133] : memref<1x32xf32, #tpu.memory_space<vmem>>, vector<1x32xf32>
    %162 = vector.broadcast %161 : vector<1x32xf32> to vector<2x32xf32>
    %163 = arith.addf %160, %162 : vector<2x32xf32>
    %cst_134 = arith.constant 0.000000e+00 : f32
    %164 = vector.broadcast %cst_134 : f32 to vector<2x32xf32>
    %165 = arith.maximumf %163, %164 : vector<2x32xf32>
    %c0_135 = arith.constant 0 : index
    %c0_136 = arith.constant 0 : index
    %166 = vector.load %arg12[%c0_135, %c0_136] : memref<32x2xf32, #tpu.memory_space<vmem>>, vector<32x2xf32>
    %cst_137 = arith.constant dense<0.000000e+00> : vector<2x2xf32>
    %167 = tpu.matmul %165, %166, %cst_137 {dimension_numbers = #tpu.dot_dimension_numbers<[1], [0], [0], [1], [0, 0, 1, 1], [], []>} : vector<2x32xf32>, vector<32x2xf32>, vector<2x2xf32> -> vector<2x2xf32>
    %c0_138 = arith.constant 0 : index
    %c0_139 = arith.constant 0 : index
    %168 = vector.load %arg13[%c0_138, %c0_139] : memref<1x2xf32, #tpu.memory_space<vmem>>, vector<1x2xf32>
    %169 = vector.broadcast %168 : vector<1x2xf32> to vector<2x2xf32>
    %170 = arith.addf %167, %169 : vector<2x2xf32>
    %c0_140 = arith.constant 0 : index
    %c0_141 = arith.constant 0 : index
    %171 = vector.load %arg14[%c0_140, %c0_141] : memref<2x2xf32, #tpu.memory_space<vmem>>, vector<2x2xf32>
    tpu.vector_store %arg14[%c0_140, %c0_141], %170 {strides = array<i32>} : memref<2x2xf32, #tpu.memory_space<vmem>>, vector<2x2xf32>,
    return
  }
}

</mosaic_0001>

<bundles_post_ra>
// kernel: audio_classifier_forward.1
= control target key start
LH: loop header
LB: loop body
LE: loop exit
PB: predicated region body
PF: predicated region fallthrough
CT: control target
= control target key end

     0   :  { %vm371_vm0 = vcmask 1040384   ;;  %vm178_vm1 = vcmask 72704   ;;  %vm48_vm2 = vcmask 130048   ;;  %v7820_v4 = vmov 0.0   ;;  %s5225_s23 = smov 16   ;;  %s7805_s0 = inlined_call_operand.vmem [shape: f32[512,9], index: 0, kind: input, shape index: {}]   ;;  %s7806_s1 = inlined_call_operand.vmem [shape: f32[9,16], index: 1, kind: input, shape index: {}]   ;;  %s7807_s2 = inlined_call_operand.vmem [shape: f32[1,16], index: 2, kind: input, shape index: {}]   ;;  %s7808_s3 = inlined_call_operand.vmem [shape: f32[1,16], index: 3, kind: input, shape index: {}]   ;;  %s7809_s4 = inlined_call_operand.vmem [shape: f32[144,32], index: 4, kind: input, shape index: {}]   ;;  %s7810_s5 = inlined_call_operand.vmem [shape: f32[1,32], index: 5, kind: input, shape index: {}]   ;;  %s7811_s6 = inlined_call_operand.vmem [shape: f32[1,32], index: 6, kind: input, shape index: {}]   ;;  %s7812_s7 = inlined_call_operand.vmem [shape: f32[288,64], index: 7, kind: input, shape index: {}]   ;;  %s7813_s8 = inlined_call_operand.vmem [shape: f32[1,64], index: 8, kind: input, shape index: {}]   ;;  %s7814_s9 = inlined_call_operand.vmem [shape: f32[1,64], index: 9, kind: input, shape index: {}]   ;;  %s7815_s10 = inlined_call_operand.vmem [shape: f32[64,32], index: 10, kind: input, shape index: {}]   ;;  %s7816_s11 = inlined_call_operand.vmem [shape: f32[1,32], index: 11, kind: input, shape index: {}]   ;;  %s7817_s12 = inlined_call_operand.vmem [shape: f32[32,2], index: 12, kind: input, shape index: {}]   ;;  %s7818_s13 = inlined_call_operand.vmem [shape: f32[1,2], index: 13, kind: input, shape index: {}]   ;;  %s7819_s14 = inlined_call_operand.hbm [shape: f32[2,2], index: 14, kind: output, shape index: {}]  }
   0x1   :  { %v177_v0 = vld [vmem:[%s7806_s1 + $0x8] sm:$0x1]  ;;  %v176_v1 = vld [vmem:[%s7806_s1] sm:$0xff]  ;;  %50 = vst.msk [vmem:[#allocation2 + $0x8] sm:$0xff] %vm48_vm2, %v7820_v4  ;;  %49 = vst.msk [vmem:[#allocation2] sm:$0xff] %vm48_vm2, %v7820_v4  ;;  %3095 = vmatprep.subr.mxu1 %v7820_v4 }
   0x2   :  { %v112_v2 = vld [vmem:[%s7805_s0] sm:$0xff]  ;;  %5031 = vmatprep.subr.msk.mxu0 %vm371_vm0, %v177_v0  ;;  %v113_v3 = vld [vmem:[%s7805_s0 + $0x8] sm:$0xff]  ;;  %51 = vst.msk [vmem:[#allocation2 + $0x10] sm:$0xff] %vm48_vm2, %v7820_v4  ;;  %52 = vst.msk [vmem:[#allocation2 + $0x18] sm:$0xff] %vm48_vm2, %v7820_v4 }
   0x3   :  { %5035 = vmatprep.mubr.msk.f32.mxu0 %vm178_vm1, %v112_v2  ;;  %5032 = vmatpush3.msk.msra.mxu0 %vm371_vm0, %v177_v0  ;;  %53 = vst.msk [vmem:[#allocation2 + $0x20] sm:$0xff] %vm48_vm2, %v7820_v4  ;;  %54 = vst.msk [vmem:[#allocation2 + $0x28] sm:$0xff] %vm48_vm2, %v7820_v4  ;;  %v114_v5 = vld [vmem:[%s7805_s0 + $0x10] sm:$0xff]  ;;  %v115_v6 = vld [vmem:[%s7805_s0 + $0x18] sm:$0xff] }
   0x4   :  { %55 = vst.msk [vmem:[#allocation2 + $0x30] sm:$0xff] %vm48_vm2, %v7820_v4  ;;  %56 = vst.msk [vmem:[#allocation2 + $0x38] sm:$0xff] %vm48_vm2, %v7820_v4  ;;  %5033 = vmatprep.subr.mxu0 %v176_v1  ;;  %v116_v7 = vld [vmem:[%s7805_s0 + $0x20] sm:$0xff]  ;;  %v117_v8 = vld [vmem:[%s7805_s0 + $0x28] sm:$0xff] }
   0x5   :  { %57 = vst.msk [vmem:[#allocation2 + $0x40] sm:$0xff] %vm48_vm2, %v7820_v4  ;;  %58 = vst.msk [vmem:[#allocation2 + $0x48] sm:$0xff] %vm48_vm2, %v7820_v4  ;;  %5034 = vmatpush3.msra.mxu0 %v176_v1  ;;  %v118_v9 = vld [vmem:[%s7805_s0 + $0x30] sm:$0xff]  ;;  %v119_v10 = vld [vmem:[%s7805_s0 + $0x38] sm:$0xff] }
   0x6   :  { %59 = vst.msk [vmem:[#allocation2 + $0x50] sm:$0xff] %vm48_vm2, %v7820_v4  ;;  %60 = vst.msk [vmem:[#allocation2 + $0x58] sm:$0xff] %vm48_vm2, %v7820_v4  ;;  %5036 = vmatmul.mubr.msk.f32.vlgmr.msra.gmra.mxu0 %vm178_vm1, %v113_v3  ;;  %v120_v11 = vld [vmem:[%s7805_s0 + $0x40] sm:$0xff]  ;;  %v121_v12 = vld [vmem:[%s7805_s0 + $0x48] sm:$0xff] }
   0x7   :  { %61 = vst.msk [vmem:[#allocation2 + $0x60] sm:$0xff] %vm48_vm2, %v7820_v4  ;;  %62 = vst.msk [vmem:[#allocation2 + $0x68] sm:$0xff] %vm48_vm2, %v7820_v4  ;;  %5038 = vmatprep.mubr.msk.f32.mxu0 %vm178_vm1, %v114_v5  ;;  %v122_v13 = vld [vmem:[%s7805_s0 + $0x50] sm:$0xff]  ;;  %v123_v15 = vld [vmem:[%s7805_s0 + $0x58] sm:$0xff] }
   0x8   :  { %63 = vst.msk [vmem:[#allocation2 + $0x70] sm:$0xff] %vm48_vm2, %v7820_v4  ;;  %64 = vst.msk [vmem:[#allocation2 + $0x78] sm:$0xff] %vm48_vm2, %v7820_v4  ;;  %v1110_v14 = vld [vmem:[#allocation2 + $0x8] sm:$0xff]  ;;  %v124_v16 = vld [vmem:[%s7805_s0 + $0x60] sm:$0xff] }
   0x9   :  { %65 = vst.msk [vmem:[#allocation2 + $0x80] sm:$0xff] %vm48_vm2, %v7820_v4  ;;  %66 = vst.msk [vmem:[#allocation2 + $0x88] sm:$0xff] %vm48_vm2, %v7820_v4  ;;  %1190 = vrot.lane.b32.xlu0 %v1110_v14, %s5225_s23  ;;  %v1351_v17 = vld [vmem:[#allocation2 + $0x9] sm:$0xff] }
   0xa   :  { %67 = vst.msk [vmem:[#allocation2 + $0x90] sm:$0xff] %vm48_vm2, %v7820_v4  ;;  %68 = vst.msk [vmem:[#allocation2 + $0x98] sm:$0xff] %vm48_vm2, %v7820_v4  ;;  %5039 = vmatmul.mubr.msk.f32.gmra.mxu0 %vm178_vm1, %v115_v6  ;;  %v1593_v18 = vld [vmem:[#allocation2 + $0x1f] sm:$0xff] }
   0xb   :  { %69 = vst.msk [vmem:[#allocation2 + $0xa0] sm:$0xff] %vm48_vm2, %v7820_v4  ;;  %70 = vst.msk [vmem:[#allocation2 + $0xa8] sm:$0xff] %vm48_vm2, %v7820_v4  ;;  %5041 = vmatprep.mubr.msk.f32.mxu0 %vm178_vm1, %v116_v7 }
   0xc   :  { %71 = vst.msk [vmem:[#allocation2 + $0xb0] sm:$0xff] %vm48_vm2, %v7820_v4  ;;  %72 = vst.msk [vmem:[#allocation2 + $0xb8] sm:$0xff] %vm48_vm2, %v7820_v4 }
   0xd   :  { %73 = vst.msk [vmem:[#allocation2 + $0xc0] sm:$0xff] %vm48_vm2, %v7820_v4  ;;  %74 = vst.msk [vmem:[#allocation2 + $0xc8] sm:$0xff] %vm48_vm2, %v7820_v4 }
   0xe   :  { %75 = vst.msk [vmem:[#allocation2 + $0xd0] sm:$0xff] %vm48_vm2, %v7820_v4  ;;  %76 = vst.msk [vmem:[#allocation2 + $0xd8] sm:$0xff] %vm48_vm2, %v7820_v4  ;;  %5042 = vmatmul.mubr.msk.f32.gmra.mxu0 %vm178_vm1, %v117_v8 }
   0xf   :  { %77 = vst.msk [vmem:[#allocation2 + $0xe0] sm:$0xff] %vm48_vm2, %v7820_v4  ;;  %78 = vst.msk [vmem:[#allocation2 + $0xe8] sm:$0xff] %vm48_vm2, %v7820_v4  ;;  %5044 = vmatprep.mubr.msk.f32.mxu0 %vm178_vm1, %v118_v9 }
  0x10   :  { %79 = vst.msk [vmem:[#allocation2 + $0xf0] sm:$0xff] %vm48_vm2, %v7820_v4  ;;  %80 = vst.msk [vmem:[#allocation2 + $0xf8] sm:$0xff] %vm48_vm2, %v7820_v4 }
  0x11   :  { %81 = vst.msk [vmem:[#allocation2 + $0x100] sm:$0xff] %vm48_vm2, %v7820_v4  ;;  %82 = vst.msk [vmem:[#allocation2 + $0x108] sm:$0xff] %vm48_vm2, %v7820_v4 }
  0x12   :  { %83 = vst.msk [vmem:[#allocation2 + $0x110] sm:$0xff] %vm48_vm2, %v7820_v4  ;;  %84 = vst.msk [vmem:[#allocation2 + $0x118] sm:$0xff] %vm48_vm2, %v7820_v4  ;;  %5045 = vmatmul.mubr.msk.f32.gmra.mxu0 %vm178_vm1, %v119_v10 }
  0x13   :  { %85 = vst.msk [vmem:[#allocation2 + $0x120] sm:$0xff] %vm48_vm2, %v7820_v4  ;;  %86 = vst.msk [vmem:[#allocation2 + $0x128] sm:$0xff] %vm48_vm2, %v7820_v4  ;;  %5047 = vmatprep.mubr.msk.f32.mxu0 %vm178_vm1, %v120_v11 }
  0x14   :  { %87 = vst.msk [vmem:[#allocation2 + $0x130] sm:$0xff] %vm48_vm2, %v7820_v4  ;;  %88 = vst.msk [vmem:[#allocation2 + $0x138] sm:$0xff] %vm48_vm2, %v7820_v4 }
  0x15   :  { %89 = vst.msk [vmem:[#allocation2 + $0x140] sm:$0xff] %vm48_vm2, %v7820_v4  ;;  %90 = vst.msk [vmem:[#allocation2 + $0x148] sm:$0xff] %vm48_vm2, %v7820_v4 }
  0x16   :  { %91 = vst.msk [vmem:[#allocation2 + $0x150] sm:$0xff] %vm48_vm2, %v7820_v4  ;;  %92 = vst.msk [vmem:[#allocation2 + $0x158] sm:$0xff] %vm48_vm2, %v7820_v4  ;;  %5048 = vmatmul.mubr.msk.f32.gmra.mxu0 %vm178_vm1, %v121_v12 }
  0x17   :  { %93 = vst.msk [vmem:[#allocation2 + $0x160] sm:$0xff] %vm48_vm2, %v7820_v4  ;;  %94 = vst.msk [vmem:[#allocation2 + $0x168] sm:$0xff] %vm48_vm2, %v7820_v4  ;;  %5050 = vmatprep.mubr.msk.f32.mxu0 %vm178_vm1, %v122_v13 }
  0x18   :  { %1073 = vst.msk [vmem:[#allocation3 + $0x30] sm:$0xff] %vm48_vm2, %v1593_v18 }
  0x1a   :  { %5051 = vmatmul.mubr.msk.f32.gmra.mxu0 %vm178_vm1, %v123_v15 }
  0x1b   :  { %19 = vsyncpa [#allocation8], 0  ;;  %5053 = vmatprep.mubr.msk.f32.mxu0 %vm178_vm1, %v124_v16  ;;  %v125_v19 = vld [vmem:[%s7805_s0 + $0x68] sm:$0xff]  ;;  %s5226_s28 = smov 32   ;;  %v126_v20 = vld [vmem:[%s7805_s0 + $0x70] sm:$0xff]  ;;  %s5227_s25 = smov 48  }
  0x1c   :  { %1431 = vrot.lane.b32.xlu0 %v1351_v17, %s5226_s28  ;;  %v1111_v21 = vld [vmem:[#allocation2 + $0x10] sm:$0xff]  ;;  %v127_v22 = vld [vmem:[%s7805_s0 + $0x78] sm:$0xff]  ;;  %v128_v23 = vld [vmem:[%s7805_s0 + $0x80] sm:$0xff]  ;;  %s5228_s15 = smov 64   ;;  %s5229_s20 = smov 112   ;;  %vm1310_vm3 = vcmask 261248  }
  0x1d   :  { %v1352_v24 = vld [vmem:[#allocation2 + $0x11] sm:$0xff]  ;;  %v129_v25 = vld [vmem:[%s7805_s0 + $0x88] sm:$0xff]  ;;  %v132_v28 = vld [vmem:[%s7805_s0 + $0xa0] sm:$0xff]  ;;  %s5230_s18 = smov 80   ;;  %s5231_s17 = smov 96   ;;  %vm1551_vm4 = vcmask 392448  }
  0x1e   :  { %5054 = vmatmul.mubr.msk.f32.gmra.mxu0 %vm178_vm1, %v125_v19  ;;  %v130_v26 = vld [vmem:[%s7805_s0 + $0x90] sm:$0xff]  ;;  %v131_v27 = vld [vmem:[%s7805_s0 + $0x98] sm:$0xff]  ;;  %v1834_v29 = vld [vmem:[#allocation2 + $0x20] sm:$0xff]  ;;  %vm1792_vm5 = vcmask 523648   ;;  %vm2033_vm6 = vcmask 654848   ;;  %vm2274_vm7 = vcmask 786048  }
  0x1f   :  { %5056 = vmatprep.mubr.msk.f32.mxu0 %vm178_vm1, %v126_v20  ;;  %v133_v30 = vld [vmem:[%s7805_s0 + $0xa8] sm:$0xff]  ;;  %v134_v31 = vld [vmem:[%s7805_s0 + $0xb0] sm:$0xff]  ;;  %v135_v33 = vld [vmem:[%s7805_s0 + $0xb8] sm:$0xff]  ;;  %vm2515_vm8 = vcmask 917248   ;;  %vm2756_vm9 = vcmask 1048448   ;;  %vm95_vm10 = vcmask 261120  }
  0x20   :  { %1192 = vrot.lane.b32.xlu0 %v1111_v21, %s5225_s23  ;;  %v2557_v32 = vld [vmem:[#allocation2 + $0x30] sm:$0xff]  ;;  %v136_v34 = vld [vmem:[%s7805_s0 + $0xc0] sm:$0xff]  ;;  %v137_v35 = vld [vmem:[%s7805_s0 + $0xc8] sm:$0xff]  ;;  %vm3622_vm11 = vcmask 257024   ;;  %vm3715_vm12 = vcmask 523520   ;;  %vm3788_vm13 = vcmask 785920  }
  0x21   :  { %v138_v36 = vld [vmem:[%s7805_s0 + $0xd0] sm:$0xff]  ;;  %v139_v37 = vld [vmem:[%s7805_s0 + $0xd8] sm:$0xff]  ;;  %v140_v38 = vld [vmem:[%s7805_s0 + $0xe0] sm:$0xff]  ;;  %vm3861_vm14 = vcmask 1048320   ;;  %vm5232_vm15 = vmmov 0   ;;  %s5233_s30 = smov [#allocation7]  }
  0x22   :  { %5057 = vmatmul.mubr.msk.f32.gmra.mxu0 %vm178_vm1, %v127_v22  ;;  %v2559_v39 = vld [vmem:[#allocation2 + $0x40] sm:$0xff]  ;;  %v141_v40 = vld [vmem:[%s7805_s0 + $0xe8] sm:$0xff]  ;;  %v142_v41 = vld [vmem:[%s7805_s0 + $0xf0] sm:$0xff]  ;;  %s4732_s16 = sshll.u32 %s5233_s30, 4  ;;  %s4733_s16 = int_to_ptr.vmem [resolvable:$true] %s4732_s16 }
  0x23   :  { %5059 = vmatprep.mubr.msk.f32.mxu0 %vm178_vm1, %v128_v23  ;;  %v143_v42 = vld [vmem:[%s7805_s0 + $0xf8] sm:$0xff]  ;;  %v144_v43 = vld [vmem:[%s7805_s0 + $0x100] sm:$0xff]  ;;  %v145_v44 = vld [vmem:[%s7805_s0 + $0x108] sm:$0xff]  ;;  %p5207_p1 = scmp.lt.s32.totalorder %s4733_s16, %s4733_s16 }
  0x24   :  { %1433 = vrot.lane.b32.xlu0 %v1352_v24, %s5226_s28  ;;  %v146_v45 = vld [vmem:[%s7805_s0 + $0x110] sm:$0xff]  ;;  %v147_v47 = vld [vmem:[%s7805_s0 + $0x118] sm:$0xff]  ;;  %v148_v48 = vld [vmem:[%s7805_s0 + $0x120] sm:$0xff] }
  0x25   :  { %v2561_v46 = vld [vmem:[#allocation2 + $0x50] sm:$0xff]  ;;  %v149_v49 = vld [vmem:[%s7805_s0 + $0x128] sm:$0xff]  ;;  %v151_v51 = vld [vmem:[%s7805_s0 + $0x138] sm:$0xff] }
  0x26   :  { %5060 = vmatmul.mubr.msk.f32.gmra.mxu0 %vm178_vm1, %v129_v25  ;;  %v150_v50 = vld [vmem:[%s7805_s0 + $0x130] sm:$0xff]  ;;  %v152_v52 = vld [vmem:[%s7805_s0 + $0x140] sm:$0xff]  ;;  %v153_v54 = vld [vmem:[%s7805_s0 + $0x148] sm:$0xff] }
  0x27   :  { %5062 = vmatprep.mubr.msk.f32.mxu0 %vm178_vm1, %v130_v26  ;;  %v2563_v53 = vld [vmem:[#allocation2 + $0x60] sm:$0xff]  ;;  %v154_v55 = vld [vmem:[%s7805_s0 + $0x150] sm:$0xff]  ;;  %v155_v56 = vld [vmem:[%s7805_s0 + $0x158] sm:$0xff] }
  0x28   :  { %1674 = vrot.lane.b32.xlu0 %v1593_v18, %s5227_s25  ;;  %v156_v57 = vld [vmem:[%s7805_s0 + $0x160] sm:$0xff]  ;;  %v157_v58 = vld [vmem:[%s7805_s0 + $0x168] sm:$0xff]  ;;  %v158_v59 = vld [vmem:[%s7805_s0 + $0x170] sm:$0xff] }
  0x29   :  { %v2565_v60 = vld [vmem:[#allocation2 + $0x70] sm:$0xff]  ;;  %v159_v61 = vld [vmem:[%s7805_s0 + $0x178] sm:$0xff]  ;;  %v160_v62 = vld [vmem:[%s7805_s0 + $0x180] sm:$0xff] }
  0x2a   :  { %5063 = vmatmul.mubr.msk.f32.gmra.mxu0 %vm178_vm1, %v131_v27  ;;  %v161_v63 = vld [vmem:[%s7805_s0 + $0x188] sm:$0xff]  ;;  %v162_v0 = vld [vmem:[%s7805_s0 + $0x190] sm:$0xff]  ;;  %v163_v1 = vld [vmem:[%s7805_s0 + $0x198] sm:$0xff] }
  0x2b   :  { %5065 = vmatprep.mubr.msk.f32.mxu0 %vm178_vm1, %v132_v28  ;;  %v164_v2 = vld [vmem:[%s7805_s0 + $0x1a0] sm:$0xff]  ;;  %v165_v5 = vld [vmem:[%s7805_s0 + $0x1a8] sm:$0xff]  ;;  %v166_v6 = vld [vmem:[%s7805_s0 + $0x1b0] sm:$0xff] }
  0x2c   :  { %1915 = vrot.lane.b32.xlu0 %v1834_v29, %s5228_s15  ;;  %v2567_v3 = vld [vmem:[#allocation2 + $0x80] sm:$0xff]  ;;  %v1592_v7 = vld [vmem:[#allocation2 + $0x17] sm:$0xff]  ;;  %v169_v11 = vld [vmem:[%s7805_s0 + $0x1c8] sm:$0xff] }
  0x2d   :  { %1672 = vrot.lane.b32.xlu1 %v1592_v7, %s5227_s25  ;;  %1072 = vst.msk [vmem:[#allocation3 + $0x20] sm:$0xff] %vm48_vm2, %v1592_v7  ;;  %v167_v8 = vld [vmem:[%s7805_s0 + $0x1b8] sm:$0xff]  ;;  %v168_v9 = vld [vmem:[%s7805_s0 + $0x1c0] sm:$0xff]  ;;  %v170_v12 = vld [vmem:[%s7805_s0 + $0x1d0] sm:$0xff] }
  0x2e   :  { %5066 = vmatmul.mubr.msk.f32.gmra.mxu0 %vm178_vm1, %v133_v30  ;;  %v1833_v10 = vld [vmem:[#allocation2 + $0x18] sm:$0xff]  ;;  %v2569_v13 = vld [vmem:[#allocation2 + $0x90] sm:$0xff]  ;;  %v1030_v15 = vld [vmem:[#allocation2 + $0x7] sm:$0xff] }
  0x2f   :  { %5068 = vmatprep.mubr.msk.f32.mxu0 %vm178_vm1, %v134_v31  ;;  %v2074_v14 = vld [vmem:[#allocation2 + $0x19] sm:$0xff]  ;;  %1070 = vst.msk [vmem:[#allocation3] sm:$0xff] %vm48_vm2, %v1030_v15  ;;  %v2332_v18 = vld [vmem:[#allocation2 + $0xaf] sm:$0xff]  ;;  %v2331_v24 = vld [vmem:[#allocation2 + $0xa7] sm:$0xff] }
  0x30   :  { %2638 = vrot.lane.b32.xlu0 %v2557_v32, %s5229_s20  ;;  %v171_v16 = vld [vmem:[%s7805_s0 + $0x1d8] sm:$0xff]  ;;  %v172_v17 = vld [vmem:[%s7805_s0 + $0x1e0] sm:$0xff]  ;;  %1091 = vst.msk [vmem:[#allocation3 + $0x150] sm:$0xff] %vm48_vm2, %v2332_v18  ;;  %v173_v19 = vld [vmem:[%s7805_s0 + $0x1e8] sm:$0xff] }
  0x31   :  { %1913 = vrot.lane.b32.xlu1 %v1833_v10, %s5228_s15  ;;  %v174_v20 = vld [vmem:[%s7805_s0 + $0x1f0] sm:$0xff]  ;;  %v175_v22 = vld [vmem:[%s7805_s0 + $0x1f8] sm:$0xff]  ;;  %v2571_v23 = vld [vmem:[#allocation2 + $0xa0] sm:$0xff]  ;;  %1090 = vst.msk [vmem:[#allocation3 + $0x140] sm:$0xff] %vm48_vm2, %v2331_v24 }
  0x32   :  { %5069 = vmatmul.mubr.msk.f32.gmra.mxu0 %vm178_vm1, %v135_v33  ;;  %v1031_v21 = vld [vmem:[#allocation2 + $0xf] sm:$0xff]  ;;  %v2091_v27 = vld [vmem:[#allocation2 + $0xa1] sm:$0xff]  ;;  %v5805_v15 = vld [vmem:[%s7808_s3] ss:$0 sm:$0xff] }
  0x33   :  { %5071 = vmatprep.mubr.msk.f32.mxu0 %vm178_vm1, %v136_v34  ;;  %1071 = vst.msk [vmem:[#allocation3 + $0x10] sm:$0xff] %vm48_vm2, %v1031_v21  ;;  %v2572_v25 = vld [vmem:[#allocation2 + $0xa8] sm:$0xff]  ;;  %v2573_v31 = vld [vmem:[#allocation2 + $0xb0] sm:$0xff]  ;;  %v2334_v33 = vld [vmem:[#allocation2 + $0xbf] sm:$0xff] }
  0x34   :  { %1196 = vrot.lane.b32.xlu0 %v1834_v29, %s5225_s23  ;;  %v2092_v29 = vld [vmem:[#allocation2 + $0xa9] sm:$0xff]  ;;  %1093 = vst.msk [vmem:[#allocation3 + $0x170] sm:$0xff] %vm48_vm2, %v2334_v33 }
  0x35   :  { %2154 = vrot.lane.b32.xlu1 %v2074_v14, %s5230_s18 }
  0x36   :  { %5072 = vmatmul.mubr.msk.f32.gmra.mxu0 %vm178_vm1, %v137_v35  ;;  %v2574_v35 = vld [vmem:[#allocation2 + $0xb8] sm:$0xff] }
  0x37   :  { %5074 = vmatprep.mubr.msk.f32.mxu0 %vm178_vm1, %v138_v36 }
  0x38   :  { %1919 = vrot.lane.b32.xlu0 %v2557_v32, %s5228_s15 }
  0x39   :  { %1194 = vrot.lane.b32.xlu1 %v1833_v10, %s5225_s23 }
  0x3a   :  { %5075 = vmatmul.mubr.msk.f32.gmra.mxu0 %vm178_vm1, %v139_v37 }
  0x3b   :  { %5077 = vmatprep.mubr.msk.f32.mxu0 %vm178_vm1, %v140_v38 }
  0x3c   :  { %2642 = vrot.lane.b32.xlu0 %v2559_v39, %s5229_s20 }
  0x3d   :  { %1435 = vrot.lane.b32.xlu1 %v2074_v14, %s5226_s28 }
  0x3e   :  { %5078 = vmatmul.mubr.msk.f32.gmra.mxu0 %vm178_vm1, %v141_v40  ;;  %v2093_v40 = vld [vmem:[#allocation2 + $0xb1] sm:$0xff] }
  0x3f   :  { %5080 = vmatprep.mubr.msk.f32.mxu0 %vm178_vm1, %v142_v41 }
  0x40   :  { %1200 = vrot.lane.b32.xlu0 %v2557_v32, %s5225_s23  ;;  %v2333_v32 = vld [vmem:[#allocation2 + $0xb7] sm:$0xff] }
  0x41   :  { %2427 = vrot.lane.b32.xlu1 %v2331_v24, %s5231_s17  ;;  %1092 = vst.msk [vmem:[#allocation3 + $0x160] sm:$0xff] %vm48_vm2, %v2333_v32 }
  0x42   :  { %5081 = vmatmul.mubr.msk.f32.gmra.mxu0 %vm178_vm1, %v143_v42  ;;  %v2094_v42 = vld [vmem:[#allocation2 + $0xb9] sm:$0xff] }
  0x43   :  { %5083 = vmatprep.mubr.msk.f32.mxu0 %vm178_vm1, %v144_v43 }
  0x44   :  { %1923 = vrot.lane.b32.xlu0 %v2559_v39, %s5228_s15 }
  0x45   :  { %2668 = vrot.lane.b32.xlu1 %v2572_v25, %s5229_s20 }
  0x46   :  { %5084 = vmatmul.mubr.msk.f32.gmra.mxu0 %vm178_vm1, %v145_v44  ;;  %v2575_v44 = vld [vmem:[#allocation2 + $0xc0] sm:$0xff] }
  0x47   :  { %5086 = vmatprep.mubr.msk.f32.mxu0 %vm178_vm1, %v146_v45 }
  0x48   :  { %2646 = vrot.lane.b32.xlu0 %v2561_v46, %s5229_s20 }
  0x49   :  { %1708 = vrot.lane.b32.xlu1 %v2331_v24, %s5227_s25 }
  0x4a   :  { %5087 = vmatmul.mubr.msk.f32.gmra.mxu0 %vm178_vm1, %v147_v47 }
  0x4b   :  { %5089 = vmatprep.mubr.msk.f32.mxu0 %vm178_vm1, %v148_v48 }
  0x4c   :  { %1204 = vrot.lane.b32.xlu0 %v2559_v39, %s5225_s23 }
  0x4d   :  { %1949 = vrot.lane.b32.xlu1 %v2572_v25, %s5228_s15 }
  0x4e   :  { %5090 = vmatmul.mubr.msk.f32.gmra.mxu0 %vm178_vm1, %v149_v49 }
  0x4f   :  { %5092 = vmatprep.mubr.msk.f32.mxu0 %vm178_vm1, %v150_v50  ;;  %v2577_v50 = vld [vmem:[#allocation2 + $0xd0] sm:$0xff] }
  0x50   :  { %1927 = vrot.lane.b32.xlu0 %v2561_v46, %s5228_s15 }
  0x51   :  { %2190 = vrot.lane.b32.xlu1 %v2092_v29, %s5230_s18 }
  0x52   :  { %5093 = vmatmul.mubr.msk.f32.gmra.mxu0 %vm178_vm1, %v151_v51 }
  0x53   :  { %5095 = vmatprep.mubr.msk.f32.mxu0 %vm178_vm1, %v152_v52 }
  0x54   :  { %2650 = vrot.lane.b32.xlu0 %v2563_v53, %s5229_s20 }
  0x55   :  { %2431 = vrot.lane.b32.xlu1 %v2333_v32, %s5231_s17 }
  0x56   :  { %5096 = vmatmul.mubr.msk.f32.gmra.mxu0 %vm178_vm1, %v153_v54 }
  0x57   :  { %5098 = vmatprep.mubr.msk.f32.mxu0 %vm178_vm1, %v154_v55 }
  0x58   :  { %1208 = vrot.lane.b32.xlu0 %v2561_v46, %s5225_s23 }
  0x59   :  { %2672 = vrot.lane.b32.xlu1 %v2574_v35, %s5229_s20 }
  0x5a   :  { %5099 = vmatmul.mubr.msk.f32.gmra.mxu0 %vm178_vm1, %v155_v56 }
  0x5b   :  { %5101 = vmatprep.mubr.msk.f32.mxu0 %vm178_vm1, %v156_v57 }
  0x5c   :  { %1931 = vrot.lane.b32.xlu0 %v2563_v53, %s5228_s15 }
  0x5d   :  { %1230 = vrot.lane.b32.xlu1 %v2572_v25, %s5225_s23 }
  0x5e   :  { %5102 = vmatmul.mubr.msk.f32.gmra.mxu0 %vm178_vm1, %v157_v58 }
  0x5f   :  { %5104 = vmatprep.mubr.msk.f32.mxu0 %vm178_vm1, %v158_v59 }
  0x60   :  { %2654 = vrot.lane.b32.xlu0 %v2565_v60, %s5229_s20 }
  0x61   :  { %1471 = vrot.lane.b32.xlu1 %v2092_v29, %s5226_s28 }
  0x62   :  { %5105 = vmatmul.mubr.msk.f32.gmra.mxu0 %vm178_vm1, %v159_v61 }
  0x63   :  { %5107 = vmatprep.mubr.msk.f32.mxu0 %vm178_vm1, %v160_v62 }
  0x64   :  { %1212 = vrot.lane.b32.xlu0 %v2563_v53, %s5225_s23 }
  0x65   :  { %1712 = vrot.lane.b32.xlu1 %v2333_v32, %s5227_s25 }
  0x66   :  { %5108 = vmatmul.mubr.msk.f32.gmra.mxu0 %vm178_vm1, %v161_v63 }
  0x67   :  { %5110 = vmatprep.mubr.msk.f32.mxu0 %vm178_vm1, %v162_v0 }
  0x68   :  { %1935 = vrot.lane.b32.xlu0 %v2565_v60, %s5228_s15 }
  0x69   :  { %1953 = vrot.lane.b32.xlu1 %v2574_v35, %s5228_s15 }
  0x6a   :  { %5111 = vmatmul.mubr.msk.f32.gmra.mxu0 %vm178_vm1, %v163_v1 }
  0x6b   :  { %5113 = vmatprep.mubr.msk.f32.mxu0 %vm178_vm1, %v164_v2 }
  0x6c   :  { %2658 = vrot.lane.b32.xlu0 %v2567_v3, %s5229_s20 }
  0x6d   :  { %2194 = vrot.lane.b32.xlu1 %v2094_v42, %s5230_s18 }
  0x6e   :  { %5114 = vmatmul.mubr.msk.f32.gmra.mxu0 %vm178_vm1, %v165_v5 }
  0x6f   :  { %5116 = vmatprep.mubr.msk.f32.mxu0 %vm178_vm1, %v166_v6 }
  0x70   :  { %1216 = vrot.lane.b32.xlu0 %v2565_v60, %s5225_s23 }
  0x71   :  { %1234 = vrot.lane.b32.xlu1 %v2574_v35, %s5225_s23 }
  0x72   :  { %5117 = vmatmul.mubr.msk.f32.gmra.mxu0 %vm178_vm1, %v167_v8 }
  0x73   :  { %5119 = vmatprep.mubr.msk.f32.mxu0 %vm178_vm1, %v168_v9  ;;  %v5792_v9 = vld [vmem:[%s7807_s2] ss:$0 sm:$0xff] }
  0x74   :  { %1939 = vrot.lane.b32.xlu0 %v2567_v3, %s5228_s15 }
  0x75   :  { %1475 = vrot.lane.b32.xlu1 %v2094_v42, %s5226_s28 }
  0x76   :  { %5120 = vmatmul.mubr.msk.f32.gmra.mxu0 %vm178_vm1, %v169_v11 }
  0x77   :  { %5122 = vmatprep.mubr.msk.f32.mxu0 %vm178_vm1, %v170_v12 }
  0x78   :  { %2662 = vrot.lane.b32.xlu0 %v2569_v13, %s5229_s20 }
  0x7a   :  { %5123 = vmatmul.mubr.msk.f32.gmra.mxu0 %vm178_vm1, %v171_v16 }
  0x7b   :  { %5125 = vmatprep.mubr.msk.f32.mxu0 %vm178_vm1, %v172_v17  ;;  %v1191_v26 = vpop.permute.xlu0 %1190 }
  0x7c   :  { %1220 = vrot.lane.b32.xlu0 %v2567_v3, %s5225_s23  ;;  %1311 = vst.msk [vmem:[#allocation3] sm:$0xff] %vm1310_vm3, %v1191_v26 }
  0x7e   :  { %5126 = vmatmul.mubr.msk.f32.gmra.mxu0 %vm178_vm1, %v173_v19 }
  0x7f   :  { %5128 = vmatprep.mubr.msk.f32.mxu0 %vm178_vm1, %v174_v20 }
  0x80   :  { %1943 = vrot.lane.b32.xlu0 %v2569_v13, %s5228_s15 }
  0x82   :  { %5129 = vmatmul.mubr.msk.f32.gmra.mxu0 %vm178_vm1, %v175_v22  ;;  %vm4529_vm1 = vcmask 519168  }
  0x84   :  { %2666 = vrot.lane.b32.xlu0 %v2571_v23, %s5229_s20 }
  0x88   :  { %1224 = vrot.lane.b32.xlu0 %v2569_v13, %s5225_s23 }
  0x8c   :  { %1947 = vrot.lane.b32.xlu0 %v2571_v23, %s5228_s15 }
  0x8e   :  { %v1432_v28 = vpop.permute.xlu0 %1431 }
  0x8f   :  { %1552 = vst.msk [vmem:[#allocation3] sm:$0xff] %vm1551_vm4, %v1432_v28 }
  0x90   :  { %2188 = vrot.lane.b32.xlu0 %v2091_v27, %s5230_s18 }
  0x92   :  { %v1193_v30 = vpop.permute.xlu0 %1192 }
  0x93   :  { %1312 = vst.msk [vmem:[#allocation3 + $0x10] sm:$0xff] %vm1310_vm3, %v1193_v30 }
  0x94   :  { %2429 = vrot.lane.b32.xlu0 %v2332_v18, %s5231_s17 }
  0x96   :  { %v1434_v34 = vpop.permute.xlu0 %1433 }
  0x97   :  { %1553 = vst.msk [vmem:[#allocation3 + $0x10] sm:$0xff] %vm1551_vm4, %v1434_v34 }
  0x98   :  { %2670 = vrot.lane.b32.xlu0 %v2573_v31, %s5229_s20 }
  0x9a   :  { %v1675_v36 = vpop.permute.xlu0 %1674 }
  0x9b   :  { %1794 = vst.msk [vmem:[#allocation3 + $0x10] sm:$0xff] %vm1792_vm5, %v1675_v36 }
  0x9c   :  { %1228 = vrot.lane.b32.xlu0 %v2571_v23, %s5225_s23 }
  0x9e   :  { %v1916_v37 = vpop.permute.xlu0 %1915 }
  0x9f   :  { %2035 = vst.msk [vmem:[#allocation3 + $0x10] sm:$0xff] %vm2033_vm6, %v1916_v37  ;;  %v1673_v8 = vpop.permute.xlu1 %1672 }
  0xa0   :  { %1469 = vrot.lane.b32.xlu0 %v2091_v27, %s5226_s28  ;;  %1793 = vst.msk [vmem:[#allocation3] sm:$0xff] %vm1792_vm5, %v1673_v8 }
  0xa2   :  { %v5728_v38 = vpop.permute.xlu0 %2638 }
  0xa3   :  { %7822 = vst [vmem:[#allocation10_spill] sm:$0xff] %v5728_v38  ;;  %v1914_v14 = vpop.permute.xlu1 %1913 }
  0xa4   :  { %1710 = vrot.lane.b32.xlu0 %v2332_v18, %s5227_s25  ;;  %2034 = vst.msk [vmem:[#allocation3] sm:$0xff] %vm2033_vm6, %v1914_v14 }
  0xa6   :  { %v1197_v39 = vpop.permute.xlu0 %1196 }
  0xa7   :  { %1314 = vst.msk [vmem:[#allocation3 + $0x30] sm:$0xff] %vm1310_vm3, %v1197_v39  ;;  %v2155_v23 = vpop.permute.xlu1 %2154 }
  0xa8   :  { %1951 = vrot.lane.b32.xlu0 %v2573_v31, %s5228_s15  ;;  %2275 = vst.msk [vmem:[#allocation3] sm:$0xff] %vm2274_vm7, %v2155_v23 }
  0xaa   :  { %v5735_v41 = vpop.permute.xlu0 %1919 }
  0xab   :  { %7823 = vst [vmem:[#allocation11_spill] sm:$0xff] %v5735_v41  ;;  %v1195_v37 = vpop.permute.xlu1 %1194 }
  0xac   :  { %2192 = vrot.lane.b32.xlu0 %v2093_v40, %s5230_s18  ;;  %1313 = vst.msk [vmem:[#allocation3 + $0x20] sm:$0xff] %vm1310_vm3, %v1195_v37 }
  0xae   :  { %v5739_v43 = vpop.permute.xlu0 %2642 }
  0xaf   :  { %7824 = vst [vmem:[#allocation12_spill] sm:$0xff] %v5739_v43 }
  0xb0   :  { %2433 = vrot.lane.b32.xlu0 %v2334_v33, %s5231_s17 }
  0xb2   :  { %v5743_v45 = vpop.permute.xlu0 %1200 }
  0xb4   :  { %2674 = vrot.lane.b32.xlu0 %v2575_v44, %s5229_s20 }
  0xb6   :  { %v5747_v46 = vpop.permute.xlu0 %1923 }
  0xb7   :  { %7825 = vst [vmem:[#allocation13_spill] sm:$0xff] %v5747_v46 }
  0xb8   :  { %1232 = vrot.lane.b32.xlu0 %v2573_v31, %s5225_s23 }
  0xba   :  { %v5751_v47 = vpop.permute.xlu0 %2646 }
  0xbb   :  { %7826 = vst [vmem:[#allocation14_spill] sm:$0xff] %v5751_v47 }
  0xbc   :  { %1473 = vrot.lane.b32.xlu0 %v2093_v40, %s5226_s28 }
  0xbe   :  { %v5754_v48 = vpop.permute.xlu0 %1204 }
  0xc0   :  { %1714 = vrot.lane.b32.xlu0 %v2334_v33, %s5227_s25 }
  0xc2   :  { %v5757_v49 = vpop.permute.xlu0 %1927 }
  0xc3   :  { %7827 = vst [vmem:[#allocation15_spill] sm:$0xff] %v5757_v49 }
  0xc4   :  { %1955 = vrot.lane.b32.xlu0 %v2575_v44, %s5228_s15 }
  0xc6   :  { %v5760_v51 = vpop.permute.xlu0 %2650  ;;  %v5037_v52 = vpop.f32.mrf.mxu0 }
  0xc7   :  { %7828 = vst [vmem:[#allocation16_spill] sm:$0xff] %v5760_v51  ;;  %v768_v13 = vmul.f32 %v5037_v52, %v5792_v9 }
  0xc8   :  { %2678 = vrot.lane.b32.xlu0 %v2577_v50, %s5229_s20  ;;  %v441_v53 = vpop.f32.mrf.mxu0 }
  0xc9   :  { %v767_v16 = vmul.f32 %v5792_v9, %v441_v53  ;;  %v839_v21 = vadd.f32 %v5805_v15, %v768_v13 }
  0xca   :  { %v5763_v54 = vpop.permute.xlu0 %1208  ;;  %v5040_v55 = vpop.f32.mrf.mxu0 }
  0xcb   :  { %v770_v19 = vmul.f32 %v5040_v55, %v5792_v9  ;;  %v838_v24 = vadd.f32 %v5805_v15, %v767_v16  ;;  %v903_v33 = vmax.f32 %v839_v21, 0.0  ;;  %v1436_v21 = vpop.permute.xlu1 %1435 }
  0xcc   :  { %1236 = vrot.lane.b32.xlu0 %v2575_v44, %s5225_s23  ;;  %v451_v56 = vpop.f32.mrf.mxu0  ;;  %1554 = vst.msk [vmem:[#allocation3 + $0x20] sm:$0xff] %vm1551_vm4, %v1436_v21 }
  0xcd   :  { %v769_v25 = vmul.f32 %v5792_v9, %v451_v56  ;;  %v841_v30 = vadd.f32 %v5805_v15, %v770_v19  ;;  %v902_v39 = vmax.f32 %v838_v24, 0.0 }
  0xce   :  { %v5766_v57 = vpop.permute.xlu0 %1931  ;;  %v5043_v58 = vpop.f32.mrf.mxu0 }
  0xcf   :  { %7829 = vst [vmem:[#allocation17_spill] sm:$0xff] %v5766_v57  ;;  %v772_v31 = vmul.f32 %v5043_v58, %v5792_v9  ;;  %v840_v40 = vadd.f32 %v5805_v15, %v769_v25  ;;  %v905_v58 = vmax.f32 %v841_v30, 0.0 }
  0xd0   :  { %1959 = vrot.lane.b32.xlu0 %v2577_v50, %s5228_s15  ;;  %v461_v59 = vpop.f32.mrf.mxu0 }
  0xd1   :  { %v771_v42 = vmul.f32 %v5792_v9, %v461_v59  ;;  %v843_v8 = vadd.f32 %v5805_v15, %v772_v31 }
  0xd2   :  { %v5769_v60 = vpop.permute.xlu0 %2654  ;;  %v5046_v61 = vpop.f32.mrf.mxu0 }
  0xd3   :  { %7830 = vst [vmem:[#allocation18_spill] sm:$0xff] %v5769_v60  ;;  %v774_v13 = vmul.f32 %v5046_v61, %v5792_v9  ;;  %v842_v23 = vadd.f32 %v5805_v15, %v771_v42  ;;  %v907_v31 = vmax.f32 %v843_v8, 0.0 }
  0xd4   :  { %v5771_v62 = vpop.f32.mrf.mxu0 }
  0xd5   :  { %v773_v24 = vmul.f32 %v5792_v9, %v5771_v62 }
  0xd6   :  { %v5773_v63 = vpop.permute.xlu0 %1212  ;;  %v5775_v0 = vpop.f32.mrf.mxu0 }
  0xd7   :  { %v844_v42 = vadd.f32 %v5805_v15, %v773_v24 }
  0xd8   :  { %v5777_v1 = vpop.f32.mrf.mxu0 }
  0xd9   :  { %v908_v24 = vmax.f32 %v844_v42, 0.0 }
  0xda   :  { %v5779_v2 = vpop.permute.xlu0 %1935  ;;  %v5781_v3 = vpop.f32.mrf.mxu0 }
  0xdb   :  { %7831 = vst [vmem:[#allocation19_spill] sm:$0xff] %v5779_v2 }
  0xdc   :  { %v5783_v5 = vpop.f32.mrf.mxu0 }
  0xde   :  { %v5785_v6 = vpop.permute.xlu0 %2658  ;;  %v5787_v7 = vpop.f32.mrf.mxu0 }
  0xdf   :  { %7832 = vst [vmem:[#allocation20_spill] sm:$0xff] %v5785_v6 }
  0xe0   :  { %v5794_v10 = vpop.f32.mrf.mxu0 }
  0xe2   :  { %v5797_v11 = vpop.permute.xlu0 %1216  ;;  %v5799_v12 = vpop.f32.mrf.mxu0 }
  0xe4   :  { %v5808_v17 = vpop.f32.mrf.mxu0 }
  0xe6   :  { %v5811_v18 = vpop.permute.xlu0 %1939  ;;  %v5061_v20 = vpop.f32.mrf.mxu0 }
  0xe7   :  { %7833 = vst [vmem:[#allocation21_spill] sm:$0xff] %v5811_v18  ;;  %v784_v22 = vmul.f32 %v5061_v20, %v5792_v9 }
  0xe8   :  { %v521_v26 = vpop.f32.mrf.mxu0 }
  0xe9   :  { %v855_v27 = vadd.f32 %v5805_v15, %v784_v22  ;;  %v783_v28 = vmul.f32 %v5792_v9, %v521_v26  ;;  %v904_v22 = vmax.f32 %v840_v40, 0.0  ;;  %v906_v40 = vmax.f32 %v842_v23, 0.0 }
  0xea   :  { %v5821_v29 = vpop.permute.xlu0 %2662  ;;  %v5064_v32 = vpop.f32.mrf.mxu0 }
  0xeb   :  { %7834 = vst [vmem:[#allocation22_spill] sm:$0xff] %v5821_v29  ;;  %v919_v34 = vmax.f32 %v855_v27, 0.0  ;;  %v854_v35 = vadd.f32 %v5805_v15, %v783_v28  ;;  %v786_v36 = vmul.f32 %v5064_v32, %v5792_v9  ;;  %v845_v32 = vadd.f32 %v5805_v15, %v774_v13 }
  0xec   :  { %v531_v44 = vpop.f32.mrf.mxu0 }
  0xed   :  { %v5830_v50 = vmax.f32 %v903_v33, %v919_v34  ;;  %v918_v52 = vmax.f32 %v854_v35, 0.0  ;;  %v857_v53 = vadd.f32 %v5805_v15, %v786_v36  ;;  %v785_v55 = vmul.f32 %v5792_v9, %v531_v44 }
  0xee   :  { %v5834_v56 = vpop.permute.xlu0 %1220  ;;  %v5067_v14 = vpop.f32.mrf.mxu0  ;;  %v776_v33 = vmul.f32 %v5775_v0, %v5792_v9  ;;  %v775_v44 = vmul.f32 %v5792_v9, %v5777_v1  ;;  %v909_v13 = vmax.f32 %v845_v32, 0.0 }
  0xef   :  { %v5838_v16 = vmax.f32 %v902_v39, %v918_v52  ;;  %v921_v59 = vmax.f32 %v857_v53, 0.0  ;;  %v856_v19 = vadd.f32 %v5805_v15, %v785_v55  ;;  %v788_v20 = vmul.f32 %v5067_v14, %v5792_v9  ;;  %v5859_v39 = vpop.permute.xlu1 %2427 }
  0xf0   :  { %v541_v25 = vpop.f32.mrf.mxu0  ;;  %7836 = vst [vmem:[#allocation24_spill] sm:$0xff] %v5859_v39  ;;  %v847_v14 = vadd.f32 %v5805_v15, %v776_v33 }
  0xf1   :  { %v5846_v26 = vmax.f32 %v905_v58, %v921_v59  ;;  %v920_v61 = vmax.f32 %v856_v19, 0.0  ;;  %v859_v27 = vadd.f32 %v5805_v15, %v788_v20  ;;  %v787_v28 = vmul.f32 %v5792_v9, %v541_v25 }
  0xf2   :  { %v5850_v30 = vpop.permute.xlu0 %1943  ;;  %v5070_v34 = vpop.f32.mrf.mxu0  ;;  %v778_v59 = vmul.f32 %v5781_v3, %v5792_v9  ;;  %v846_v25 = vadd.f32 %v5805_v15, %v775_v44 }
  0xf3   :  { %7835 = vst [vmem:[#allocation23_spill] sm:$0xff] %v5850_v30  ;;  %v5855_v62 = vmax.f32 %v904_v22, %v920_v61  ;;  %v923_v35 = vmax.f32 %v859_v27, 0.0  ;;  %v858_v36 = vadd.f32 %v5805_v15, %v787_v28  ;;  %v790_v37 = vmul.f32 %v5070_v34, %v5792_v9  ;;  %v5877_v23 = vpop.permute.xlu1 %2668 }
  0xf4   :  { %v551_v52 = vpop.f32.mrf.mxu0  ;;  %7838 = vst [vmem:[#allocation26_spill] sm:$0xff] %v5877_v23  ;;  %v777_v61 = vmul.f32 %v5792_v9, %v5783_v5  ;;  %v911_v34 = vmax.f32 %v847_v14, 0.0 }
  0xf5   :  { %v5864_v53 = vmax.f32 %v907_v31, %v923_v35  ;;  %v922_v0 = vmax.f32 %v858_v36, 0.0  ;;  %v861_v55 = vadd.f32 %v5805_v15, %v790_v37  ;;  %v789_v58 = vmul.f32 %v5792_v9, %v551_v52 }
  0xf6   :  { %v5868_v8 = vpop.permute.xlu0 %2666  ;;  %v5073_v19 = vpop.f32.mrf.mxu0  ;;  %v849_v35 = vadd.f32 %v5805_v15, %v778_v59  ;;  %v780_v36 = vmul.f32 %v5787_v7, %v5792_v9 }
  0xf7   :  { %7837 = vst [vmem:[#allocation25_spill] sm:$0xff] %v5868_v8  ;;  %v5873_v20 = vmax.f32 %v906_v40, %v922_v0  ;;  %v925_v1 = vmax.f32 %v861_v55, 0.0  ;;  %v860_v21 = vadd.f32 %v5805_v15, %v789_v58  ;;  %v792_v22 = vmul.f32 %v5073_v19, %v5792_v9  ;;  %v5895_v52 = vpop.permute.xlu1 %1708 }
  0xf8   :  { %v561_v27 = vpop.f32.mrf.mxu0  ;;  %7839 = vst [vmem:[#allocation27_spill] sm:$0xff] %v5895_v52  ;;  %v910_v0 = vmax.f32 %v846_v25, 0.0  ;;  %v848_v55 = vadd.f32 %v5805_v15, %v777_v61  ;;  %v779_v58 = vmul.f32 %v5792_v9, %v5794_v10 }
  0xf9   :  { %v5882_v28 = vmax.f32 %v909_v13, %v925_v1  ;;  %v924_v3 = vmax.f32 %v860_v21, 0.0  ;;  %v863_v31 = vadd.f32 %v5805_v15, %v792_v22  ;;  %v791_v32 = vmul.f32 %v5792_v9, %v561_v27 }
  0xfa   :  { %v5886_v33 = vpop.permute.xlu0 %1224  ;;  %v5076_v37 = vpop.f32.mrf.mxu0  ;;  %v913_v21 = vmax.f32 %v849_v35, 0.0  ;;  %v851_v22 = vadd.f32 %v5805_v15, %v780_v36  ;;  %v781_v35 = vmul.f32 %v5792_v9, %v5808_v17 }
  0xfb   :  { %v5891_v40 = vmax.f32 %v908_v24, %v924_v3  ;;  %v927_v5 = vmax.f32 %v863_v31, 0.0  ;;  %v862_v42 = vadd.f32 %v5805_v15, %v791_v32  ;;  %v794_v44 = vmul.f32 %v5076_v37, %v5792_v9  ;;  %v5913_v31 = vpop.permute.xlu1 %1949 }
  0xfc   :  { %v571_v13 = vpop.f32.mrf.mxu0  ;;  %v782_v24 = vmul.f32 %v5799_v12, %v5792_v9  ;;  %7841 = vst [vmem:[#allocation29_spill] sm:$0xff] %v5913_v31  ;;  %v912_v32 = vmax.f32 %v848_v55, 0.0 }
  0xfd   :  { %v5900_v14 = vmax.f32 %v911_v34, %v927_v5  ;;  %v926_v7 = vmax.f32 %v862_v42, 0.0  ;;  %v865_v59 = vadd.f32 %v5805_v15, %v794_v44  ;;  %v793_v19 = vmul.f32 %v5792_v9, %v571_v13 }
  0xfe   :  { %v5904_v1 = vpop.permute.xlu0 %1947  ;;  %v5079_v25 = vpop.f32.mrf.mxu0  ;;  %v850_v34 = vadd.f32 %v5805_v15, %v779_v58  ;;  %v853_v13 = vadd.f32 %v5805_v15, %v782_v24 }
  0xff   :  { %7840 = vst [vmem:[#allocation28_spill] sm:$0xff] %v5904_v1  ;;  %v5909_v61 = vmax.f32 %v910_v0, %v926_v7  ;;  %v929_v10 = vmax.f32 %v865_v59, 0.0  ;;  %v864_v27 = vadd.f32 %v5805_v15, %v793_v19  ;;  %v796_v3 = vmul.f32 %v5079_v25, %v5792_v9  ;;  %v5929_v19 = vpop.permute.xlu1 %2190 }
 0x100   :  { %v581_v36 = vpop.f32.mrf.mxu0  ;;  %v915_v0 = vmax.f32 %v851_v22, 0.0  ;;  %7843 = vst [vmem:[#allocation31_spill] sm:$0xff] %v5929_v19  ;;  %v852_v25 = vadd.f32 %v5805_v15, %v781_v35 }
 0x101   :  { %v5918_v37 = vmax.f32 %v913_v21, %v929_v10  ;;  %v928_v12 = vmax.f32 %v864_v27, 0.0  ;;  %v867_v5 = vadd.f32 %v5805_v15, %v796_v3  ;;  %v795_v42 = vmul.f32 %v5792_v9, %v581_v36 }
 0x102   :  { %v5922_v44 = vpop.permute.xlu0 %2188  ;;  %v5082_v7 = vpop.f32.mrf.mxu0  ;;  %v914_v21 = vmax.f32 %v850_v34, 0.0  ;;  %v916_v4 = vmax.f32 %v852_v25, 0.0 }
 0x103   :  { %7842 = vst [vmem:[#allocation30_spill] sm:$0xff] %v5922_v44  ;;  %v5925_v55 = vmax.f32 %v912_v32, %v928_v12  ;;  %v931_v58 = vmax.f32 %v867_v5, 0.0  ;;  %v866_v59 = vadd.f32 %v5805_v15, %v795_v42  ;;  %v798_v17 = vmul.f32 %v5082_v7, %v5792_v9  ;;  %v5941_v34 = vpop.permute.xlu1 %2431 }
 0x104   :  { %v591_v10 = vpop.f32.mrf.mxu0  ;;  %v917_v12 = vmax.f32 %v853_v13, 0.0  ;;  %7845 = vst [vmem:[#allocation33_spill] sm:$0xff] %v5941_v34 }
 0x105   :  { %v5932_v27 = vmax.f32 %v915_v0, %v931_v58  ;;  %v930_v3 = vmax.f32 %v866_v59, 0.0  ;;  %v869_v22 = vadd.f32 %v5805_v15, %v798_v17  ;;  %v797_v24 = vmul.f32 %v5792_v9, %v591_v10 }
 0x106   :  { %v5936_v32 = vpop.permute.xlu0 %2429  ;;  %v5085_v36 = vpop.f32.mrf.mxu0 }
 0x107   :  { %7844 = vst [vmem:[#allocation32_spill] sm:$0xff] %v5936_v32  ;;  %v5938_v5 = vmax.f32 %v914_v21, %v930_v3  ;;  %v933_v42 = vmax.f32 %v869_v22, 0.0  ;;  %v868_v7 = vadd.f32 %v5805_v15, %v797_v24  ;;  %v5949_v23 = vpop.permute.xlu1 %2672 }
 0x108   :  { %v601_v35 = vpop.f32.mrf.mxu0  ;;  %7848 = vst [vmem:[#allocation36_spill] sm:$0xff] %v5949_v23 }
 0x109   :  { %v5943_v0 = vmax.f32 %v917_v12, %v933_v42  ;;  %v932_v58 = vmax.f32 %v868_v7, 0.0  ;;  %v799_v44 = vmul.f32 %v5792_v9, %v601_v35 }
 0x10a   :  { %v5945_v59 = vpop.permute.xlu0 %2670  ;;  %v5088_v17 = vpop.f32.mrf.mxu0 }
 0x10b   :  { %7846 = vst [vmem:[#allocation34_spill] sm:$0xff] %v5945_v59  ;;  %v5947_v10 = vmax.f32 %v916_v4, %v932_v58  ;;  %v1231_v22 = vpop.permute.xlu1 %1230  ;;  %v800_v59 = vmul.f32 %v5085_v36, %v5792_v9  ;;  %v802_v6 = vmul.f32 %v5088_v17, %v5792_v9  ;;  %v870_v51 = vadd.f32 %v5805_v15, %v799_v44 }
 0x10c   :  { %v611_v13 = vpop.f32.mrf.mxu0  ;;  %1331 = vst.msk [vmem:[#allocation3 + $0x140] sm:$0xff] %vm1310_vm3, %v1231_v22 }
 0x10d   :  { %7847 = vst [vmem:[#allocation35_spill] sm:$0xff] %v5947_v10  ;;  %v801_v36 = vmul.f32 %v5792_v9, %v611_v13  ;;  %v873_v17 = vadd.f32 %v5805_v15, %v802_v6  ;;  %v934_v41 = vmax.f32 %v870_v51, 0.0 }
 0x10e   :  { %v5951_v21 = vpop.permute.xlu0 %1228  ;;  %v5091_v3 = vpop.f32.mrf.mxu0 }
 0x10f   :  { %v1472_v12 = vpop.permute.xlu1 %1471  ;;  %v804_v57 = vmul.f32 %v5091_v3, %v5792_v9  ;;  %v937_v10 = vmax.f32 %v873_v17, 0.0 }
 0x110   :  { %v621_v24 = vpop.f32.mrf.mxu0  ;;  %1572 = vst.msk [vmem:[#allocation3 + $0x140] sm:$0xff] %vm1551_vm4, %v1472_v12 }
 0x112   :  { %v5954_v39 = vpop.permute.xlu0 %1469  ;;  %v5094_v25 = vpop.f32.mrf.mxu0 }
 0x113   :  { %v1713_v58 = vpop.permute.xlu1 %1712 }
 0x114   :  { %v5956_v42 = vpop.f32.mrf.mxu0  ;;  %1813 = vst.msk [vmem:[#allocation3 + $0x140] sm:$0xff] %vm1792_vm5, %v1713_v58 }
 0x116   :  { %v5959_v4 = vpop.permute.xlu0 %1710  ;;  %v5961_v7 = vpop.f32.mrf.mxu0 }
 0x117   :  { %v1954_v19 = vpop.permute.xlu1 %1953 }
 0x118   :  { %v5963_v23 = vpop.f32.mrf.mxu0  ;;  %2054 = vst.msk [vmem:[#allocation3 + $0x140] sm:$0xff] %vm2033_vm6, %v1954_v19 }
 0x11a   :  { %v5966_v34 = vpop.permute.xlu0 %1951  ;;  %v5968_v22 = vpop.f32.mrf.mxu0 }
 0x11b   :  { %v2195_v8 = vpop.permute.xlu1 %2194 }
 0x11c   :  { %v5970_v31 = vpop.f32.mrf.mxu0  ;;  %2295 = vst.msk [vmem:[#allocation3 + $0x140] sm:$0xff] %vm2274_vm7, %v2195_v8  ;;  %v871_v8 = vadd.f32 %v5805_v15, %v800_v59  ;;  %v803_v59 = vmul.f32 %v5792_v9, %v621_v24 }
 0x11e   :  { %v5973_v52 = vpop.permute.xlu0 %2192  ;;  %v5975_v12 = vpop.f32.mrf.mxu0  ;;  %v935_v44 = vmax.f32 %v871_v8, 0.0  ;;  %v874_v8 = vadd.f32 %v5805_v15, %v803_v59 }
 0x11f   :  { %v1235_v32 = vpop.permute.xlu1 %1234 }
 0x120   :  { %v5977_v30 = vpop.f32.mrf.mxu0  ;;  %1333 = vst.msk [vmem:[#allocation3 + $0x160] sm:$0xff] %vm1310_vm3, %v1235_v32 }
 0x122   :  { %v5980_v29 = vpop.permute.xlu0 %2433  ;;  %v5982_v58 = vpop.f32.mrf.mxu0 }
 0x123   :  { %v1476_v18 = vpop.permute.xlu1 %1475 }
 0x124   :  { %v5986_v1 = vpop.f32.mrf.mxu0  ;;  %1574 = vst.msk [vmem:[#allocation3 + $0x160] sm:$0xff] %vm1551_vm4, %v1476_v18 }
 0x126   :  { %v5989_v19 = vpop.permute.xlu0 %2674  ;;  %v5109_v2 = vpop.f32.mrf.mxu0 }
 0x127   :  { %v816_v60 = vmul.f32 %v5109_v2, %v5792_v9 }
 0x128   :  { %v681_v49 = vpop.f32.mrf.mxu0 }
 0x129   :  { %v887_v35 = vadd.f32 %v5805_v15, %v816_v60  ;;  %v815_v32 = vmul.f32 %v5792_v9, %v681_v49  ;;  %v872_v60 = vadd.f32 %v5805_v15, %v801_v36 }
 0x12a   :  { %v1233_v47 = vpop.permute.xlu0 %1232  ;;  %v5112_v2 = vpop.f32.mrf.mxu0 }
 0x12b   :  { %1332 = vst.msk [vmem:[#allocation3 + $0x150] sm:$0xff] %vm1310_vm3, %v1233_v47  ;;  %v951_v43 = vmax.f32 %v887_v35, 0.0  ;;  %v886_v13 = vadd.f32 %v5805_v15, %v815_v32  ;;  %v818_v18 = vmul.f32 %v5112_v2, %v5792_v9  ;;  %v875_v47 = vadd.f32 %v5805_v15, %v804_v57 }
 0x12c   :  { %v691_v49 = vpop.f32.mrf.mxu0  ;;  %v806_v35 = vmul.f32 %v5094_v25, %v5792_v9  ;;  %v808_v57 = vmul.f32 %v5961_v7, %v5792_v9  ;;  %v2972_v25 = vld [vmem:[%s7809_s4 + $0x78] sm:$0xff] }
 0x12d   :  { %v983_v38 = vmax.f32 %v935_v44, %v951_v43  ;;  %v950_v46 = vmax.f32 %v886_v13, 0.0  ;;  %v889_v6 = vadd.f32 %v5805_v15, %v818_v18  ;;  %v817_v3 = vmul.f32 %v5792_v9, %v691_v49  ;;  %3096 = vmatpush1.msra.mxu1 %v2972_v25 }
 0x12e   :  { %v1474_v24 = vpop.permute.xlu0 %1473  ;;  %v5115_v32 = vpop.f32.mrf.mxu0  ;;  %v936_v44 = vmax.f32 %v872_v60, 0.0  ;;  %v805_v13 = vmul.f32 %v5792_v9, %v5956_v42  ;;  %v939_v42 = vmax.f32 %v875_v47, 0.0  ;;  %v938_v60 = vmax.f32 %v874_v8, 0.0 }
 0x12f   :  { %1573 = vst.msk [vmem:[#allocation3 + $0x150] sm:$0xff] %vm1551_vm4, %v1474_v24  ;;  %v999_v51 = vmax.f32 %v5830_v50, %v983_v38  ;;  %v982_v36 = vmax.f32 %v934_v41, %v950_v46  ;;  %v953_v43 = vmax.f32 %v889_v6, 0.0  ;;  %v888_v2 = vadd.f32 %v5805_v15, %v817_v3 }
 0x130   :  { %v820_v17 = vmul.f32 %v5115_v32, %v5792_v9  ;;  %v701_v59 = vpop.f32.mrf.mxu0  ;;  %v877_v7 = vadd.f32 %v5805_v15, %v806_v35  ;;  %v7849_v3 = vmov 0.0   ;;  %v876_v35 = vadd.f32 %v5805_v15, %v805_v13 }
 0x131   :  { %1015 = vst.msk [vmem:[#allocation2 + $0x38] sm:$0xff] %vm48_vm2, %v999_v51  ;;  %v998_v38 = vmax.f32 %v5838_v16, %v982_v36  ;;  %v985_v41 = vmax.f32 %v937_v10, %v953_v43  ;;  %v952_v46 = vmax.f32 %v888_v2, 0.0  ;;  %v819_v50 = vmul.f32 %v5792_v9, %v701_v59  ;;  %3097 = vmatprep.subr.mxu1 %v7849_v3  ;;  %v2971_v16 = vld [vmem:[%s7809_s4 + $0x70] sm:$0xff] }
 0x132   :  { %v1715_v18 = vpop.permute.xlu0 %1714  ;;  %v891_v49 = vadd.f32 %v5805_v15, %v820_v17  ;;  %v5118_v6 = vpop.f32.mrf.mxu0  ;;  %3098 = vmatpush1.msra.mxu1 %v2971_v16  ;;  %v6038_v32 = vadd.f32 %v5805_v15, %v808_v57  ;;  %v807_v51 = vmul.f32 %v5792_v9, %v5963_v23  ;;  %v2970_v57 = vld [vmem:[%s7809_s4 + $0x68] sm:$0xff]  ;;  %v941_v59 = vmax.f32 %v877_v7, 0.0  ;;  %96 = vst.msk [vmem:[#allocation5] sm:$0xff] %vm95_vm10, %v7849_v3 }
 0x133   :  { %1814 = vst.msk [vmem:[#allocation3 + $0x150] sm:$0xff] %vm1792_vm5, %v1715_v18  ;;  %v1001_v10 = vmax.f32 %v5846_v26, %v985_v41  ;;  %v984_v24 = vmax.f32 %v936_v44, %v952_v46  ;;  %v890_v47 = vadd.f32 %v5805_v15, %v819_v50  ;;  %v822_v8 = vmul.f32 %v5118_v6, %v5792_v9 }
 0x134   :  { %1014 = vst.msk [vmem:[#allocation2 + $0x28] sm:$0xff] %vm48_vm2, %v998_v38  ;;  %v955_v36 = vmax.f32 %v891_v49, 0.0  ;;  %v711_v43 = vpop.f32.mrf.mxu0  ;;  %3099 = vmatprep.subr.mxu1 %v7849_v3  ;;  %v810_v23 = vmul.f32 %v5968_v22, %v5792_v9  ;;  %v809_v25 = vmul.f32 %v5792_v9, %v5970_v31  ;;  %v940_v31 = vmax.f32 %v876_v35, 0.0 }
 0x135   :  { %1017 = vst.msk [vmem:[#allocation2 + $0x58] sm:$0xff] %vm48_vm2, %v1001_v10  ;;  %v1000_v26 = vmax.f32 %v5855_v62, %v984_v24  ;;  %v954_v2 = vmax.f32 %v890_v47, 0.0  ;;  %v893_v44 = vadd.f32 %v5805_v15, %v822_v8  ;;  %v821_v17 = vmul.f32 %v5792_v9, %v711_v43  ;;  %3100 = vmatpush1.msra.mxu1 %v2970_v57  ;;  %v2969_v62 = vld [vmem:[%s7809_s4 + $0x60] sm:$0xff] }
 0x136   :  { %v1956_v13 = vpop.permute.xlu0 %1955  ;;  %v987_v38 = vmax.f32 %v939_v42, %v955_v36  ;;  %v5121_v41 = vpop.f32.mrf.mxu0  ;;  %3101 = vmatprep.subr.mxu1 %v7849_v3  ;;  %v943_v42 = vmax.f32 %v6038_v32, 0.0  ;;  %v6064_v7 = vadd.f32 %v5805_v15, %v807_v51  ;;  %v6091_v51 = vadd.f32 %v5805_v15, %v809_v25  ;;  %v2968_v25 = vld [vmem:[%s7809_s4 + $0x58] sm:$0xff]  ;;  %97 = vst.msk [vmem:[#allocation5 + $0x8] sm:$0xff] %vm95_vm10, %v7849_v3 }
 0x137   :  { %2055 = vst.msk [vmem:[#allocation3 + $0x150] sm:$0xff] %vm2033_vm6, %v1956_v13  ;;  %v986_v46 = vmax.f32 %v938_v60, %v954_v2  ;;  %v957_v50 = vmax.f32 %v893_v44, 0.0  ;;  %v892_v18 = vadd.f32 %v5805_v15, %v821_v17  ;;  %v824_v22 = vmul.f32 %v5121_v41, %v5792_v9  ;;  %3102 = vmatpush1.msra.mxu1 %v2969_v62 }
 0x138   :  { %1016 = vst.msk [vmem:[#allocation2 + $0x48] sm:$0xff] %vm48_vm2, %v1000_v26  ;;  %v1003_v49 = vmax.f32 %v5864_v53, %v987_v38  ;;  %v721_v6 = vpop.f32.mrf.mxu0  ;;  %v6067_v16 = vld [vmem:[#allocation2 + $0x37] sm:$0xff]  ;;  %v6077_v35 = vld [vmem:[#allocation2 + $0x3f] sm:$0xff]  ;;  %v812_v36 = vmul.f32 %v5975_v12, %v5792_v9  ;;  %3103 = vmatprep.subr.mxu1 %v7849_v3  ;;  %v811_v38 = vmul.f32 %v5792_v9, %v5977_v30 }
 0x139   :  { %v6069_v10 = vld [vmem:[#allocation2 + $0x31] sm:$0xff]  ;;  %v1002_v60 = vmax.f32 %v5873_v20, %v986_v46  ;;  %v989_v24 = vmax.f32 %v941_v59, %v957_v50  ;;  %v956_v47 = vmax.f32 %v892_v18, 0.0  ;;  %v895_v8 = vadd.f32 %v5805_v15, %v824_v22  ;;  %2399 = vrot.lane.b32.xlu1 %v6067_v16, %s5231_s17  ;;  %v6079_v53 = vld [vmem:[#allocation2 + $0x39] sm:$0xff]  ;;  %1076 = vst.msk [vmem:[#allocation3 + $0x60] sm:$0xff] %vm48_vm2, %v6067_v16 }
 0x13a   :  { %2160 = vrot.lane.b32.xlu0 %v6069_v10, %s5230_s18  ;;  %v6081_v32 = vpop.permute.xlu0 %2678  ;;  %2838 = vst.msk [vmem:[#allocation3 + $0x18] sm:$0xff] %vm48_vm2, %v6069_v10  ;;  %v6088_v20 = vadd.f32 %v5805_v15, %v810_v23  ;;  %1019 = vst.msk [vmem:[#allocation2 + $0x78] sm:$0xff] %vm48_vm2, %v1003_v49  ;;  %v823_v43 = vmul.f32 %v5792_v9, %v721_v6  ;;  %v5124_v26 = vpop.f32.mrf.mxu0  ;;  %v6109_v59 = vld [vmem:[#allocation2 + $0x38] sm:$0xff]  ;;  %3104 = vmatpush1.msra.mxu1 %v2968_v25  ;;  %v2967_v49 = vld [vmem:[%s7809_s4 + $0x50] sm:$0xff] }
 0x13b   :  { %v6097_v2 = vld [vmem:[#allocation2 + $0x29] sm:$0xff]  ;;  %2839 = vst.msk [vmem:[#allocation3 + $0x28] sm:$0xff] %vm48_vm2, %v6079_v53  ;;  %1077 = vst.msk [vmem:[#allocation3 + $0x70] sm:$0xff] %vm48_vm2, %v6077_v35  ;;  %v1005_v12 = vmax.f32 %v5882_v28, %v989_v24  ;;  %v988_v17 = vmax.f32 %v940_v31, %v956_v47  ;;  %v959_v13 = vmax.f32 %v895_v8, 0.0  ;;  %v826_v57 = vmul.f32 %v5124_v26, %v5792_v9 }
 0x13c   :  { %v6099_v44 = vld [vmem:[#allocation2 + $0x2f] sm:$0xff]  ;;  %1018 = vst.msk [vmem:[#allocation2 + $0x68] sm:$0xff] %vm48_vm2, %v1002_v60  ;;  %2837 = vst.msk [vmem:[#allocation3 + $0x8] sm:$0xff] %vm48_vm2, %v6097_v2  ;;  %v6113_v23 = vld [vmem:[#allocation2 + $0x27] sm:$0xff]  ;;  %v942_v28 = vmax.f32 %v6064_v7, 0.0  ;;  %v894_v41 = vadd.f32 %v5805_v15, %v823_v43  ;;  %v731_v46 = vpop.f32.mrf.mxu0  ;;  %v6156_v6 = vadd.f32 %v5805_v15, %v812_v36  ;;  %3105 = vmatprep.subr.mxu1 %v7849_v3 }
 0x13d   :  { %1075 = vst.msk [vmem:[#allocation3 + $0x50] sm:$0xff] %vm48_vm2, %v6099_v44  ;;  %v6126_v62 = vld [vmem:[#allocation2 + $0x5f] sm:$0xff]  ;;  %v6128_v50 = vld [vmem:[#allocation2 + $0x51] sm:$0xff]  ;;  %1074 = vst.msk [vmem:[#allocation3 + $0x40] sm:$0xff] %vm48_vm2, %v6113_v23  ;;  %v991_v30 = vmax.f32 %v943_v42, %v959_v13  ;;  %v897_v22 = vadd.f32 %v5805_v15, %v826_v57  ;;  %v825_v31 = vmul.f32 %v5792_v9, %v731_v46  ;;  %2640 = vrot.lane.b32.xlu1 %v6109_v59, %s5229_s20 }
 0x13e   :  { %1318 = vst.msk [vmem:[#allocation3 + $0x70] sm:$0xff] %vm1310_vm3, %v5754_v48  ;;  %v6130_v18 = vld [vmem:[#allocation2 + $0x57] sm:$0xff]  ;;  %1316 = vst.msk [vmem:[#allocation3 + $0x50] sm:$0xff] %vm1310_vm3, %v5743_v45  ;;  %v1004_v48 = vmax.f32 %v5891_v40, %v988_v17  ;;  %v1237_v7 = vpop.permute.xlu0 %1236  ;;  %v945_v40 = vmax.f32 %v6088_v20, 0.0  ;;  %v944_v42 = vmax.f32 %v6091_v51, 0.0  ;;  %v958_v24 = vmax.f32 %v894_v41, 0.0  ;;  %2401 = vrot.lane.b32.xlu0 %v6077_v35, %s5231_s17  ;;  %v5127_v47 = vpop.f32.mrf.mxu0  ;;  %3106 = vmatpush1.msra.mxu1 %v2967_v49 }
 0x13f   :  { %1021 = vst.msk [vmem:[#allocation2 + $0x98] sm:$0xff] %vm48_vm2, %v1005_v12  ;;  %1081 = vst.msk [vmem:[#allocation3 + $0xb0] sm:$0xff] %vm48_vm2, %v6126_v62  ;;  %v6144_v45 = vld [vmem:[#allocation2 + $0x59] sm:$0xff]  ;;  %v6158_v60 = vld [vmem:[#allocation2 + $0x4f] sm:$0xff]  ;;  %v961_v20 = vmax.f32 %v897_v22, 0.0  ;;  %v896_v51 = vadd.f32 %v5805_v15, %v825_v31  ;;  %v828_v36 = vmul.f32 %v5127_v47, %v5792_v9  ;;  %v814_v17 = vmul.f32 %v5982_v58, %v5792_v9 }
 0x140   :  { %1080 = vst.msk [vmem:[#allocation3 + $0xa0] sm:$0xff] %vm48_vm2, %v6130_v18  ;;  %2842 = vst.msk [vmem:[#allocation3 + $0x58] sm:$0xff] %vm48_vm2, %v6128_v50  ;;  %v6164_v8 = vld [vmem:[#allocation2 + $0x41] sm:$0xff]  ;;  %v6178_v26 = vld [vmem:[#allocation2 + $0x49] sm:$0xff]  ;;  %v813_v13 = vmul.f32 %v5792_v9, %v5986_v1  ;;  %v990_v57 = vmax.f32 %v942_v28, %v958_v24  ;;  %v741_v25 = vpop.f32.mrf.mxu0  ;;  %3107 = vmatprep.subr.mxu1 %v7849_v3 }
 0x141   :  { %1322 = vst.msk [vmem:[#allocation3 + $0xb0] sm:$0xff] %vm1310_vm3, %v5773_v63  ;;  %v6166_v43 = vld [vmem:[#allocation2 + $0x47] sm:$0xff]  ;;  %1334 = vst.msk [vmem:[#allocation3 + $0x170] sm:$0xff] %vm1310_vm3, %v1237_v7  ;;  %v1007_v63 = vmax.f32 %v5900_v14, %v991_v30  ;;  %v6188_v14 = vadd.f32 %v5805_v15, %v811_v38  ;;  %v993_v58 = vmax.f32 %v945_v40, %v961_v20  ;;  %v960_v38 = vmax.f32 %v896_v51, 0.0  ;;  %v6209_v28 = vld [vmem:[#allocation2 + $0x77] sm:$0xff] }
 0x142   :  { %2843 = vst.msk [vmem:[#allocation3 + $0x68] sm:$0xff] %vm48_vm2, %v6144_v45  ;;  %1079 = vst.msk [vmem:[#allocation3 + $0x90] sm:$0xff] %vm48_vm2, %v6158_v60  ;;  %v2966_v12 = vld [vmem:[%s7809_s4 + $0x48] sm:$0xff]  ;;  %v2965_v41 = vld [vmem:[%s7809_s4 + $0x40] sm:$0xff]  ;;  %v899_v1 = vadd.f32 %v5805_v15, %v828_v36  ;;  %v827_v46 = vmul.f32 %v5792_v9, %v741_v25  ;;  %1680 = vrot.lane.b32.xlu1 %v6067_v16, %s5227_s25  ;;  %v1006_v30 = vmax.f32 %v5909_v61, %v990_v57  ;;  %v5130_v22 = vpop.f32.mrf.mxu0 }
 0x143   :  { %1020 = vst.msk [vmem:[#allocation2 + $0x88] sm:$0xff] %vm48_vm2, %v1004_v48  ;;  %2840 = vst.msk [vmem:[#allocation3 + $0x38] sm:$0xff] %vm48_vm2, %v6164_v8  ;;  %3108 = vmatpush1.msra.mxu1 %v2966_v12  ;;  %v947_v48 = vmax.f32 %v6156_v6, 0.0  ;;  %1441 = vrot.lane.b32.xlu0 %v6069_v10, %s5226_s28  ;;  %v2878_v31 = vld [vmem:[#allocation3 + $0x8] sm:$0xff]  ;;  %v6215_v7 = vld [vmem:[#allocation2 + $0x6f] sm:$0xff]  ;;  %v1009_v49 = vmax.f32 %v5918_v37, %v993_v58  ;;  %v992_v61 = vmax.f32 %v944_v42, %v960_v38 }
 0x144   :  { %1078 = vst.msk [vmem:[#allocation3 + $0x80] sm:$0xff] %vm48_vm2, %v6166_v43  ;;  %2841 = vst.msk [vmem:[#allocation3 + $0x48] sm:$0xff] %vm48_vm2, %v6178_v26  ;;  %v6219_v16 = vld [vmem:[#allocation2 + $0x61] sm:$0xff]  ;;  %3109 = vmatprep.subr.mxu1 %v7849_v3  ;;  %v963_v40 = vmax.f32 %v899_v1, 0.0  ;;  %v898_v10 = vadd.f32 %v5805_v15, %v827_v46  ;;  %4807 = vmatprep.mubr.msk.f32.mxu1 %vm48_vm2, %v2878_v31  ;;  %v6231_v6 = vld [vmem:[#allocation2 + $0x79] sm:$0xff]  ;;  %v946_v37 = vmax.f32 %v6188_v14, 0.0 }
 0x145   :  { %1320 = vst.msk [vmem:[#allocation3 + $0x90] sm:$0xff] %vm1310_vm3, %v5763_v54  ;;  %v6207_v54 = vld [vmem:[#allocation2 + $0x7f] sm:$0xff]  ;;  %3110 = vmatpush1.msra.mxu1 %v2965_v41  ;;  %v885_v42 = vadd.f32 %v5805_v15, %v814_v17  ;;  %v6241_v47 = vadd.f32 %v5805_v15, %v813_v13  ;;  %v2963_v51 = vld [vmem:[%s7809_s4 + $0x30] sm:$0xff]  ;;  %v1008_v36 = vmax.f32 %v5925_v55, %v992_v61  ;;  %v2962_v55 = vld [vmem:[%s7809_s4 + $0x28] sm:$0xff] }
 0x146   :  { %1023 = vst.msk [vmem:[#allocation2 + $0xd8] sm:$0xff] %vm48_vm2, %v1007_v63  ;;  %1085 = vst.msk [vmem:[#allocation3 + $0xf0] sm:$0xff] %vm48_vm2, %v6207_v54  ;;  %v2964_v24 = vld [vmem:[%s7809_s4 + $0x38] sm:$0xff]  ;;  %v751_v63 = vpop.f32.mrf.mxu0  ;;  %3111 = vmatprep.subr.mxu1 %v7849_v3  ;;  %v995_v12 = vmax.f32 %v947_v48, %v963_v40  ;;  %v962_v14 = vmax.f32 %v898_v10, 0.0  ;;  %1921 = vrot.lane.b32.xlu1 %v6109_v59, %s5228_s15  ;;  %v2075_v46 = vld [vmem:[#allocation2 + $0x21] sm:$0xff] }
 0x147   :  { %1084 = vst.msk [vmem:[#allocation3 + $0xe0] sm:$0xff] %vm48_vm2, %v6209_v28  ;;  %1083 = vst.msk [vmem:[#allocation3 + $0xd0] sm:$0xff] %vm48_vm2, %v6215_v7  ;;  %v6247_v20 = vld [vmem:[#allocation2 + $0x9f] sm:$0xff]  ;;  %v829_v17 = vmul.f32 %v5792_v9, %v751_v63  ;;  %3112 = vmatpush1.msra.mxu1 %v2964_v24  ;;  %1682 = vrot.lane.b32.xlu0 %v6077_v35, %s5227_s25  ;;  %v6288_v58 = vld [vmem:[#allocation2 + $0x97] sm:$0xff]  ;;  %v949_v38 = vmax.f32 %v885_v42, 0.0 }
 0x148   :  { %1326 = vst.msk [vmem:[#allocation3 + $0xf0] sm:$0xff] %vm1310_vm3, %v5834_v56  ;;  %v830_v56 = vmul.f32 %v5130_v22, %v5792_v9  ;;  %1324 = vst.msk [vmem:[#allocation3 + $0xd0] sm:$0xff] %vm1310_vm3, %v5797_v11  ;;  %v6262_v11 = vld [vmem:[#allocation2 + $0x67] sm:$0xff]  ;;  %3113 = vmatprep.subr.mxu1 %v7849_v3  ;;  %v1011_v35 = vmax.f32 %v5932_v27, %v995_v12  ;;  %v994_v25 = vmax.f32 %v946_v37, %v962_v14  ;;  %v6313_v48 = vld [vmem:[#allocation2 + $0x99] sm:$0xff] }
 0x149   :  { %2844 = vst.msk [vmem:[#allocation3 + $0x78] sm:$0xff] %vm48_vm2, %v6219_v16  ;;  %1022 = vst.msk [vmem:[#allocation2 + $0xc8] sm:$0xff] %vm48_vm2, %v1006_v30  ;;  %v900_v41 = vadd.f32 %v5805_v15, %v829_v17  ;;  %3114 = vmatpush1.msra.mxu1 %v2963_v51  ;;  %v948_v27 = vmax.f32 %v6241_v47, 0.0  ;;  %v7850_v61 = vld [vmem:[#allocation35_spill] sm:$0xff]  ;;  %v2974_v47 = vld [vmem:[%s7809_s4 + $0x88] sm:$0xff] }
 0x14a   :  { %2847 = vst.msk [vmem:[#allocation3 + $0xa8] sm:$0xff] %vm48_vm2, %v6231_v6  ;;  %1025 = vst.msk [vmem:[#allocation2 + $0xf8] sm:$0xff] %vm48_vm2, %v1009_v49  ;;  %v901_v13 = vadd.f32 %v5805_v15, %v830_v56  ;;  %v6267_v57 = vld [vmem:[#allocation2 + $0x8f] sm:$0xff]  ;;  %v6271_v9 = vld [vmem:[#allocation2 + $0x81] sm:$0xff]  ;;  %3115 = vmatprep.subr.mxu1 %v7849_v3  ;;  %2162 = vrot.lane.b32.xlu1 %v6079_v53, %s5230_s18 }
 0x14b   :  { %1089 = vst.msk [vmem:[#allocation3 + $0x130] sm:$0xff] %vm48_vm2, %v6247_v20  ;;  %1082 = vst.msk [vmem:[#allocation3 + $0xc0] sm:$0xff] %vm48_vm2, %v6262_v11  ;;  %v2961_v15 = vld [vmem:[%s7809_s4 + $0x20] sm:$0xff]  ;;  %3116 = vmatpush1.msra.mxu1 %v2962_v55  ;;  %2156 = vrot.lane.b32.xlu0 %v2075_v46, %s5230_s18  ;;  %v6323_v22 = vld [vmem:[#allocation2 + $0x89] sm:$0xff] }
 0x14c   :  { %1330 = vst.msk [vmem:[#allocation3 + $0x130] sm:$0xff] %vm1310_vm3, %v5951_v21  ;;  %v6286_v21 = vld [vmem:[#allocation2 + $0x69] sm:$0xff]  ;;  %v965_v1 = vmax.f32 %v901_v13, 0.0  ;;  %3117 = vmatprep.subr.mxu1 %v7849_v3  ;;  %v2957_v24 = vld [vmem:[%s7809_s4] sm:$0xff] }
 0x14d   :  { %1024 = vst.msk [vmem:[#allocation2 + $0xe8] sm:$0xff] %vm48_vm2, %v1008_v36  ;;  %1087 = vst.msk [vmem:[#allocation3 + $0x110] sm:$0xff] %vm48_vm2, %v6267_v57  ;;  %3118 = vmatpush1.msra.mxu1 %v2961_v15  ;;  %v6365_v10 = vld [vmem:[#allocation2 + $0xd7] sm:$0xff]  ;;  %v2973_v51 = vld [vmem:[%s7809_s4 + $0x80] sm:$0xff] }
 0x14e   :  { %1571 = vst.msk [vmem:[#allocation3 + $0x130] sm:$0xff] %vm1551_vm4, %v5954_v39  ;;  %v6300_v39 = vld [vmem:[#allocation2 + $0xdf] sm:$0xff]  ;;  %v997_v30 = vmax.f32 %v949_v38, %v965_v1  ;;  %3119 = vmatprep.subr.mxu1 %v7849_v3  ;;  %1202 = vrot.lane.b32.xlu1 %v6109_v59, %s5225_s23  ;;  %v2806_v36 = vld [vmem:[#allocation2 + $0x71] sm:$0xff]  ;;  %v2556_v13 = vld [vmem:[#allocation2 + $0x28] sm:$0xff] }
 0x14f   :  { %2848 = vst.msk [vmem:[#allocation3 + $0xb8] sm:$0xff] %vm48_vm2, %v6271_v9  ;;  %2845 = vst.msk [vmem:[#allocation3 + $0x88] sm:$0xff] %vm48_vm2, %v6286_v21  ;;  %2397 = vrot.lane.b32.xlu0 %v6099_v44, %s5231_s17  ;;  %v6394_v63 = vld [vmem:[#allocation2 + $0xd9] sm:$0xff]  ;;  %v2818_v1 = vld [vmem:[#allocation2 + $0xd1] sm:$0xff] }
 0x150   :  { %1328 = vst.msk [vmem:[#allocation3 + $0x110] sm:$0xff] %vm1310_vm3, %v5886_v33  ;;  %v1010_v33 = vmax.f32 %v5938_v5, %v994_v25  ;;  %v6321_v5 = vld [vmem:[#allocation2 + $0x87] sm:$0xff]  ;;  %v6330_v31 = vld [vmem:[#allocation2 + $0xcf] sm:$0xff]  ;;  %v1013_v49 = vmax.f32 %v5943_v0, %v997_v30 }
 0x151   :  { %1812 = vst.msk [vmem:[#allocation3 + $0x130] sm:$0xff] %vm1792_vm5, %v5959_v4  ;;  %v964_v4 = vmax.f32 %v900_v41, 0.0  ;;  %v2959_v0 = vld [vmem:[%s7809_s4 + $0x10] sm:$0xff]  ;;  %v6373_v37 = vld [vmem:[#allocation2 + $0xc7] sm:$0xff]  ;;  %v6422_v55 = vld [vmem:[#allocation2 + $0xf9] sm:$0xff] }
 0x152   :  { %1088 = vst.msk [vmem:[#allocation3 + $0x120] sm:$0xff] %vm48_vm2, %v6288_v58  ;;  %1027 = vst.msk [vmem:[#allocation2 + $0x118] sm:$0xff] %vm48_vm2, %v1011_v35  ;;  %1443 = vrot.lane.b32.xlu1 %v6079_v53, %s5226_s28  ;;  %v6379_v42 = vld [vmem:[#allocation2 + $0xc9] sm:$0xff]  ;;  %v6418_v17 = vld [vmem:[#allocation2 + $0xf7] sm:$0xff] }
 0x153   :  { %2053 = vst.msk [vmem:[#allocation3 + $0x130] sm:$0xff] %vm2033_vm6, %v5966_v34  ;;  %v996_v34 = vmax.f32 %v948_v27, %v964_v4  ;;  %1437 = vrot.lane.b32.xlu0 %v2075_v46, %s5226_s28  ;;  %v2816_v38 = vld [vmem:[#allocation2 + $0xc1] sm:$0xff]  ;;  %v2822_v4 = vld [vmem:[#allocation2 + $0xf1] sm:$0xff] }
 0x154   :  { %1097 = vst.msk [vmem:[#allocation3 + $0x1b0] sm:$0xff] %vm48_vm2, %v6300_v39  ;;  %2851 = vst.msk [vmem:[#allocation3 + $0xe8] sm:$0xff] %vm48_vm2, %v6313_v48  ;;  %v6362_v59 = vld [vmem:[#allocation2 + $0xef] sm:$0xff]  ;;  %v6402_v12 = vld [vmem:[#allocation2 + $0xe7] sm:$0xff] }
 0x155   :  { %2294 = vst.msk [vmem:[#allocation3 + $0x130] sm:$0xff] %vm2274_vm7, %v5973_v52  ;;  %v2960_v52 = vld [vmem:[%s7809_s4 + $0x18] sm:$0xff]  ;;  %v1012_v40 = vmax.f32 %v7850_v61, %v996_v34  ;;  %v6416_v14 = vld [vmem:[#allocation2 + $0xe9] sm:$0xff]  ;;  %v2820_v15 = vld [vmem:[#allocation2 + $0xe1] sm:$0xff] }
 0x156   :  { %1026 = vst.msk [vmem:[#allocation2 + $0x108] sm:$0xff] %vm48_vm2, %v1010_v33  ;;  %2849 = vst.msk [vmem:[#allocation3 + $0xc8] sm:$0xff] %vm48_vm2, %v6323_v22  ;;  %3120 = vmatpush1.msra.mxu1 %v2960_v52  ;;  %2395 = vrot.lane.b32.xlu1 %v6113_v23, %s5231_s17 }
 0x157   :  { %2535 = vst.msk [vmem:[#allocation3 + $0x130] sm:$0xff] %vm2515_vm8, %v5980_v29  ;;  %v6343_v29 = vld [vmem:[#allocation2 + $0xff] sm:$0xff]  ;;  %3121 = vmatprep.subr.mxu1 %v7849_v3  ;;  %1678 = vrot.lane.b32.xlu0 %v6099_v44, %s5227_s25  ;;  %v2810_v44 = vld [vmem:[#allocation2 + $0x91] sm:$0xff] }
 0x158   :  { %1086 = vst.msk [vmem:[#allocation3 + $0x100] sm:$0xff] %vm48_vm2, %v6321_v5  ;;  %1095 = vst.msk [vmem:[#allocation3 + $0x190] sm:$0xff] %vm48_vm2, %v6330_v31  ;;  %3122 = vmatpush1.msra.mxu1 %v2959_v0 }
 0x159   :  { %2776 = vst.msk [vmem:[#allocation3 + $0x130] sm:$0xff] %vm2756_vm9, %v5989_v19  ;;  %v2958_v19 = vld [vmem:[%s7809_s4 + $0x8] sm:$0xff]  ;;  %3123 = vmatprep.subr.mxu1 %v7849_v3  ;;  %v6392_v53 = vld [vmem:[#allocation2 + $0x11f] sm:$0xff]  ;;  %v6437_v41 = vld [vmem:[#allocation2 + $0x117] sm:$0xff] }
 0x15a   :  { %1101 = vst.msk [vmem:[#allocation3 + $0x1f0] sm:$0xff] %vm48_vm2, %v6343_v29  ;;  %1029 = vst.msk [vmem:[#allocation2 + $0x138] sm:$0xff] %vm48_vm2, %v1013_v49  ;;  %3124 = vmatpush1.msra.mxu1 %v2958_v19  ;;  %2636 = vrot.lane.b32.xlu1 %v2556_v13, %s5229_s20  ;;  %v6449_v27 = vld [vmem:[#allocation2 + $0x119] sm:$0xff]  ;;  %v2826_v30 = vld [vmem:[#allocation2 + $0x111] sm:$0xff] }
 0x15b   :  { %1028 = vst.msk [vmem:[#allocation2 + $0x128] sm:$0xff] %vm48_vm2, %v1012_v40  ;;  %1099 = vst.msk [vmem:[#allocation3 + $0x1d0] sm:$0xff] %vm48_vm2, %v6362_v59  ;;  %3125 = vmatprep.subr.mxu1 %v7849_v3  ;;  %2168 = vrot.lane.b32.xlu0 %v6128_v50, %s5230_s18 }
 0x15c   :  { %1096 = vst.msk [vmem:[#allocation3 + $0x1a0] sm:$0xff] %vm48_vm2, %v6365_v10  ;;  %1094 = vst.msk [vmem:[#allocation3 + $0x180] sm:$0xff] %vm48_vm2, %v6373_v37  ;;  %3126 = vmatpush1.msra.mxu1 %v2957_v24 }
 0x15d   :  { %v6388_v56 = vld [vmem:[#allocation2 + $0x10f] sm:$0xff]  ;;  %2857 = vst.msk [vmem:[#allocation3 + $0x148] sm:$0xff] %vm48_vm2, %v6379_v42  ;;  %3155 = vmatprep.subr.mxu1 %v7849_v3  ;;  %2859 = vst.msk [vmem:[#allocation3 + $0x168] sm:$0xff] %vm48_vm2, %v6394_v63  ;;  %v6428_v35 = vld [vmem:[#allocation2 + $0x107] sm:$0xff] }
 0x15e   :  { %1103 = vst.msk [vmem:[#allocation3 + $0x210] sm:$0xff] %vm48_vm2, %v6388_v56  ;;  %1105 = vst.msk [vmem:[#allocation3 + $0x230] sm:$0xff] %vm48_vm2, %v6392_v53  ;;  %3156 = vmatpush2.msra.mxu1 %v2974_v47  ;;  %v6435_v25 = vld [vmem:[#allocation2 + $0x109] sm:$0xff]  ;;  %1676 = vrot.lane.b32.xlu1 %v6113_v23, %s5227_s25  ;;  %v2824_v46 = vld [vmem:[#allocation2 + $0x101] sm:$0xff] }
 0x15f   :  { %2846 = vst.msk [vmem:[#allocation3 + $0x98] sm:$0xff] %vm48_vm2, %v2806_v36  ;;  %1098 = vst.msk [vmem:[#allocation3 + $0x1c0] sm:$0xff] %vm48_vm2, %v6402_v12  ;;  %3157 = vmatprep.subr.mxu1 %v7849_v3  ;;  %2409 = vrot.lane.b32.xlu0 %v6126_v62, %s5231_s17  ;;  %v7852_v36 = vld [vmem:[#allocation10_spill] sm:$0xff] }
 0x160   :  { %3158 = vmatpush2.msra.mxu1 %v2973_v51  ;;  %2861 = vst.msk [vmem:[#allocation3 + $0x188] sm:$0xff] %vm48_vm2, %v6416_v14  ;;  %1100 = vst.msk [vmem:[#allocation3 + $0x1e0] sm:$0xff] %vm48_vm2, %v6418_v17 }
 0x161   :  { %5157 = vmatprep.subr.mxu1 %v7849_v3  ;;  %2863 = vst.msk [vmem:[#allocation3 + $0x1a8] sm:$0xff] %vm48_vm2, %v6422_v55  ;;  %2850 = vst.msk [vmem:[#allocation3 + $0xd8] sm:$0xff] %vm48_vm2, %v2810_v44  ;;  %v2830_v52 = vld [vmem:[#allocation2 + $0x131] sm:$0xff]  ;;  %v2831_v49 = vld [vmem:[#allocation2 + $0x139] sm:$0xff] }
 0x162   :  { %1102 = vst.msk [vmem:[#allocation3 + $0x200] sm:$0xff] %vm48_vm2, %v6428_v35  ;;  %2865 = vst.msk [vmem:[#allocation3 + $0x1c8] sm:$0xff] %vm48_vm2, %v6435_v25  ;;  %v6451_v33 = vld [vmem:[#allocation2 + $0x127] sm:$0xff]  ;;  %1917 = vrot.lane.b32.xlu1 %v2556_v13, %s5228_s15  ;;  %v6473_v61 = vld [vmem:[#allocation2 + $0x13f] sm:$0xff] }
 0x163   :  { %1104 = vst.msk [vmem:[#allocation3 + $0x220] sm:$0xff] %vm48_vm2, %v6437_v41  ;;  %2856 = vst.msk [vmem:[#allocation3 + $0x138] sm:$0xff] %vm48_vm2, %v2816_v38  ;;  %v6461_v23 = vld [vmem:[#allocation2 + $0x129] sm:$0xff]  ;;  %v2828_v34 = vld [vmem:[#allocation2 + $0x121] sm:$0xff]  ;;  %1449 = vrot.lane.b32.xlu0 %v6128_v50, %s5226_s28 }
 0x164   :  { %2858 = vst.msk [vmem:[#allocation3 + $0x158] sm:$0xff] %vm48_vm2, %v2818_v1  ;;  %2860 = vst.msk [vmem:[#allocation3 + $0x178] sm:$0xff] %vm48_vm2, %v2820_v15  ;;  %v1067_v40 = vld [vmem:[#allocation2 + $0x12f] sm:$0xff]  ;;  %v1068_v0 = vld [vmem:[#allocation2 + $0x137] sm:$0xff] }
 0x165   :  { %2867 = vst.msk [vmem:[#allocation3 + $0x1e8] sm:$0xff] %vm48_vm2, %v6449_v27  ;;  %1106 = vst.msk [vmem:[#allocation3 + $0x240] sm:$0xff] %vm48_vm2, %v6451_v33  ;;  %v2085_v50 = vld [vmem:[#allocation2 + $0x71] sm:$0xff]  ;;  %v2564_v1 = vld [vmem:[#allocation2 + $0x68] sm:$0xff] }
 0x166   :  { %2862 = vst.msk [vmem:[#allocation3 + $0x198] sm:$0xff] %vm48_vm2, %v2822_v4  ;;  %2869 = vst.msk [vmem:[#allocation3 + $0x208] sm:$0xff] %vm48_vm2, %v6461_v23  ;;  %2158 = vrot.lane.b32.xlu1 %v6097_v2, %s5230_s18  ;;  %v2097_v15 = vld [vmem:[#allocation2 + $0xd1] sm:$0xff]  ;;  %v7853_v4 = vld [vmem:[#allocation11_spill] sm:$0xff] }
 0x167   :  { %2864 = vst.msk [vmem:[#allocation3 + $0x1b8] sm:$0xff] %vm48_vm2, %v2824_v46  ;;  %2866 = vst.msk [vmem:[#allocation3 + $0x1d8] sm:$0xff] %vm48_vm2, %v2826_v30  ;;  %1690 = vrot.lane.b32.xlu0 %v6126_v62, %s5227_s25  ;;  %v2562_v62 = vld [vmem:[#allocation2 + $0x58] sm:$0xff]  ;;  %v7854_v30 = vld [vmem:[#allocation12_spill] sm:$0xff] }
 0x168   :  { %2868 = vst.msk [vmem:[#allocation3 + $0x1f8] sm:$0xff] %vm48_vm2, %v2828_v34  ;;  %2870 = vst.msk [vmem:[#allocation3 + $0x218] sm:$0xff] %vm48_vm2, %v2830_v52  ;;  %v6603_v52 = vld [vmem:[#allocation2 + $0xe0] sm:$0xff] }
 0x169   :  { %2871 = vst.msk [vmem:[#allocation3 + $0x228] sm:$0xff] %vm48_vm2, %v2831_v49  ;;  %1109 = vst.msk [vmem:[#allocation3 + $0x270] sm:$0xff] %vm48_vm2, %v6473_v61 }
 0x16a   :  { %1107 = vst.msk [vmem:[#allocation3 + $0x250] sm:$0xff] %vm48_vm2, %v1067_v40  ;;  %1108 = vst.msk [vmem:[#allocation3 + $0x260] sm:$0xff] %vm48_vm2, %v1068_v0  ;;  %1198 = vrot.lane.b32.xlu1 %v2556_v13, %s5225_s23 }
 0x16b   :  { %2164 = vrot.lane.b32.xlu0 %v6164_v8, %s5230_s18  ;;  %98 = vst.msk [vmem:[#allocation5 + $0x10] sm:$0xff] %vm95_vm10, %v7849_v3  ;;  %99 = vst.msk [vmem:[#allocation5 + $0x18] sm:$0xff] %vm95_vm10, %v7849_v3 }
 0x16c   :  { %100 = vst.msk [vmem:[#allocation5 + $0x20] sm:$0xff] %vm95_vm10, %v7849_v3  ;;  %101 = vst.msk [vmem:[#allocation5 + $0x28] sm:$0xff] %vm95_vm10, %v7849_v3 }
 0x16d   :  { %102 = vst.msk [vmem:[#allocation5 + $0x30] sm:$0xff] %vm95_vm10, %v7849_v3  ;;  %103 = vst.msk [vmem:[#allocation5 + $0x38] sm:$0xff] %vm95_vm10, %v7849_v3 }
 0x16e   :  { %1439 = vrot.lane.b32.xlu1 %v6097_v2, %s5226_s28  ;;  %v2560_v2 = vld [vmem:[#allocation2 + $0x48] sm:$0xff]  ;;  %104 = vst.msk [vmem:[#allocation5 + $0x40] sm:$0xff] %vm95_vm10, %v7849_v3  ;;  %105 = vst.msk [vmem:[#allocation5 + $0x48] sm:$0xff] %vm95_vm10, %v7849_v3 }
 0x16f   :  { %2405 = vrot.lane.b32.xlu0 %v6158_v60, %s5231_s17  ;;  %106 = vst.msk [vmem:[#allocation5 + $0x50] sm:$0xff] %vm95_vm10, %v7849_v3  ;;  %107 = vst.msk [vmem:[#allocation5 + $0x58] sm:$0xff] %vm95_vm10, %v7849_v3 }
 0x170   :  { %108 = vst.msk [vmem:[#allocation5 + $0x60] sm:$0xff] %vm95_vm10, %v7849_v3  ;;  %109 = vst.msk [vmem:[#allocation5 + $0x68] sm:$0xff] %vm95_vm10, %v7849_v3 }
 0x171   :  { %110 = vst.msk [vmem:[#allocation5 + $0x70] sm:$0xff] %vm95_vm10, %v7849_v3  ;;  %111 = vst.msk [vmem:[#allocation5 + $0x78] sm:$0xff] %vm95_vm10, %v7849_v3 }
 0x172   :  { %2407 = vrot.lane.b32.xlu1 %v6130_v18, %s5231_s17 }
 0x173   :  { %1445 = vrot.lane.b32.xlu0 %v6164_v8, %s5226_s28 }
 0x176   :  { %2648 = vrot.lane.b32.xlu1 %v2562_v62, %s5229_s20 }
 0x177   :  { %1686 = vrot.lane.b32.xlu0 %v6158_v60, %s5227_s25 }
 0x17a   :  { %1688 = vrot.lane.b32.xlu1 %v6130_v18, %s5227_s25  ;;  %v2089_v18 = vld [vmem:[#allocation2 + $0x91] sm:$0xff] }
 0x17b   :  { %2176 = vrot.lane.b32.xlu0 %v2085_v50, %s5230_s18 }
 0x17e   :  { %1929 = vrot.lane.b32.xlu1 %v2562_v62, %s5228_s15 }
 0x17f   :  { %2417 = vrot.lane.b32.xlu0 %v6207_v54, %s5231_s17 }
 0x182   :  { %2170 = vrot.lane.b32.xlu1 %v6144_v45, %s5230_s18 }
 0x183   :  { %1457 = vrot.lane.b32.xlu0 %v2085_v50, %s5226_s28  ;;  %v5197_v50 = vld [vmem:[#allocation2 + $0xd0] sm:$0xff] }
 0x186   :  { %1210 = vrot.lane.b32.xlu1 %v2562_v62, %s5225_s23  ;;  %v2880_v62 = vld [vmem:[#allocation3 + $0x18] sm:$0xff] }
 0x187   :  { %1698 = vrot.lane.b32.xlu0 %v6207_v54, %s5227_s25 }
 0x18a   :  { %1451 = vrot.lane.b32.xlu1 %v6144_v45, %s5226_s28  ;;  %v6534_v45 = vpop.permute.xlu0 %1959 }
 0x18b   :  { %2172 = vrot.lane.b32.xlu0 %v6219_v16, %s5230_s18 }
 0x18e   :  { %2403 = vrot.lane.b32.xlu1 %v6166_v43, %s5231_s17 }
 0x18f   :  { %2413 = vrot.lane.b32.xlu0 %v6215_v7, %s5231_s17 }
 0x192   :  { %2644 = vrot.lane.b32.xlu1 %v2560_v2, %s5229_s20 }
 0x193   :  { %1453 = vrot.lane.b32.xlu0 %v6219_v16, %s5226_s28 }
 0x196   :  { %1684 = vrot.lane.b32.xlu1 %v6166_v43, %s5227_s25  ;;  %v2566_v43 = vld [vmem:[#allocation2 + $0x78] sm:$0xff] }
 0x197   :  { %1694 = vrot.lane.b32.xlu0 %v6215_v7, %s5227_s25 }
 0x19a   :  { %1925 = vrot.lane.b32.xlu1 %v2560_v2, %s5228_s15 }
 0x19b   :  { %2184 = vrot.lane.b32.xlu0 %v2089_v18, %s5230_s18 }
 0x19e   :  { %2166 = vrot.lane.b32.xlu1 %v6178_v26, %s5230_s18 }
 0x19f   :  { %2425 = vrot.lane.b32.xlu0 %v6247_v20, %s5231_s17 }
 0x1a2   :  { %1206 = vrot.lane.b32.xlu1 %v2560_v2, %s5225_s23 }
 0x1a3   :  { %1465 = vrot.lane.b32.xlu0 %v2089_v18, %s5226_s28 }
 0x1a6   :  { %1447 = vrot.lane.b32.xlu1 %v6178_v26, %s5226_s28 }
 0x1a7   :  { %1706 = vrot.lane.b32.xlu0 %v6247_v20, %s5227_s25 }
 0x1aa   :  { %2415 = vrot.lane.b32.xlu1 %v6209_v28, %s5231_s17 }
 0x1ab   :  { %2180 = vrot.lane.b32.xlu0 %v6271_v9, %s5230_s18  ;;  %v6542_v60 = vpop.permute.xlu1 %2399 }
 0x1ac   :  { %v2161_v8 = vpop.permute.xlu0 %2160 }
 0x1ae   :  { %2656 = vrot.lane.b32.xlu1 %v2566_v43, %s5229_s20 }
 0x1af   :  { %2421 = vrot.lane.b32.xlu0 %v6267_v57, %s5231_s17  ;;  %v6547_v26 = vpop.permute.xlu1 %2640 }
 0x1b0   :  { %v2402_v54 = vpop.permute.xlu0 %2401 }
 0x1b2   :  { %1696 = vrot.lane.b32.xlu1 %v6209_v28, %s5227_s25  ;;  %v2095_v28 = vld [vmem:[#allocation2 + $0xc1] sm:$0xff] }
 0x1b3   :  { %1461 = vrot.lane.b32.xlu0 %v6271_v9, %s5226_s28  ;;  %v7851_v9 = vld [vmem:[#allocation13_spill] sm:$0xff] }
 0x1b4   :  { %v6553_v7 = vpop.permute.xlu1 %1680 }
 0x1b5   :  { %v1442_v16 = vpop.permute.xlu0 %1441 }
 0x1b6   :  { %1557 = vst.msk [vmem:[#allocation3 + $0x50] sm:$0xff] %vm1551_vm4, %v1442_v16  ;;  %1937 = vrot.lane.b32.xlu1 %v2566_v43, %s5228_s15 }
 0x1b7   :  { %1702 = vrot.lane.b32.xlu0 %v6267_v57, %s5227_s25 }
 0x1b8   :  { %v6559_v20 = vpop.permute.xlu1 %1921 }
 0x1b9   :  { %v1683_v19 = vpop.permute.xlu0 %1682 }
 0x1ba   :  { %1798 = vst.msk [vmem:[#allocation3 + $0x50] sm:$0xff] %vm1792_vm5, %v1683_v19  ;;  %2178 = vrot.lane.b32.xlu1 %v6231_v6, %s5230_s18 }
 0x1bb   :  { %2039 = vst.msk [vmem:[#allocation3 + $0x50] sm:$0xff] %vm2033_vm6, %v7851_v9  ;;  %2196 = vrot.lane.b32.xlu0 %v2095_v28, %s5230_s18 }
 0x1bc   :  { %v6567_v24 = vpop.permute.xlu1 %2162 }
 0x1bd   :  { %v2157_v47 = vpop.permute.xlu0 %2156 }
 0x1be   :  { %2276 = vst.msk [vmem:[#allocation3 + $0x10] sm:$0xff] %vm2274_vm7, %v2157_v47  ;;  %1218 = vrot.lane.b32.xlu1 %v2566_v43, %s5225_s23  ;;  %v2882_v43 = vld [vmem:[#allocation3 + $0x28] sm:$0xff] }
 0x1bf   :  { %2437 = vrot.lane.b32.xlu0 %v6330_v31, %s5231_s17  ;;  %v2570_v47 = vld [vmem:[#allocation2 + $0x98] sm:$0xff] }
 0x1c0   :  { %v1203_v57 = vpop.permute.xlu1 %1202 }
 0x1c1   :  { %1317 = vst.msk [vmem:[#allocation3 + $0x60] sm:$0xff] %vm1310_vm3, %v1203_v57  ;;  %v2398_v51 = vpop.permute.xlu0 %2397 }
 0x1c2   :  { %2517 = vst.msk [vmem:[#allocation3 + $0x10] sm:$0xff] %vm2515_vm8, %v2398_v51  ;;  %1459 = vrot.lane.b32.xlu1 %v6231_v6, %s5226_s28  ;;  %v2886_v51 = vld [vmem:[#allocation3 + $0x48] sm:$0xff] }
 0x1c3   :  { %2758 = vst.msk [vmem:[#allocation3 + $0x10] sm:$0xff] %vm2756_vm9, %v7852_v36  ;;  %1477 = vrot.lane.b32.xlu0 %v2095_v28, %s5226_s28 }
 0x1c4   :  { %v1444_v13 = vpop.permute.xlu1 %1443 }
 0x1c5   :  { %1558 = vst.msk [vmem:[#allocation3 + $0x60] sm:$0xff] %vm1551_vm4, %v1444_v13  ;;  %v1438_v44 = vpop.permute.xlu0 %1437  ;;  %v7857_v13 = vld [vmem:[#allocation15_spill] sm:$0xff] }
 0x1c6   :  { %1555 = vst.msk [vmem:[#allocation3 + $0x30] sm:$0xff] %vm1551_vm4, %v1438_v44  ;;  %2411 = vrot.lane.b32.xlu1 %v6262_v11, %s5231_s17 }
 0x1c7   :  { %1718 = vrot.lane.b32.xlu0 %v6330_v31, %s5227_s25 }
 0x1c8   :  { %v2396_v38 = vpop.permute.xlu1 %2395 }
 0x1c9   :  { %2516 = vst.msk [vmem:[#allocation3] sm:$0xff] %vm2515_vm8, %v2396_v38  ;;  %v1679_v6 = vpop.permute.xlu0 %1678  ;;  %v2581_v38 = vld [vmem:[#allocation2 + $0xf0] sm:$0xff] }
 0x1ca   :  { %1796 = vst.msk [vmem:[#allocation3 + $0x30] sm:$0xff] %vm1792_vm5, %v1679_v6  ;;  %2652 = vrot.lane.b32.xlu1 %v2564_v1, %s5229_s20  ;;  %v2879_v18 = vld [vmem:[#allocation3 + $0x10] sm:$0xff] }
 0x1cb   :  { %2037 = vst.msk [vmem:[#allocation3 + $0x30] sm:$0xff] %vm2033_vm6, %v7853_v4  ;;  %2200 = vrot.lane.b32.xlu0 %v2097_v15, %s5230_s18 }
 0x1cc   :  { %2278 = vst.msk [vmem:[#allocation3 + $0x30] sm:$0xff] %vm2274_vm7, %v2161_v8  ;;  %v2637_v46 = vpop.permute.xlu1 %2636 }
 0x1cd   :  { %2519 = vst.msk [vmem:[#allocation3 + $0x30] sm:$0xff] %vm2515_vm8, %v2402_v54  ;;  %v6595_v31 = vpop.permute.xlu0 %2168  ;;  %v7855_v54 = vld [vmem:[#allocation17_spill] sm:$0xff] }
 0x1ce   :  { %2757 = vst.msk [vmem:[#allocation3] sm:$0xff] %vm2756_vm9, %v2637_v46  ;;  %2760 = vst.msk [vmem:[#allocation3 + $0x30] sm:$0xff] %vm2756_vm9, %v7854_v30  ;;  %1692 = vrot.lane.b32.xlu1 %v6262_v11, %s5227_s25 }
 0x1cf   :  { %2441 = vrot.lane.b32.xlu0 %v6300_v39, %s5231_s17 }
 0x1d0   :  { %v1677_v34 = vpop.permute.xlu1 %1676 }
 0x1d1   :  { %1795 = vst.msk [vmem:[#allocation3 + $0x20] sm:$0xff] %vm1792_vm5, %v1677_v34  ;;  %v6606_v49 = vpop.permute.xlu0 %2409  ;;  %v7859_v34 = vld [vmem:[#allocation21_spill] sm:$0xff] }
 0x1d2   :  { %1933 = vrot.lane.b32.xlu1 %v2564_v1, %s5228_s15 }
 0x1d3   :  { %2682 = vrot.lane.b32.xlu0 %v6603_v52, %s5229_s20 }
 0x1d4   :  { %v1918_v40 = vpop.permute.xlu1 %1917 }
 0x1d5   :  { %v2877_v0 = vld [vmem:[#allocation3] sm:$0xff]  ;;  %2036 = vst.msk [vmem:[#allocation3 + $0x20] sm:$0xff] %vm2033_vm6, %v1918_v40  ;;  %v1450_v11 = vpop.permute.xlu0 %1449  ;;  %v2883_v57 = vld [vmem:[#allocation3 + $0x30] sm:$0xff] }
 0x1d6   :  { %3160 = vmatmul.mubr.f32.vlgmr.msra.gmra.mxu1 %v2877_v0  ;;  %1561 = vst.msk [vmem:[#allocation3 + $0x90] sm:$0xff] %vm1551_vm4, %v1450_v11  ;;  %2174 = vrot.lane.b32.xlu1 %v6286_v21, %s5230_s18  ;;  %v2568_v0 = vld [vmem:[#allocation2 + $0x88] sm:$0xff]  ;;  %v7860_v11 = vld [vmem:[#allocation18_spill] sm:$0xff] }
 0x1d7   :  { %4808 = vmatprep.mubr.msk.f32.mxu1 %vm48_vm2, %v2880_v62  ;;  %1240 = vrot.lane.b32.xlu0 %v5197_v50, %s5225_s23 }
 0x1d8   :  { %v2159_v2 = vpop.permute.xlu1 %2158 }
 0x1d9   :  { %2277 = vst.msk [vmem:[#allocation3 + $0x20] sm:$0xff] %vm2274_vm7, %v2159_v2  ;;  %v1691_v8 = vpop.permute.xlu0 %1690 }
 0x1da   :  { %3165 = vmatmul.mubr.f32.gmra.mxu1 %v2879_v18  ;;  %2518 = vst.msk [vmem:[#allocation3 + $0x20] sm:$0xff] %vm2515_vm8, %v6542_v60  ;;  %1214 = vrot.lane.b32.xlu1 %v2564_v1, %s5225_s23  ;;  %v7858_v1 = vld [vmem:[#allocation16_spill] sm:$0xff] }
 0x1db   :  { %1802 = vst.msk [vmem:[#allocation3 + $0x90] sm:$0xff] %vm1792_vm5, %v1691_v8  ;;  %4809 = vmatprep.mubr.msk.f32.mxu1 %vm48_vm2, %v2882_v43  ;;  %1481 = vrot.lane.b32.xlu0 %v2097_v15, %s5226_s28  ;;  %v6710_v18 = vld [vmem:[#allocation2 + $0x100] sm:$0xff] }
 0x1dc   :  { %2759 = vst.msk [vmem:[#allocation3 + $0x20] sm:$0xff] %vm2756_vm9, %v6547_v26  ;;  %v1199_v16 = vpop.permute.xlu1 %1198  ;;  %v7861_v43 = vld [vmem:[#allocation19_spill] sm:$0xff] }
 0x1dd   :  { %2043 = vst.msk [vmem:[#allocation3 + $0x90] sm:$0xff] %vm2033_vm6, %v7855_v54  ;;  %v2165_v19 = vpop.permute.xlu0 %2164 }
 0x1de   :  { %1315 = vst.msk [vmem:[#allocation3 + $0x40] sm:$0xff] %vm1310_vm3, %v1199_v16  ;;  %1455 = vrot.lane.b32.xlu1 %v6286_v21, %s5226_s28  ;;  %v7856_v21 = vld [vmem:[#allocation14_spill] sm:$0xff] }
 0x1df   :  { %2280 = vst.msk [vmem:[#allocation3 + $0x50] sm:$0xff] %vm2274_vm7, %v2165_v19  ;;  %1722 = vrot.lane.b32.xlu0 %v6300_v39, %s5227_s25  ;;  %v2884_v39 = vld [vmem:[#allocation3 + $0x38] sm:$0xff] }
 0x1e0   :  { %v1440_v60 = vpop.permute.xlu1 %1439  ;;  %v2888_v19 = vld [vmem:[#allocation3 + $0x58] sm:$0xff] }
 0x1e1   :  { %1556 = vst.msk [vmem:[#allocation3 + $0x40] sm:$0xff] %vm1551_vm4, %v1440_v60  ;;  %v2406_v26 = vpop.permute.xlu0 %2405  ;;  %v7862_v60 = vld [vmem:[#allocation20_spill] sm:$0xff] }
 0x1e2   :  { %1797 = vst.msk [vmem:[#allocation3 + $0x40] sm:$0xff] %vm1792_vm5, %v6553_v7  ;;  %2423 = vrot.lane.b32.xlu1 %v6288_v58, %s5231_s17 }
 0x1e3   :  { %2521 = vst.msk [vmem:[#allocation3 + $0x50] sm:$0xff] %vm2515_vm8, %v2406_v26  ;;  %v2881_v28 = vld [vmem:[#allocation3 + $0x20] sm:$0xff]  ;;  %1963 = vrot.lane.b32.xlu0 %v6603_v52, %s5228_s15  ;;  %v2812_v26 = vld [vmem:[#allocation2 + $0xa1] sm:$0xff] }
 0x1e4   :  { %2038 = vst.msk [vmem:[#allocation3 + $0x40] sm:$0xff] %vm2033_vm6, %v6559_v20  ;;  %3170 = vmatmul.mubr.f32.gmra.mxu1 %v2881_v28  ;;  %v6648_v7 = vpop.permute.xlu1 %2407  ;;  %v2099_v20 = vld [vmem:[#allocation2 + $0xe1] sm:$0xff] }
 0x1e5   :  { %2762 = vst.msk [vmem:[#allocation3 + $0x50] sm:$0xff] %vm2756_vm9, %v7856_v21  ;;  %4810 = vmatprep.mubr.msk.f32.mxu1 %vm48_vm2, %v2884_v39  ;;  %v1446_v9 = vpop.permute.xlu0 %1445 }
 0x1e6   :  { %2279 = vst.msk [vmem:[#allocation3 + $0x40] sm:$0xff] %vm2274_vm7, %v6567_v24  ;;  %2664 = vrot.lane.b32.xlu1 %v2570_v47, %s5229_s20 }
 0x1e7   :  { %1559 = vst.msk [vmem:[#allocation3 + $0x70] sm:$0xff] %vm1551_vm4, %v1446_v9  ;;  %2204 = vrot.lane.b32.xlu0 %v2099_v20, %s5230_s18  ;;  %v2890_v9 = vld [vmem:[#allocation3 + $0x68] sm:$0xff] }
 0x1e8   :  { %3175 = vmatmul.mubr.f32.gmra.mxu1 %v2883_v57  ;;  %v6654_v36 = vpop.permute.xlu1 %2648  ;;  %2852 = vst.msk [vmem:[#allocation3 + $0xf8] sm:$0xff] %vm48_vm2, %v2812_v26  ;;  %v7863_v57 = vld [vmem:[#allocation28_spill] sm:$0xff] }
 0x1e9   :  { %4811 = vmatprep.mubr.msk.f32.mxu1 %vm48_vm2, %v2886_v51  ;;  %v1687_v24 = vpop.permute.xlu0 %1686  ;;  %v2892_v51 = vld [vmem:[#allocation3 + $0x78] sm:$0xff] }
 0x1ea   :  { %1800 = vst.msk [vmem:[#allocation3 + $0x70] sm:$0xff] %vm1792_vm5, %v1687_v24  ;;  %1704 = vrot.lane.b32.xlu1 %v6288_v58, %s5227_s25 }
 0x1eb   :  { %2041 = vst.msk [vmem:[#allocation3 + $0x70] sm:$0xff] %vm2033_vm6, %v7857_v13  ;;  %2445 = vrot.lane.b32.xlu0 %v6362_v59, %s5231_s17  ;;  %v2813_v13 = vld [vmem:[#allocation2 + $0xa9] sm:$0xff] }
 0x1ec   :  { %2282 = vst.msk [vmem:[#allocation3 + $0x70] sm:$0xff] %vm2274_vm7, %v6595_v31  ;;  %v6666_v44 = vpop.permute.xlu1 %1688  ;;  %v2887_v21 = vld [vmem:[#allocation3 + $0x50] sm:$0xff] }
 0x1ed   :  { %2523 = vst.msk [vmem:[#allocation3 + $0x70] sm:$0xff] %vm2515_vm8, %v6606_v49  ;;  %v2177_v6 = vpop.permute.xlu0 %2176 }
 0x1ee   :  { %2764 = vst.msk [vmem:[#allocation3 + $0x70] sm:$0xff] %vm2756_vm9, %v7858_v1  ;;  %1945 = vrot.lane.b32.xlu1 %v2570_v47, %s5228_s15  ;;  %v7866_v1 = vld [vmem:[#allocation34_spill] sm:$0xff] }
 0x1ef   :  { %2686 = vrot.lane.b32.xlu0 %v2581_v38, %s5229_s20  ;;  %2853 = vst.msk [vmem:[#allocation3 + $0x108] sm:$0xff] %vm48_vm2, %v2813_v13  ;;  %v6923_v13 = vld [vmem:[#allocation5 + $0xf] sm:$0xff] }
 0x1f0   :  { %v6674_v58 = vpop.permute.xlu1 %1929  ;;  %3644 = vst.msk [vmem:[#allocation6 + $0x18] sm:$0xff] %vm95_vm10, %v6923_v13 }
 0x1f1   :  { %v2418_v15 = vpop.permute.xlu0 %2417 }
 0x1f2   :  { %2186 = vrot.lane.b32.xlu1 %v6313_v48, %s5230_s18 }
 0x1f3   :  { %1244 = vrot.lane.b32.xlu0 %v6603_v52, %s5225_s23 }
 0x1f4   :  { %v6680_v4 = vpop.permute.xlu1 %2170 }
 0x1f5   :  { %v1458_v46 = vpop.permute.xlu0 %1457 }
 0x1f6   :  { %1565 = vst.msk [vmem:[#allocation3 + $0xd0] sm:$0xff] %vm1551_vm4, %v1458_v46  ;;  %1226 = vrot.lane.b32.xlu1 %v2570_v47, %s5225_s23 }
 0x1f7   :  { %1485 = vrot.lane.b32.xlu0 %v2099_v20, %s5226_s28 }
 0x1f8   :  { %v1211_v31 = vpop.permute.xlu1 %1210 }
 0x1f9   :  { %1321 = vst.msk [vmem:[#allocation3 + $0xa0] sm:$0xff] %vm1310_vm3, %v1211_v31  ;;  %v1699_v30 = vpop.permute.xlu0 %1698  ;;  %v2814_v31 = vld [vmem:[#allocation2 + $0xb1] sm:$0xff] }
 0x1fa   :  { %1806 = vst.msk [vmem:[#allocation3 + $0xd0] sm:$0xff] %vm1792_vm5, %v1699_v30  ;;  %1467 = vrot.lane.b32.xlu1 %v6313_v48, %s5226_s28  ;;  %v2815_v30 = vld [vmem:[#allocation2 + $0xb9] sm:$0xff] }
 0x1fb   :  { %2047 = vst.msk [vmem:[#allocation3 + $0xd0] sm:$0xff] %vm2033_vm6, %v7859_v34  ;;  %1726 = vrot.lane.b32.xlu0 %v6362_v59, %s5227_s25  ;;  %v2101_v59 = vld [vmem:[#allocation2 + $0xf1] sm:$0xff] }
 0x1fc   :  { %v1452_v52 = vpop.permute.xlu1 %1451  ;;  %2854 = vst.msk [vmem:[#allocation3 + $0x118] sm:$0xff] %vm48_vm2, %v2814_v31  ;;  %2855 = vst.msk [vmem:[#allocation3 + $0x128] sm:$0xff] %vm48_vm2, %v2815_v30 }
 0x1fd   :  { %1562 = vst.msk [vmem:[#allocation3 + $0xa0] sm:$0xff] %vm1551_vm4, %v1452_v52  ;;  %v2173_v49 = vpop.permute.xlu0 %2172  ;;  %v7867_v52 = vld [vmem:[#allocation22_spill] sm:$0xff] }
 0x1fe   :  { %2284 = vst.msk [vmem:[#allocation3 + $0x90] sm:$0xff] %vm2274_vm7, %v2173_v49  ;;  %2419 = vrot.lane.b32.xlu1 %v6321_v5, %s5231_s17 }
 0x1ff   :  { %1967 = vrot.lane.b32.xlu0 %v2581_v38, %s5228_s15 }
 0x200   :  { %v2404_v40 = vpop.permute.xlu1 %2403 }
 0x201   :  { %2520 = vst.msk [vmem:[#allocation3 + $0x40] sm:$0xff] %vm2515_vm8, %v2404_v40  ;;  %v2414_v48 = vpop.permute.xlu0 %2413  ;;  %v6823_v40 = vld [vmem:[#allocation2 + $0x110] sm:$0xff] }
 0x202   :  { %2525 = vst.msk [vmem:[#allocation3 + $0x90] sm:$0xff] %vm2515_vm8, %v2414_v48  ;;  %2660 = vrot.lane.b32.xlu1 %v2568_v0, %s5229_s20 }
 0x203   :  { %2766 = vst.msk [vmem:[#allocation3 + $0x90] sm:$0xff] %vm2756_vm9, %v7860_v11  ;;  %2208 = vrot.lane.b32.xlu0 %v2101_v59, %s5230_s18 }
 0x204   :  { %v2645_v62 = vpop.permute.xlu1 %2644 }
 0x205   :  { %2761 = vst.msk [vmem:[#allocation3 + $0x40] sm:$0xff] %vm2756_vm9, %v2645_v62  ;;  %v1454_v50 = vpop.permute.xlu0 %1453  ;;  %v7868_v62 = vld [vmem:[#allocation23_spill] sm:$0xff] }
 0x206   :  { %1563 = vst.msk [vmem:[#allocation3 + $0xb0] sm:$0xff] %vm1551_vm4, %v1454_v50  ;;  %1700 = vrot.lane.b32.xlu1 %v6321_v5, %s5227_s25 }
 0x207   :  { %2449 = vrot.lane.b32.xlu0 %v6343_v29, %s5231_s17 }
 0x208   :  { %v1685_v2 = vpop.permute.xlu1 %1684 }
 0x209   :  { %1799 = vst.msk [vmem:[#allocation3 + $0x60] sm:$0xff] %vm1792_vm5, %v1685_v2  ;;  %v1695_v8 = vpop.permute.xlu0 %1694 }
 0x20a   :  { %1804 = vst.msk [vmem:[#allocation3 + $0xb0] sm:$0xff] %vm1792_vm5, %v1695_v8  ;;  %1941 = vrot.lane.b32.xlu1 %v2568_v0, %s5228_s15  ;;  %v7869_v8 = vld [vmem:[#allocation25_spill] sm:$0xff] }
 0x20b   :  { %2045 = vst.msk [vmem:[#allocation3 + $0xb0] sm:$0xff] %vm2033_vm6, %v7861_v43  ;;  %2690 = vrot.lane.b32.xlu0 %v6710_v18, %s5229_s20 }
 0x20c   :  { %2286 = vst.msk [vmem:[#allocation3 + $0xb0] sm:$0xff] %vm2274_vm7, %v2177_v6  ;;  %v1926_v5 = vpop.permute.xlu1 %1925  ;;  %v2885_v54 = vld [vmem:[#allocation3 + $0x40] sm:$0xff]  ;;  %v6800_v6 = vld [vmem:[#allocation2 + $0xd8] sm:$0xff] }
 0x20d   :  { %2527 = vst.msk [vmem:[#allocation3 + $0xb0] sm:$0xff] %vm2515_vm8, %v2418_v15  ;;  %v6722_v16 = vpop.permute.xlu0 %2184  ;;  %3180 = vmatmul.mubr.f32.gmra.mxu1 %v2885_v54  ;;  %v2891_v15 = vld [vmem:[#allocation3 + $0x70] sm:$0xff] }
 0x20e   :  { %2040 = vst.msk [vmem:[#allocation3 + $0x60] sm:$0xff] %vm2033_vm6, %v1926_v5  ;;  %2182 = vrot.lane.b32.xlu1 %v6323_v22, %s5230_s18  ;;  %4812 = vmatprep.mubr.msk.f32.mxu1 %vm48_vm2, %v2888_v19 }
 0x20f   :  { %2768 = vst.msk [vmem:[#allocation3 + $0xb0] sm:$0xff] %vm2756_vm9, %v7862_v60  ;;  %1248 = vrot.lane.b32.xlu0 %v2581_v38, %s5225_s23 }
 0x210   :  { %v2167_v28 = vpop.permute.xlu1 %2166 }
 0x211   :  { %2281 = vst.msk [vmem:[#allocation3 + $0x60] sm:$0xff] %vm2274_vm7, %v2167_v28  ;;  %v6732_v39 = vpop.permute.xlu0 %2425  ;;  %3185 = vmatmul.mubr.f32.gmra.mxu1 %v2887_v21  ;;  %v2896_v21 = vld [vmem:[#allocation3 + $0x98] sm:$0xff] }
 0x212   :  { %2522 = vst.msk [vmem:[#allocation3 + $0x60] sm:$0xff] %vm2515_vm8, %v6648_v7  ;;  %1222 = vrot.lane.b32.xlu1 %v2568_v0, %s5225_s23  ;;  %4813 = vmatprep.mubr.msk.f32.mxu1 %vm48_vm2, %v2890_v9  ;;  %v2576_v0 = vld [vmem:[#allocation2 + $0xc8] sm:$0xff]  ;;  %v2895_v9 = vld [vmem:[#allocation3 + $0x90] sm:$0xff] }
 0x213   :  { %2763 = vst.msk [vmem:[#allocation3 + $0x60] sm:$0xff] %vm2756_vm9, %v6654_v36  ;;  %1489 = vrot.lane.b32.xlu0 %v2101_v59, %s5226_s28  ;;  %v7864_v36 = vld [vmem:[#allocation30_spill] sm:$0xff] }
 0x214   :  { %v1207_v47 = vpop.permute.xlu1 %1206 }
 0x215   :  { %1319 = vst.msk [vmem:[#allocation3 + $0x80] sm:$0xff] %vm1310_vm3, %v1207_v47  ;;  %v1466_v20 = vpop.permute.xlu0 %1465 }
 0x216   :  { %1569 = vst.msk [vmem:[#allocation3 + $0x110] sm:$0xff] %vm1551_vm4, %v1466_v20  ;;  %1463 = vrot.lane.b32.xlu1 %v6323_v22, %s5226_s28  ;;  %v2898_v20 = vld [vmem:[#allocation3 + $0xa8] sm:$0xff] }
 0x217   :  { %1730 = vrot.lane.b32.xlu0 %v6343_v29, %s5227_s25 }
 0x218   :  { %v1448_v22 = vpop.permute.xlu1 %1447 }
 0x219   :  { %1560 = vst.msk [vmem:[#allocation3 + $0x80] sm:$0xff] %vm1551_vm4, %v1448_v22  ;;  %v1707_v29 = vpop.permute.xlu0 %1706 }
 0x21a   :  { %1801 = vst.msk [vmem:[#allocation3 + $0x80] sm:$0xff] %vm1792_vm5, %v6666_v44  ;;  %1810 = vst.msk [vmem:[#allocation3 + $0x110] sm:$0xff] %vm1792_vm5, %v1707_v29  ;;  %2439 = vrot.lane.b32.xlu1 %v6365_v10, %s5231_s17  ;;  %v2889_v7 = vld [vmem:[#allocation3 + $0x60] sm:$0xff]  ;;  %v7865_v44 = vld [vmem:[#allocation32_spill] sm:$0xff] }
 0x21b   :  { %2042 = vst.msk [vmem:[#allocation3 + $0x80] sm:$0xff] %vm2033_vm6, %v6674_v58  ;;  %2051 = vst.msk [vmem:[#allocation3 + $0x110] sm:$0xff] %vm2033_vm6, %v7863_v57  ;;  %1971 = vrot.lane.b32.xlu0 %v6710_v18, %s5228_s15  ;;  %3190 = vmatmul.mubr.f32.gmra.mxu1 %v2889_v7  ;;  %v2103_v58 = vld [vmem:[#allocation2 + $0x101] sm:$0xff] }
 0x21c   :  { %2292 = vst.msk [vmem:[#allocation3 + $0x110] sm:$0xff] %vm2274_vm7, %v7864_v36  ;;  %2283 = vst.msk [vmem:[#allocation3 + $0x80] sm:$0xff] %vm2274_vm7, %v6680_v4  ;;  %v6795_v24 = vpop.permute.xlu1 %2415  ;;  %4814 = vmatprep.mubr.msk.f32.mxu1 %vm48_vm2, %v2892_v51  ;;  %v2894_v4 = vld [vmem:[#allocation3 + $0x88] sm:$0xff]  ;;  %v6901_v7 = vld [vmem:[#allocation2 + $0xe8] sm:$0xff] }
 0x21d   :  { %2533 = vst.msk [vmem:[#allocation3 + $0x110] sm:$0xff] %vm2515_vm8, %v7865_v44  ;;  %v2181_v38 = vpop.permute.xlu0 %2180 }
 0x21e   :  { %2774 = vst.msk [vmem:[#allocation3 + $0x110] sm:$0xff] %vm2756_vm9, %v7866_v1  ;;  %2680 = vrot.lane.b32.xlu1 %v6800_v6, %s5229_s20  ;;  %v2902_v1 = vld [vmem:[#allocation3 + $0xc8] sm:$0xff] }
 0x21f   :  { %2288 = vst.msk [vmem:[#allocation3 + $0xd0] sm:$0xff] %vm2274_vm7, %v2181_v38  ;;  %2212 = vrot.lane.b32.xlu0 %v2103_v58, %s5230_s18  ;;  %3195 = vmatmul.mubr.f32.gmra.mxu1 %v2891_v15  ;;  %v2107_v38 = vld [vmem:[#allocation2 + $0x121] sm:$0xff] }
 0x220   :  { %v6809_v46 = vpop.permute.xlu1 %2656  ;;  %4815 = vmatprep.mubr.msk.f32.mxu1 %vm48_vm2, %v2894_v4  ;;  %v2348_v4 = vld [vmem:[#allocation2 + $0x12f] sm:$0xff] }
 0x221   :  { %v2422_v34 = vpop.permute.xlu0 %2421 }
 0x222   :  { %2529 = vst.msk [vmem:[#allocation3 + $0xd0] sm:$0xff] %vm2515_vm8, %v2422_v34  ;;  %2435 = vrot.lane.b32.xlu1 %v6373_v37, %s5231_s17  ;;  %v6946_v34 = vld [vmem:[#allocation5 + $0x10] sm:$0xff] }
 0x223   :  { %2770 = vst.msk [vmem:[#allocation3 + $0xd0] sm:$0xff] %vm2756_vm9, %v7867_v52  ;;  %2453 = vrot.lane.b32.xlu0 %v6388_v56, %s5231_s17  ;;  %v6948_v52 = vld [vmem:[#allocation5 + $0x37] sm:$0xff] }
 0x224   :  { %v6821_v49 = vpop.permute.xlu1 %1696  ;;  %3649 = vst.msk [vmem:[#allocation6 + $0x90] sm:$0xff] %vm95_vm10, %v6948_v52  ;;  %3886 = vst.msk [vmem:[#allocation6 + $0x8] sm:$0xff] %vm95_vm10, %v6946_v34 }
 0x225   :  { %v1462_v48 = vpop.permute.xlu0 %1461 }
 0x226   :  { %1567 = vst.msk [vmem:[#allocation3 + $0xf0] sm:$0xff] %vm1551_vm4, %v1462_v48  ;;  %2676 = vrot.lane.b32.xlu1 %v2576_v0, %s5229_s20 }
 0x227   :  { %2694 = vrot.lane.b32.xlu0 %v6823_v40, %s5229_s20 }
 0x228   :  { %v6829_v59 = vpop.permute.xlu1 %1937 }
 0x229   :  { %v1703_v11 = vpop.permute.xlu0 %1702 }
 0x22a   :  { %1808 = vst.msk [vmem:[#allocation3 + $0xf0] sm:$0xff] %vm1792_vm5, %v1703_v11  ;;  %1716 = vrot.lane.b32.xlu1 %v6373_v37, %s5227_s25  ;;  %v6970_v11 = vld [vmem:[#allocation2 + $0xf8] sm:$0xff] }
 0x22b   :  { %2049 = vst.msk [vmem:[#allocation3 + $0xf0] sm:$0xff] %vm2033_vm6, %v7868_v62  ;;  %1252 = vrot.lane.b32.xlu0 %v6710_v18, %s5225_s23 }
 0x22c   :  { %2290 = vst.msk [vmem:[#allocation3 + $0xf0] sm:$0xff] %vm2274_vm7, %v6722_v16  ;;  %v6840_v50 = vpop.permute.xlu1 %2178 }
 0x22d   :  { %2531 = vst.msk [vmem:[#allocation3 + $0xf0] sm:$0xff] %vm2515_vm8, %v6732_v39  ;;  %v2197_v2 = vpop.permute.xlu0 %2196 }
 0x22e   :  { %2772 = vst.msk [vmem:[#allocation3 + $0xf0] sm:$0xff] %vm2756_vm9, %v7869_v8  ;;  %1957 = vrot.lane.b32.xlu1 %v2576_v0, %s5228_s15  ;;  %v6982_v8 = vld [vmem:[#allocation5 + $0x3f] sm:$0xff] }
 0x22f   :  { %2296 = vst.msk [vmem:[#allocation3 + $0x150] sm:$0xff] %vm2274_vm7, %v2197_v2  ;;  %1493 = vrot.lane.b32.xlu0 %v2103_v58, %s5226_s28  ;;  %v7870_v2 = vld [vmem:[#allocation27_spill] sm:$0xff] }
 0x230   :  { %v1219_v37 = vpop.permute.xlu1 %1218  ;;  %3650 = vst.msk [vmem:[#allocation6 + $0xa8] sm:$0xff] %vm95_vm10, %v6982_v8 }
 0x231   :  { %1325 = vst.msk [vmem:[#allocation3 + $0xe0] sm:$0xff] %vm1310_vm3, %v1219_v37  ;;  %v2438_v18 = vpop.permute.xlu0 %2437  ;;  %v7871_v37 = vld [vmem:[#allocation29_spill] sm:$0xff] }
 0x232   :  { %2537 = vst.msk [vmem:[#allocation3 + $0x150] sm:$0xff] %vm2515_vm8, %v2438_v18  ;;  %2198 = vrot.lane.b32.xlu1 %v6379_v42, %s5230_s18  ;;  %v7872_v18 = vld [vmem:[#allocation31_spill] sm:$0xff] }
 0x233   :  { %2778 = vst.msk [vmem:[#allocation3 + $0x150] sm:$0xff] %vm2756_vm9, %v6081_v32  ;;  %1734 = vrot.lane.b32.xlu0 %v6388_v56, %s5227_s25  ;;  %v2105_v32 = vld [vmem:[#allocation2 + $0x111] sm:$0xff] }
 0x234   :  { %v1460_v43 = vpop.permute.xlu1 %1459 }
 0x235   :  { %1566 = vst.msk [vmem:[#allocation3 + $0xe0] sm:$0xff] %vm1551_vm4, %v1460_v43  ;;  %v1478_v5 = vpop.permute.xlu0 %1477 }
 0x236   :  { %1575 = vst.msk [vmem:[#allocation3 + $0x170] sm:$0xff] %vm1551_vm4, %v1478_v5  ;;  %1238 = vrot.lane.b32.xlu1 %v2576_v0, %s5225_s23  ;;  %v7873_v5 = vld [vmem:[#allocation33_spill] sm:$0xff] }
 0x237   :  { %1975 = vrot.lane.b32.xlu0 %v6823_v40, %s5228_s15 }
 0x238   :  { %v2412_v54 = vpop.permute.xlu1 %2411 }
 0x239   :  { %2524 = vst.msk [vmem:[#allocation3 + $0x80] sm:$0xff] %vm2515_vm8, %v2412_v54  ;;  %v1719_v16 = vpop.permute.xlu0 %1718 }
 0x23a   :  { %1816 = vst.msk [vmem:[#allocation3 + $0x170] sm:$0xff] %vm1792_vm5, %v1719_v16  ;;  %1479 = vrot.lane.b32.xlu1 %v6379_v42, %s5226_s28  ;;  %v6875_v42 = vld [vmem:[#allocation2 + $0x120] sm:$0xff] }
 0x23b   :  { %2057 = vst.msk [vmem:[#allocation3 + $0x170] sm:$0xff] %vm2033_vm6, %v6534_v45  ;;  %2216 = vrot.lane.b32.xlu0 %v2105_v32, %s5230_s18  ;;  %v7874_v16 = vld [vmem:[#allocation36_spill] sm:$0xff] }
 0x23c   :  { %v2653_v56 = vpop.permute.xlu1 %2652 }
 0x23d   :  { %2765 = vst.msk [vmem:[#allocation3 + $0x80] sm:$0xff] %vm2756_vm9, %v2653_v56  ;;  %v2201_v19 = vpop.permute.xlu0 %2200 }
 0x23e   :  { %2298 = vst.msk [vmem:[#allocation3 + $0x170] sm:$0xff] %vm2274_vm7, %v2201_v19  ;;  %1720 = vrot.lane.b32.xlu1 %v6365_v10, %s5227_s25 }
 0x23f   :  { %2457 = vrot.lane.b32.xlu0 %v6392_v53, %s5231_s17 }
 0x240   :  { %v1693_v60 = vpop.permute.xlu1 %1692 }
 0x241   :  { %1803 = vst.msk [vmem:[#allocation3 + $0xa0] sm:$0xff] %vm1792_vm5, %v1693_v60  ;;  %v2442_v45 = vpop.permute.xlu0 %2441  ;;  %v2350_v60 = vld [vmem:[#allocation2 + $0x13f] sm:$0xff] }
 0x242   :  { %2539 = vst.msk [vmem:[#allocation3 + $0x170] sm:$0xff] %vm2515_vm8, %v2442_v45  ;;  %1961 = vrot.lane.b32.xlu1 %v6800_v6, %s5228_s15  ;;  %v2591_v45 = vld [vmem:[#allocation2 + $0x140] sm:$0xff] }
 0x243   :  { %2698 = vrot.lane.b32.xlu0 %v6875_v42, %s5229_s20 }
 0x244   :  { %v1934_v26 = vpop.permute.xlu1 %1933  ;;  %v2893_v28 = vld [vmem:[#allocation3 + $0x80] sm:$0xff] }
 0x245   :  { %2044 = vst.msk [vmem:[#allocation3 + $0xa0] sm:$0xff] %vm2033_vm6, %v1934_v26  ;;  %v2683_v10 = vpop.permute.xlu0 %2682  ;;  %3200 = vmatmul.mubr.f32.gmra.mxu1 %v2893_v28 }
 0x246   :  { %2780 = vst.msk [vmem:[#allocation3 + $0x170] sm:$0xff] %vm2756_vm9, %v2683_v10  ;;  %2202 = vrot.lane.b32.xlu1 %v6394_v63, %s5230_s18  ;;  %4816 = vmatprep.mubr.msk.f32.mxu1 %vm48_vm2, %v2896_v21  ;;  %v2904_v10 = vld [vmem:[#allocation3 + $0xd8] sm:$0xff]  ;;  %v2110_v21 = vld [vmem:[#allocation2 + $0x139] sm:$0xff] }
 0x247   :  { %1256 = vrot.lane.b32.xlu0 %v6823_v40, %s5225_s23 }
 0x248   :  { %v2175_v39 = vpop.permute.xlu1 %2174 }
 0x249   :  { %2285 = vst.msk [vmem:[#allocation3 + $0xa0] sm:$0xff] %vm2274_vm7, %v2175_v39  ;;  %v1241_v47 = vpop.permute.xlu0 %1240  ;;  %3205 = vmatmul.mubr.f32.gmra.mxu1 %v2895_v9  ;;  %v2903_v9 = vld [vmem:[#allocation3 + $0xd0] sm:$0xff] }
 0x24a   :  { %2526 = vst.msk [vmem:[#allocation3 + $0xa0] sm:$0xff] %vm2515_vm8, %v6795_v24  ;;  %2443 = vrot.lane.b32.xlu1 %v6402_v12, %s5231_s17  ;;  %4817 = vmatprep.mubr.msk.f32.mxu1 %vm48_vm2, %v2898_v20 }
 0x24b   :  { %1336 = vst.msk [vmem:[#allocation3 + $0x190] sm:$0xff] %vm1310_vm3, %v1241_v47  ;;  %1497 = vrot.lane.b32.xlu0 %v2105_v32, %s5226_s28  ;;  %v2109_v32 = vld [vmem:[#allocation2 + $0x131] sm:$0xff]  ;;  %v2592_v47 = vld [vmem:[#allocation2 + $0x148] sm:$0xff] }
 0x24c   :  { %2767 = vst.msk [vmem:[#allocation3 + $0xa0] sm:$0xff] %vm2756_vm9, %v6809_v46  ;;  %v1215_v22 = vpop.permute.xlu1 %1214  ;;  %v2589_v46 = vld [vmem:[#allocation2 + $0x130] sm:$0xff] }
 0x24d   :  { %1323 = vst.msk [vmem:[#allocation3 + $0xc0] sm:$0xff] %vm1310_vm3, %v1215_v22  ;;  %v1482_v29 = vpop.permute.xlu0 %1481  ;;  %v2906_v22 = vld [vmem:[#allocation3 + $0xe8] sm:$0xff] }
 0x24e   :  { %1577 = vst.msk [vmem:[#allocation3 + $0x190] sm:$0xff] %vm1551_vm4, %v1482_v29  ;;  %2684 = vrot.lane.b32.xlu1 %v6901_v7, %s5229_s20 }
 0x24f   :  { %1738 = vrot.lane.b32.xlu0 %v6392_v53, %s5227_s25  ;;  %v2900_v53 = vld [vmem:[#allocation3 + $0xb8] sm:$0xff] }
 0x250   :  { %v1456_v57 = vpop.permute.xlu1 %1455 }
 0x251   :  { %1564 = vst.msk [vmem:[#allocation3 + $0xc0] sm:$0xff] %vm1551_vm4, %v1456_v57  ;;  %v1723_v51 = vpop.permute.xlu0 %1722 }
 0x252   :  { %1805 = vst.msk [vmem:[#allocation3 + $0xc0] sm:$0xff] %vm1792_vm5, %v6821_v49  ;;  %1818 = vst.msk [vmem:[#allocation3 + $0x190] sm:$0xff] %vm1792_vm5, %v1723_v51  ;;  %1242 = vrot.lane.b32.xlu1 %v6800_v6, %s5225_s23  ;;  %v2899_v6 = vld [vmem:[#allocation3 + $0xb0] sm:$0xff]  ;;  %v6957_v49 = vld [vmem:[#allocation5 + $0x38] sm:$0xff] }
 0x253   :  { %v2897_v36 = vld [vmem:[#allocation3 + $0xa0] sm:$0xff]  ;;  %2046 = vst.msk [vmem:[#allocation3 + $0xc0] sm:$0xff] %vm2033_vm6, %v6829_v59  ;;  %1979 = vrot.lane.b32.xlu0 %v6875_v42, %s5228_s15  ;;  %v7027_v51 = vld [vmem:[#allocation2 + $0x108] sm:$0xff] }
 0x254   :  { %3210 = vmatmul.mubr.f32.gmra.mxu1 %v2897_v36  ;;  %2287 = vst.msk [vmem:[#allocation3 + $0xc0] sm:$0xff] %vm2274_vm7, %v6840_v50  ;;  %v6920_v24 = vpop.permute.xlu1 %2423 }
 0x255   :  { %4818 = vmatprep.mubr.msk.f32.mxu1 %vm48_vm2, %v2900_v53  ;;  %v1964_v44 = vpop.permute.xlu0 %1963  ;;  %3891 = vst.msk [vmem:[#allocation6 + $0x80] sm:$0xff] %vm95_vm10, %v6957_v49  ;;  %v3728_v53 = vld [vmem:[#allocation5 + $0x9] sm:$0xff] }
 0x256   :  { %2059 = vst.msk [vmem:[#allocation3 + $0x190] sm:$0xff] %vm2033_vm6, %v1964_v44  ;;  %1483 = vrot.lane.b32.xlu1 %v6394_v63, %s5226_s28  ;;  %v2908_v44 = vld [vmem:[#allocation3 + $0xf8] sm:$0xff] }
 0x257   :  { %2220 = vrot.lane.b32.xlu0 %v2107_v38, %s5230_s18 }
 0x258   :  { %3215 = vmatmul.mubr.f32.gmra.mxu1 %v2899_v6  ;;  %v6931_v58 = vpop.permute.xlu1 %2664 }
 0x259   :  { %4819 = vmatprep.mubr.msk.f32.mxu1 %vm48_vm2, %v2902_v1  ;;  %v2205_v15 = vpop.permute.xlu0 %2204  ;;  %v7875_v1 = vld [vmem:[#allocation24_spill] sm:$0xff] }
 0x25a   :  { %2300 = vst.msk [vmem:[#allocation3 + $0x190] sm:$0xff] %vm2274_vm7, %v2205_v15  ;;  %1724 = vrot.lane.b32.xlu1 %v6402_v12, %s5227_s25  ;;  %v2910_v15 = vld [vmem:[#allocation3 + $0x108] sm:$0xff] }
 0x25b   :  { %2461 = vrot.lane.b32.xlu0 %v2348_v4, %s5231_s17 }
 0x25c   :  { %v6938_v63 = vpop.permute.xlu1 %1704 }
 0x25d   :  { %v2446_v31 = vpop.permute.xlu0 %2445 }
 0x25e   :  { %2541 = vst.msk [vmem:[#allocation3 + $0x190] sm:$0xff] %vm2515_vm8, %v2446_v31  ;;  %1965 = vrot.lane.b32.xlu1 %v6901_v7, %s5228_s15 }
 0x25f   :  { %2702 = vrot.lane.b32.xlu0 %v2589_v46, %s5229_s20 }
 0x260   :  { %v6944_v30 = vpop.permute.xlu1 %1945 }
 0x261   :  { %v2687_v12 = vpop.permute.xlu0 %2686 }
 0x262   :  { %2782 = vst.msk [vmem:[#allocation3 + $0x190] sm:$0xff] %vm2756_vm9, %v2687_v12  ;;  %2206 = vrot.lane.b32.xlu1 %v6416_v14, %s5230_s18 }
 0x263   :  { %1260 = vrot.lane.b32.xlu0 %v6875_v42, %s5225_s23 }
 0x264   :  { %v6963_v40 = vpop.permute.xlu1 %2186 }
 0x265   :  { %v1245_v48 = vpop.permute.xlu0 %1244 }
 0x266   :  { %1338 = vst.msk [vmem:[#allocation3 + $0x1b0] sm:$0xff] %vm1310_vm3, %v1245_v48  ;;  %2447 = vrot.lane.b32.xlu1 %v6418_v17, %s5231_s17  ;;  %v7073_v48 = vld [vmem:[%s7811_s6] ss:$0 sm:$0xff] }
 0x267   :  { %1501 = vrot.lane.b32.xlu0 %v2107_v38, %s5226_s28 }
 0x268   :  { %v1227_v0 = vpop.permute.xlu1 %1226 }
 0x269   :  { %1329 = vst.msk [vmem:[#allocation3 + $0x120] sm:$0xff] %vm1310_vm3, %v1227_v0  ;;  %v1486_v59 = vpop.permute.xlu0 %1485 }
 0x26a   :  { %1579 = vst.msk [vmem:[#allocation3 + $0x1b0] sm:$0xff] %vm1551_vm4, %v1486_v59  ;;  %2688 = vrot.lane.b32.xlu1 %v6970_v11, %s5229_s20  ;;  %v2914_v59 = vld [vmem:[#allocation3 + $0x128] sm:$0xff] }
 0x26b   :  { %1742 = vrot.lane.b32.xlu0 %v2348_v4, %s5227_s25  ;;  %v7876_v4 = vld [vmem:[#allocation26_spill] sm:$0xff] }
 0x26c   :  { %v1468_v62 = vpop.permute.xlu1 %1467 }
 0x26d   :  { %1570 = vst.msk [vmem:[#allocation3 + $0x120] sm:$0xff] %vm1551_vm4, %v1468_v62  ;;  %v1727_v50 = vpop.permute.xlu0 %1726 }
 0x26e   :  { %1811 = vst.msk [vmem:[#allocation3 + $0x120] sm:$0xff] %vm1792_vm5, %v7870_v2  ;;  %1820 = vst.msk [vmem:[#allocation3 + $0x1b0] sm:$0xff] %vm1792_vm5, %v1727_v50  ;;  %1246 = vrot.lane.b32.xlu1 %v6901_v7, %s5225_s23  ;;  %v3655_v7 = vld [vmem:[#allocation5 + $0x8] sm:$0xff]  ;;  %v2911_v2 = vld [vmem:[#allocation3 + $0x110] sm:$0xff] }
 0x26f   :  { %2052 = vst.msk [vmem:[#allocation3 + $0x120] sm:$0xff] %vm2033_vm6, %v7871_v37  ;;  %1983 = vrot.lane.b32.xlu0 %v2589_v46, %s5228_s15 }
 0x270   :  { %2293 = vst.msk [vmem:[#allocation3 + $0x120] sm:$0xff] %vm2274_vm7, %v7872_v18  ;;  %v2420_v43 = vpop.permute.xlu1 %2419 }
 0x271   :  { %2534 = vst.msk [vmem:[#allocation3 + $0x120] sm:$0xff] %vm2515_vm8, %v7873_v5  ;;  %2528 = vst.msk [vmem:[#allocation3 + $0xc0] sm:$0xff] %vm2515_vm8, %v2420_v43  ;;  %v1968_v54 = vpop.permute.xlu0 %1967  ;;  %v7092_v43 = vld [vmem:[#allocation5 + $0x39] sm:$0xff] }
 0x272   :  { %2775 = vst.msk [vmem:[#allocation3 + $0x120] sm:$0xff] %vm2756_vm9, %v7874_v16  ;;  %1487 = vrot.lane.b32.xlu1 %v6416_v14, %s5226_s28  ;;  %v2916_v16 = vld [vmem:[#allocation3 + $0x138] sm:$0xff] }
 0x273   :  { %2061 = vst.msk [vmem:[#allocation3 + $0x1b0] sm:$0xff] %vm2033_vm6, %v1968_v54  ;;  %2224 = vrot.lane.b32.xlu0 %v2109_v32, %s5230_s18 }
 0x274   :  { %v2661_v56 = vpop.permute.xlu1 %2660 }
 0x275   :  { %2769 = vst.msk [vmem:[#allocation3 + $0xc0] sm:$0xff] %vm2756_vm9, %v2661_v56  ;;  %v2209_v19 = vpop.permute.xlu0 %2208 }
 0x276   :  { %2302 = vst.msk [vmem:[#allocation3 + $0x1b0] sm:$0xff] %vm2274_vm7, %v2209_v19  ;;  %1728 = vrot.lane.b32.xlu1 %v6418_v17, %s5227_s25  ;;  %v7102_v19 = vld [vmem:[#allocation2 + $0x118] sm:$0xff] }
 0x277   :  { %2465 = vrot.lane.b32.xlu0 %v2350_v60, %s5231_s17  ;;  %v2915_v60 = vld [vmem:[#allocation3 + $0x130] sm:$0xff] }
 0x278   :  { %v1701_v42 = vpop.permute.xlu1 %1700 }
 0x279   :  { %1807 = vst.msk [vmem:[#allocation3 + $0xe0] sm:$0xff] %vm1792_vm5, %v1701_v42  ;;  %v2450_v14 = vpop.permute.xlu0 %2449  ;;  %v2913_v54 = vld [vmem:[#allocation3 + $0x120] sm:$0xff]  ;;  %v2918_v42 = vld [vmem:[#allocation3 + $0x148] sm:$0xff] }
 0x27a   :  { %2543 = vst.msk [vmem:[#allocation3 + $0x1b0] sm:$0xff] %vm2515_vm8, %v2450_v14  ;;  %1969 = vrot.lane.b32.xlu1 %v6970_v11, %s5228_s15 }
 0x27b   :  { %2706 = vrot.lane.b32.xlu0 %v2591_v45, %s5229_s20 }
 0x27c   :  { %v1942_v26 = vpop.permute.xlu1 %1941  ;;  %v2901_v28 = vld [vmem:[#allocation3 + $0xc0] sm:$0xff] }
 0x27d   :  { %2048 = vst.msk [vmem:[#allocation3 + $0xe0] sm:$0xff] %vm2033_vm6, %v1942_v26  ;;  %v2691_v17 = vpop.permute.xlu0 %2690  ;;  %3220 = vmatmul.mubr.f32.gmra.mxu1 %v2901_v28  ;;  %v7111_v28 = vld [vmem:[#allocation5 + $0x40] sm:$0xff] }
 0x27e   :  { %2784 = vst.msk [vmem:[#allocation3 + $0x1b0] sm:$0xff] %vm2756_vm9, %v2691_v17  ;;  %2210 = vrot.lane.b32.xlu1 %v6422_v55, %s5230_s18  ;;  %4820 = vmatprep.mubr.msk.f32.mxu1 %vm48_vm2, %v2904_v10 }
 0x27f   :  { %2226 = vrot.lane.b32.xlu0 %v2110_v21, %s5230_s18 }
 0x280   :  { %v2183_v39 = vpop.permute.xlu1 %2182 }
 0x281   :  { %2289 = vst.msk [vmem:[#allocation3 + $0xe0] sm:$0xff] %vm2274_vm7, %v2183_v39  ;;  %v1249_v20 = vpop.permute.xlu0 %1248  ;;  %3225 = vmatmul.mubr.f32.gmra.mxu1 %v2903_v9  ;;  %v2920_v9 = vld [vmem:[#allocation3 + $0x158] sm:$0xff] }
 0x282   :  { %2530 = vst.msk [vmem:[#allocation3 + $0xe0] sm:$0xff] %vm2515_vm8, %v6920_v24  ;;  %2451 = vrot.lane.b32.xlu1 %v6428_v35, %s5231_s17  ;;  %4821 = vmatprep.mubr.msk.f32.mxu1 %vm48_vm2, %v2906_v22 }
 0x283   :  { %1340 = vst.msk [vmem:[#allocation3 + $0x1d0] sm:$0xff] %vm1310_vm3, %v1249_v20  ;;  %2708 = vrot.lane.b32.xlu0 %v2592_v47, %s5229_s20 }
 0x284   :  { %2771 = vst.msk [vmem:[#allocation3 + $0xe0] sm:$0xff] %vm2756_vm9, %v6931_v58  ;;  %v1223_v29 = vpop.permute.xlu1 %1222 }
 0x285   :  { %1327 = vst.msk [vmem:[#allocation3 + $0x100] sm:$0xff] %vm1310_vm3, %v1223_v29  ;;  %v1490_v57 = vpop.permute.xlu0 %1489 }
 0x286   :  { %1581 = vst.msk [vmem:[#allocation3 + $0x1d0] sm:$0xff] %vm1551_vm4, %v1490_v57  ;;  %2692 = vrot.lane.b32.xlu1 %v7027_v51, %s5229_s20 }
 0x287   :  { %3679 = vrot.lane.b32.xlu0 %v3655_v7, %s5226_s28 }
 0x288   :  { %v1464_v36 = vpop.permute.xlu1 %1463 }
 0x289   :  { %1568 = vst.msk [vmem:[#allocation3 + $0x100] sm:$0xff] %vm1551_vm4, %v1464_v36  ;;  %v1731_v24 = vpop.permute.xlu0 %1730 }
 0x28a   :  { %1809 = vst.msk [vmem:[#allocation3 + $0x100] sm:$0xff] %vm1792_vm5, %v6938_v63  ;;  %1822 = vst.msk [vmem:[#allocation3 + $0x1d0] sm:$0xff] %vm1792_vm5, %v1731_v24  ;;  %1250 = vrot.lane.b32.xlu1 %v6970_v11, %s5225_s23  ;;  %v2907_v63 = vld [vmem:[#allocation3 + $0xf0] sm:$0xff]  ;;  %v7081_v11 = vld [vmem:[#allocation5 + $0x68] sm:$0xff] }
 0x28b   :  { %v2905_v38 = vld [vmem:[#allocation3 + $0xe0] sm:$0xff]  ;;  %2050 = vst.msk [vmem:[#allocation3 + $0x100] sm:$0xff] %vm2033_vm6, %v6944_v30  ;;  %3752 = vrot.lane.b32.xlu0 %v3728_v53, %s5228_s15  ;;  %v7065_v30 = vld [vmem:[%s7810_s5] ss:$0 sm:$0xff]  ;;  %v2922_v53 = vld [vmem:[#allocation3 + $0x168] sm:$0xff] }
 0x28c   :  { %3230 = vmatmul.mubr.f32.gmra.mxu1 %v2905_v38  ;;  %2291 = vst.msk [vmem:[#allocation3 + $0x100] sm:$0xff] %vm2274_vm7, %v6963_v40  ;;  %v7044_v6 = vpop.permute.xlu1 %2439 }
 0x28d   :  { %4822 = vmatprep.mubr.msk.f32.mxu1 %vm48_vm2, %v2908_v44  ;;  %2532 = vst.msk [vmem:[#allocation3 + $0x100] sm:$0xff] %vm2515_vm8, %v7875_v1  ;;  %v1972_v58 = vpop.permute.xlu0 %1971  ;;  %v2924_v1 = vld [vmem:[#allocation3 + $0x178] sm:$0xff] }
 0x28e   :  { %2773 = vst.msk [vmem:[#allocation3 + $0x100] sm:$0xff] %vm2756_vm9, %v7876_v4  ;;  %1491 = vrot.lane.b32.xlu1 %v6422_v55, %s5226_s28  ;;  %v2926_v4 = vld [vmem:[#allocation3 + $0x188] sm:$0xff] }
 0x28f   :  { %2063 = vst.msk [vmem:[#allocation3 + $0x1d0] sm:$0xff] %vm2033_vm6, %v1972_v58  ;;  %3825 = vrot.lane.b32.xlu0 %v6923_v13, %s5231_s17  ;;  %v2912_v13 = vld [vmem:[#allocation3 + $0x118] sm:$0xff]  ;;  %v2923_v58 = vld [vmem:[#allocation3 + $0x170] sm:$0xff] }
 0x290   :  { %3235 = vmatmul.mubr.f32.gmra.mxu1 %v2907_v63  ;;  %v7056_v46 = vpop.permute.xlu1 %2680  ;;  %3897 = vst.msk [vmem:[#allocation6 + $0x110] sm:$0xff] %vm95_vm10, %v7081_v11 }
 0x291   :  { %4823 = vmatprep.mubr.msk.f32.mxu1 %vm48_vm2, %v2910_v15  ;;  %v2213_v31 = vpop.permute.xlu0 %2212 }
 0x292   :  { %2304 = vst.msk [vmem:[#allocation3 + $0x1d0] sm:$0xff] %vm2274_vm7, %v2213_v31  ;;  %1732 = vrot.lane.b32.xlu1 %v6428_v35, %s5227_s25 }
 0x293   :  { %3681 = vrot.lane.b32.xlu0 %v6946_v34, %s5226_s28 }
 0x294   :  { %v2436_v55 = vpop.permute.xlu1 %2435 }
 0x295   :  { %2536 = vst.msk [vmem:[#allocation3 + $0x140] sm:$0xff] %vm2515_vm8, %v2436_v55  ;;  %v2454_v12 = vpop.permute.xlu0 %2453  ;;  %v2909_v35 = vld [vmem:[#allocation3 + $0x100] sm:$0xff] }
 0x296   :  { %v3161_v40 = vpop.f32.mrf.mxu1  ;;  %2545 = vst.msk [vmem:[#allocation3 + $0x1d0] sm:$0xff] %vm2515_vm8, %v2454_v12  ;;  %1973 = vrot.lane.b32.xlu1 %v7027_v51, %s5228_s15  ;;  %3240 = vmatmul.mubr.f32.gmra.mxu1 %v2909_v35  ;;  %v3631_v55 = vld [vmem:[#allocation5 + $0x7] sm:$0xff] }
 0x297   :  { %4824 = vmatprep.mubr.msk.f32.mxu1 %vm48_vm2, %v2912_v13  ;;  %3835 = vrot.lane.b32.xlu0 %v6948_v52, %s5231_s17  ;;  %3643 = vst.msk [vmem:[#allocation6] sm:$0xff] %vm95_vm10, %v3631_v55  ;;  %v7154_v40 = vld [vmem:[#allocation2 + $0x128] sm:$0xff] }
 0x298   :  { %v3163_v0 = vpop.f32.mrf.mxu1  ;;  %v2677_v34 = vpop.permute.xlu1 %2676 }
 0x299   :  { %2777 = vst.msk [vmem:[#allocation3 + $0x140] sm:$0xff] %vm2756_vm9, %v2677_v34  ;;  %v2695_v62 = vpop.permute.xlu0 %2694 }
 0x29a   :  { %v3166_v50 = vpop.f32.mrf.mxu1  ;;  %2786 = vst.msk [vmem:[#allocation3 + $0x1d0] sm:$0xff] %vm2756_vm9, %v2695_v62  ;;  %2214 = vrot.lane.b32.xlu1 %v6435_v25, %s5230_s18  ;;  %3245 = vmatmul.mubr.f32.gmra.mxu1 %v2911_v2 }
 0x29b   :  { %4825 = vmatprep.mubr.msk.f32.mxu1 %vm48_vm2, %v2914_v59  ;;  %3691 = vrot.lane.b32.xlu0 %v6957_v49, %s5226_s28 }
 0x29c   :  { %v3168_v37 = vpop.f32.mrf.mxu1  ;;  %v1717_v18 = vpop.permute.xlu1 %1716 }
 0x29d   :  { %1815 = vst.msk [vmem:[#allocation3 + $0x160] sm:$0xff] %vm1792_vm5, %v1717_v18  ;;  %v1253_v5 = vpop.permute.xlu0 %1252  ;;  %v2928_v37 = vld [vmem:[#allocation3 + $0x198] sm:$0xff]  ;;  %v2927_v18 = vld [vmem:[#allocation3 + $0x190] sm:$0xff] }
 0x29e   :  { %1342 = vst.msk [vmem:[#allocation3 + $0x1f0] sm:$0xff] %vm1310_vm3, %v1253_v5  ;;  %2455 = vrot.lane.b32.xlu1 %v6437_v41, %s5231_s17  ;;  %3250 = vmatmul.mubr.f32.gmra.mxu1 %v2913_v54 }
 0x29f   :  { %4826 = vmatprep.mubr.msk.f32.mxu1 %vm48_vm2, %v2916_v16  ;;  %3764 = vrot.lane.b32.xlu0 %v7092_v43, %s5228_s15  ;;  %v2930_v16 = vld [vmem:[#allocation3 + $0x1a8] sm:$0xff] }
 0x2a0   :  { %v1958_v32 = vpop.permute.xlu1 %1957  ;;  %v2917_v21 = vld [vmem:[#allocation3 + $0x140] sm:$0xff] }
 0x2a1   :  { %2056 = vst.msk [vmem:[#allocation3 + $0x160] sm:$0xff] %vm2033_vm6, %v1958_v32  ;;  %v1494_v56 = vpop.permute.xlu0 %1493 }
 0x2a2   :  { %1583 = vst.msk [vmem:[#allocation3 + $0x1f0] sm:$0xff] %vm1551_vm4, %v1494_v56  ;;  %2696 = vrot.lane.b32.xlu1 %v7102_v19, %s5229_s20  ;;  %3255 = vmatmul.mubr.f32.gmra.mxu1 %v2915_v60 }
 0x2a3   :  { %4827 = vmatprep.mubr.msk.f32.mxu1 %vm48_vm2, %v2918_v42  ;;  %3837 = vrot.lane.b32.xlu0 %v6982_v8, %s5231_s17 }
 0x2a4   :  { %v3171_v45 = vpop.f32.mrf.mxu1  ;;  %v2199_v26 = vpop.permute.xlu1 %2198 }
 0x2a5   :  { %v3369_v14 = vmul.f32 %v7065_v30, %v3171_v45  ;;  %2297 = vst.msk [vmem:[#allocation3 + $0x160] sm:$0xff] %vm2274_vm7, %v2199_v26  ;;  %v1735_v17 = vpop.permute.xlu0 %1734 }
 0x2a6   :  { %v3173_v10 = vpop.f32.mrf.mxu1  ;;  %2538 = vst.msk [vmem:[#allocation3 + $0x160] sm:$0xff] %vm2515_vm8, %v7044_v6  ;;  %1254 = vrot.lane.b32.xlu1 %v7027_v51, %s5225_s23  ;;  %3260 = vmatmul.mubr.f32.gmra.mxu1 %v2917_v21  ;;  %v2919_v51 = vld [vmem:[#allocation3 + $0x150] sm:$0xff] }
 0x2a7   :  { %v3416_v39 = vadd.f32 %v7073_v48, %v3369_v14  ;;  %1824 = vst.msk [vmem:[#allocation3 + $0x1f0] sm:$0xff] %vm1792_vm5, %v1735_v17  ;;  %4828 = vmatprep.mubr.msk.f32.mxu1 %vm48_vm2, %v2920_v9  ;;  %3693 = vrot.lane.b32.xlu0 %v7111_v28, %s5226_s28 }
 0x2a8   :  { %2779 = vst.msk [vmem:[#allocation3 + $0x160] sm:$0xff] %vm2756_vm9, %v7056_v46  ;;  %v3176_v47 = vpop.f32.mrf.mxu1  ;;  %v1239_v29 = vpop.permute.xlu1 %1238 }
 0x2a9   :  { %v3456_v20 = vmax.f32 %v3416_v39, 0.0  ;;  %v3370_v22 = vmul.f32 %v7065_v30, %v3176_v47  ;;  %1335 = vst.msk [vmem:[#allocation3 + $0x180] sm:$0xff] %vm1310_vm3, %v1239_v29  ;;  %v1976_v7 = vpop.permute.xlu0 %1975  ;;  %v2349_v39 = vld [vmem:[#allocation2 + $0x137] sm:$0xff] }
 0x2aa   :  { %v3178_v57 = vpop.f32.mrf.mxu1  ;;  %2065 = vst.msk [vmem:[#allocation3 + $0x1f0] sm:$0xff] %vm2033_vm6, %v1976_v7  ;;  %1495 = vrot.lane.b32.xlu1 %v6435_v25, %s5226_s28  ;;  %3265 = vmatmul.mubr.f32.gmra.mxu1 %v2919_v51 }
 0x2ab   :  { %3496 = vst.msk [vmem:[#allocation4 + $0x10] sm:$0xff] %vm95_vm10, %v3456_v20  ;;  %v3417_v36 = vadd.f32 %v7073_v48, %v3370_v22  ;;  %4829 = vmatprep.mubr.msk.f32.mxu1 %vm48_vm2, %v2922_v53  ;;  %v2590_v22 = vld [vmem:[#allocation2 + $0x138] sm:$0xff] }
 0x2ac   :  { %v1480_v44 = vpop.permute.xlu1 %1479 }
 0x2ad   :  { %v3457_v24 = vmax.f32 %v3417_v36, 0.0  ;;  %1576 = vst.msk [vmem:[#allocation3 + $0x180] sm:$0xff] %vm1551_vm4, %v1480_v44  ;;  %v2217_v38 = vpop.permute.xlu0 %2216 }
 0x2ae   :  { %2306 = vst.msk [vmem:[#allocation3 + $0x1f0] sm:$0xff] %vm2274_vm7, %v2217_v38  ;;  %1736 = vrot.lane.b32.xlu1 %v6437_v41, %s5227_s25 }
 0x2af   :  { %3497 = vst.msk [vmem:[#allocation4 + $0x18] sm:$0xff] %vm95_vm10, %v3457_v24  ;;  %v2921_v6 = vld [vmem:[#allocation3 + $0x160] sm:$0xff] }
 0x2b0   :  { %3270 = vmatmul.mubr.f32.gmra.mxu1 %v2921_v6  ;;  %v1721_v25 = vpop.permute.xlu1 %1720 }
 0x2b1   :  { %4830 = vmatprep.mubr.msk.f32.mxu1 %vm48_vm2, %v2924_v1  ;;  %1817 = vst.msk [vmem:[#allocation3 + $0x180] sm:$0xff] %vm1792_vm5, %v1721_v25  ;;  %v2458_v15 = vpop.permute.xlu0 %2457 }
 0x2b2   :  { %2547 = vst.msk [vmem:[#allocation3 + $0x1f0] sm:$0xff] %vm2515_vm8, %v2458_v15  ;;  %1977 = vrot.lane.b32.xlu1 %v7102_v19, %s5228_s15 }
 0x2b4   :  { %3275 = vmatmul.mubr.f32.gmra.mxu1 %v2923_v58  ;;  %v1962_v63 = vpop.permute.xlu1 %1961 }
 0x2b5   :  { %4831 = vmatprep.mubr.msk.f32.mxu1 %vm48_vm2, %v2926_v4  ;;  %2058 = vst.msk [vmem:[#allocation3 + $0x180] sm:$0xff] %vm2033_vm6, %v1962_v63  ;;  %v2699_v41 = vpop.permute.xlu0 %2698 }
 0x2b6   :  { %2788 = vst.msk [vmem:[#allocation3 + $0x1f0] sm:$0xff] %vm2756_vm9, %v2699_v41  ;;  %2218 = vrot.lane.b32.xlu1 %v6449_v27, %s5230_s18  ;;  %v3535_v51 = vld [vmem:[#allocation4 + $0x10] ss:$2 sm:$0xff]  ;;  %v3551_v36 = vld [vmem:[#allocation4 + $0x11] ss:$2 sm:$0xff] }
 0x2b7   :  { %v3566_v25 = vmax.f32 %v3535_v51, %v3551_v36 }
 0x2b8   :  { %v2203_v46 = vpop.permute.xlu1 %2202 }
 0x2b9   :  { %2299 = vst.msk [vmem:[#allocation3 + $0x180] sm:$0xff] %vm2274_vm7, %v2203_v46  ;;  %v1257_v31 = vpop.permute.xlu0 %1256 }
 0x2ba   :  { %1344 = vst.msk [vmem:[#allocation3 + $0x210] sm:$0xff] %vm1310_vm3, %v1257_v31  ;;  %2459 = vrot.lane.b32.xlu1 %v6451_v33, %s5231_s17 }
 0x2bc   :  { %v2444_v13 = vpop.permute.xlu1 %2443 }
 0x2bd   :  { %2540 = vst.msk [vmem:[#allocation3 + $0x180] sm:$0xff] %vm2515_vm8, %v2444_v13  ;;  %v1498_v12 = vpop.permute.xlu0 %1497 }
 0x2be   :  { %1585 = vst.msk [vmem:[#allocation3 + $0x210] sm:$0xff] %vm1551_vm4, %v1498_v12  ;;  %2700 = vrot.lane.b32.xlu1 %v7154_v40, %s5229_s20 }
 0x2c0   :  { %v2685_v35 = vpop.permute.xlu1 %2684 }
 0x2c1   :  { %2781 = vst.msk [vmem:[#allocation3 + $0x180] sm:$0xff] %vm2756_vm9, %v2685_v35  ;;  %v1739_v0 = vpop.permute.xlu0 %1738 }
 0x2c2   :  { %1826 = vst.msk [vmem:[#allocation3 + $0x210] sm:$0xff] %vm1792_vm5, %v1739_v0  ;;  %1258 = vrot.lane.b32.xlu1 %v7102_v19, %s5225_s23  ;;  %v2932_v0 = vld [vmem:[#allocation3 + $0x1b8] sm:$0xff] }
 0x2c4   :  { %v1243_v34 = vpop.permute.xlu1 %1242 }
 0x2c5   :  { %1337 = vst.msk [vmem:[#allocation3 + $0x1a0] sm:$0xff] %vm1310_vm3, %v1243_v34  ;;  %v1980_v59 = vpop.permute.xlu0 %1979 }
 0x2c6   :  { %2067 = vst.msk [vmem:[#allocation3 + $0x210] sm:$0xff] %vm2033_vm6, %v1980_v59  ;;  %1499 = vrot.lane.b32.xlu1 %v6449_v27, %s5226_s28 }
 0x2c8   :  { %v1484_v62 = vpop.permute.xlu1 %1483  ;;  %v2925_v50 = vld [vmem:[#allocation3 + $0x180] sm:$0xff] }
 0x2c9   :  { %1578 = vst.msk [vmem:[#allocation3 + $0x1a0] sm:$0xff] %vm1551_vm4, %v1484_v62  ;;  %v2221_v2 = vpop.permute.xlu0 %2220  ;;  %3280 = vmatmul.mubr.f32.gmra.mxu1 %v2925_v50  ;;  %v2934_v62 = vld [vmem:[#allocation3 + $0x1c8] sm:$0xff]  ;;  %v2832_v50 = vld [vmem:[#allocation2 + $0x141] sm:$0xff] }
 0x2ca   :  { %2308 = vst.msk [vmem:[#allocation3 + $0x210] sm:$0xff] %vm2274_vm7, %v2221_v2  ;;  %1740 = vrot.lane.b32.xlu1 %v6451_v33, %s5227_s25  ;;  %4832 = vmatprep.mubr.msk.f32.mxu1 %vm48_vm2, %v2928_v37  ;;  %v2351_v2 = vld [vmem:[#allocation2 + $0x147] sm:$0xff] }
 0x2cb   :  { %2872 = vst.msk [vmem:[#allocation3 + $0x238] sm:$0xff] %vm48_vm2, %v2832_v50 }
 0x2cc   :  { %v1725_v5 = vpop.permute.xlu1 %1724 }
 0x2cd   :  { %1819 = vst.msk [vmem:[#allocation3 + $0x1a0] sm:$0xff] %vm1792_vm5, %v1725_v5  ;;  %v2462_v54 = vpop.permute.xlu0 %2461  ;;  %v3181_v27 = vpop.f32.mrf.mxu1  ;;  %3285 = vmatmul.mubr.f32.gmra.mxu1 %v2927_v18 }
 0x2ce   :  { %2549 = vst.msk [vmem:[#allocation3 + $0x210] sm:$0xff] %vm2515_vm8, %v2462_v54  ;;  %v3371_v32 = vmul.f32 %v7065_v30, %v3181_v27  ;;  %1981 = vrot.lane.b32.xlu1 %v7154_v40, %s5228_s15  ;;  %4833 = vmatprep.mubr.msk.f32.mxu1 %vm48_vm2, %v2930_v16  ;;  %v2833_v16 = vld [vmem:[#allocation2 + $0x149] sm:$0xff] }
 0x2cf   :  { %v3183_v33 = vpop.f32.mrf.mxu1  ;;  %2873 = vst.msk [vmem:[#allocation3 + $0x248] sm:$0xff] %vm48_vm2, %v2833_v16 }
 0x2d0   :  { %v3418_v56 = vadd.f32 %v7073_v48, %v3371_v32  ;;  %v1966_v19 = vpop.permute.xlu1 %1965 }
 0x2d1   :  { %2060 = vst.msk [vmem:[#allocation3 + $0x1a0] sm:$0xff] %vm2033_vm6, %v1966_v19  ;;  %v2703_v60 = vpop.permute.xlu0 %2702  ;;  %v3186_v42 = vpop.f32.mrf.mxu1 }
 0x2d2   :  { %v3458_v45 = vmax.f32 %v3418_v56, 0.0  ;;  %2790 = vst.msk [vmem:[#allocation3 + $0x210] sm:$0xff] %vm2756_vm9, %v2703_v60  ;;  %v3372_v14 = vmul.f32 %v7065_v30, %v3186_v42  ;;  %2222 = vrot.lane.b32.xlu1 %v6461_v23, %s5230_s18 }
 0x2d3   :  { %v3188_v26 = vpop.f32.mrf.mxu1 }
 0x2d4   :  { %3498 = vst.msk [vmem:[#allocation4 + $0x20] sm:$0xff] %vm95_vm10, %v3458_v45  ;;  %v3419_v17 = vadd.f32 %v7073_v48, %v3372_v14  ;;  %v2207_v10 = vpop.permute.xlu1 %2206  ;;  %v2936_v26 = vld [vmem:[#allocation3 + $0x1d8] sm:$0xff] }
 0x2d5   :  { %2301 = vst.msk [vmem:[#allocation3 + $0x1a0] sm:$0xff] %vm2274_vm7, %v2207_v10  ;;  %v1261_v21 = vpop.permute.xlu0 %1260  ;;  %v3980_v10 = vld [vmem:[#allocation5 + $0x67] sm:$0xff] }
 0x2d6   :  { %v3459_v9 = vmax.f32 %v3419_v17, 0.0  ;;  %1346 = vst.msk [vmem:[#allocation3 + $0x230] sm:$0xff] %vm1310_vm3, %v1261_v21  ;;  %2463 = vrot.lane.b32.xlu1 %v2349_v39, %s5231_s17  ;;  %v2935_v17 = vld [vmem:[#allocation3 + $0x1d0] sm:$0xff] }
 0x2d8   :  { %3499 = vst.msk [vmem:[#allocation4 + $0x28] sm:$0xff] %vm95_vm10, %v3459_v9  ;;  %v2448_v47 = vpop.permute.xlu1 %2447  ;;  %v2938_v9 = vld [vmem:[#allocation3 + $0x1e8] sm:$0xff] }
 0x2d9   :  { %2542 = vst.msk [vmem:[#allocation3 + $0x1a0] sm:$0xff] %vm2515_vm8, %v2448_v47  ;;  %v1502_v20 = vpop.permute.xlu0 %1501 }
 0x2da   :  { %1587 = vst.msk [vmem:[#allocation3 + $0x230] sm:$0xff] %vm1551_vm4, %v1502_v20  ;;  %2704 = vrot.lane.b32.xlu1 %v2590_v22, %s5229_s20  ;;  %v4204_v20 = vld [vmem:[%s7812_s7 + $0xf0] sm:$0xff] }
 0x2db   :  { %v3191_v29 = vpop.f32.mrf.mxu1 }
 0x2dc   :  { %v3373_v7 = vmul.f32 %v7065_v30, %v3191_v29  ;;  %v2689_v57 = vpop.permute.xlu1 %2688  ;;  %v4188_v29 = vld [vmem:[%s7812_s7 + $0x70] sm:$0xff] }
 0x2dd   :  { %2783 = vst.msk [vmem:[#allocation3 + $0x1a0] sm:$0xff] %vm2756_vm9, %v2689_v57  ;;  %v1743_v53 = vpop.permute.xlu0 %1742  ;;  %v3193_v24 = vpop.f32.mrf.mxu1  ;;  %v4203_v57 = vld [vmem:[%s7812_s7 + $0xe8] sm:$0xff] }
 0x2de   :  { %v3420_v44 = vadd.f32 %v7073_v48, %v3373_v7  ;;  %1828 = vst.msk [vmem:[#allocation3 + $0x230] sm:$0xff] %vm1792_vm5, %v1743_v53  ;;  %1262 = vrot.lane.b32.xlu1 %v7154_v40, %s5225_s23 }
 0x2df   :  { %v3575_v38 = vld [vmem:[#allocation4 + $0x20] ss:$2 sm:$0xff]  ;;  %v3591_v6 = vld [vmem:[#allocation4 + $0x21] ss:$2 sm:$0xff]  ;;  %v3196_v1 = vpop.f32.mrf.mxu1 }
 0x2e0   :  { %v3606_v58 = vmax.f32 %v3575_v38, %v3591_v6  ;;  %v3460_v15 = vmax.f32 %v3420_v44, 0.0  ;;  %v3374_v4 = vmul.f32 %v7065_v30, %v3196_v1  ;;  %v1247_v63 = vpop.permute.xlu1 %1246  ;;  %v3909_v1 = vld [vmem:[#allocation5 + $0x69] sm:$0xff] }
 0x2e1   :  { %1339 = vst.msk [vmem:[#allocation3 + $0x1c0] sm:$0xff] %vm1310_vm3, %v1247_v63  ;;  %v1984_v41 = vpop.permute.xlu0 %1983  ;;  %v3198_v46 = vpop.f32.mrf.mxu1 }
 0x2e2   :  { %3500 = vst.msk [vmem:[#allocation4 + $0x30] sm:$0xff] %vm95_vm10, %v3460_v15  ;;  %v3421_v31 = vadd.f32 %v7073_v48, %v3374_v4  ;;  %1503 = vrot.lane.b32.xlu1 %v6461_v23, %s5226_s28  ;;  %v3614_v55 = vmax.f32 %v3566_v25, %v3606_v58  ;;  %v2931_v23 = vld [vmem:[#allocation3 + $0x1b0] sm:$0xff] }
 0x2e3   :  { %2069 = vst.msk [vmem:[#allocation3 + $0x230] sm:$0xff] %vm2033_vm6, %v1984_v41  ;;  %v4202_v41 = vld [vmem:[%s7812_s7 + $0xe0] sm:$0xff] }
 0x2e4   :  { %v3461_v13 = vmax.f32 %v3421_v31, 0.0  ;;  %v1488_v12 = vpop.permute.xlu1 %1487  ;;  %v2929_v40 = vld [vmem:[#allocation3 + $0x1a0] sm:$0xff]  ;;  %3623 = vst.msk [vmem:[#allocation5 + $0x18] sm:$0xf] %vm3622_vm11, %v3614_v55  ;;  %v4186_v46 = vld [vmem:[%s7812_s7 + $0x60] sm:$0xff]  ;;  %v4201_v55 = vld [vmem:[%s7812_s7 + $0xd8] sm:$0xff] }
 0x2e5   :  { %1580 = vst.msk [vmem:[#allocation3 + $0x1c0] sm:$0xff] %vm1551_vm4, %v1488_v12  ;;  %v2225_v35 = vpop.permute.xlu0 %2224  ;;  %3290 = vmatmul.mubr.f32.gmra.mxu1 %v2929_v40 }
 0x2e6   :  { %3501 = vst.msk [vmem:[#allocation4 + $0x38] sm:$0xff] %vm95_vm10, %v3461_v13  ;;  %1744 = vrot.lane.b32.xlu1 %v2349_v39, %s5227_s25  ;;  %4834 = vmatprep.mubr.msk.f32.mxu1 %vm48_vm2, %v2932_v0 }
 0x2e7   :  { %2310 = vst.msk [vmem:[#allocation3 + $0x230] sm:$0xff] %vm2274_vm7, %v2225_v35 }
 0x2e8   :  { %v1729_v34 = vpop.permute.xlu1 %1728 }
 0x2e9   :  { %1821 = vst.msk [vmem:[#allocation3 + $0x1c0] sm:$0xff] %vm1792_vm5, %v1729_v34  ;;  %v2466_v59 = vpop.permute.xlu0 %2465  ;;  %3295 = vmatmul.mubr.f32.gmra.mxu1 %v2931_v23 }
 0x2ea   :  { %2551 = vst.msk [vmem:[#allocation3 + $0x230] sm:$0xff] %vm2515_vm8, %v2466_v59  ;;  %1985 = vrot.lane.b32.xlu1 %v2590_v22, %s5228_s15  ;;  %4835 = vmatprep.mubr.msk.f32.mxu1 %vm48_vm2, %v2934_v62 }
 0x2eb   :  { %v7217_v37 = vld [vmem:[#allocation5 + $0x11] sm:$0xff] }
 0x2ec   :  { %v7219_v18 = vld [vmem:[#allocation5 + $0x17] sm:$0xff]  ;;  %v1970_v54 = vpop.permute.xlu1 %1969  ;;  %3754 = vrot.lane.b32.xlu0 %v7217_v37, %s5228_s15 }
 0x2ed   :  { %v7221_v5 = vld [vmem:[#allocation5 + $0x18] sm:$0xff]  ;;  %3645 = vst.msk [vmem:[#allocation6 + $0x30] sm:$0xff] %vm95_vm10, %v7219_v18  ;;  %v2707_v27 = vpop.permute.xlu0 %2706 }
 0x2ee   :  { %3887 = vst.msk [vmem:[#allocation6 + $0x20] sm:$0xff] %vm95_vm10, %v7221_v5  ;;  %2467 = vrot.lane.b32.xlu1 %v2351_v2, %s5231_s17  ;;  %v3537_v35 = vld [vmem:[#allocation4 + $0x30] ss:$2 sm:$0xff]  ;;  %v3553_v0 = vld [vmem:[#allocation4 + $0x31] ss:$2 sm:$0xff] }
 0x2ef   :  { %2062 = vst.msk [vmem:[#allocation3 + $0x1c0] sm:$0xff] %vm2033_vm6, %v1970_v54 }
 0x2f0   :  { %2792 = vst.msk [vmem:[#allocation3 + $0x230] sm:$0xff] %vm2756_vm9, %v2707_v27  ;;  %v2211_v32 = vpop.permute.xlu1 %2210  ;;  %3827 = vrot.lane.b32.xlu0 %v7219_v18, %s5231_s17 }
 0x2f1   :  { %2303 = vst.msk [vmem:[#allocation3 + $0x1c0] sm:$0xff] %vm2274_vm7, %v2211_v32  ;;  %v7236_v33 = vpop.permute.xlu0 %2226 }
 0x2f2   :  { %4002 = vrot.lane.b32.xlu1 %v6948_v52, %s5228_s15 }
 0x2f4   :  { %v2452_v56 = vpop.permute.xlu1 %2451  ;;  %3683 = vrot.lane.b32.xlu0 %v7221_v5, %s5226_s28 }
 0x2f5   :  { %2544 = vst.msk [vmem:[#allocation3 + $0x1c0] sm:$0xff] %vm2515_vm8, %v2452_v56  ;;  %v7243_v19 = vpop.permute.xlu0 %2708 }
 0x2f6   :  { %4074 = vrot.lane.b32.xlu1 %v6957_v49, %s5231_s17 }
 0x2f8   :  { %v2693_v60 = vpop.permute.xlu1 %2692 }
 0x2f9   :  { %2785 = vst.msk [vmem:[#allocation3 + $0x1c0] sm:$0xff] %vm2756_vm9, %v2693_v60  ;;  %v3680_v42 = vpop.permute.xlu0 %3679 }
 0x2fa   :  { %3932 = vrot.lane.b32.xlu1 %v7092_v43, %s5226_s28  ;;  %3716 = vst.msk [vmem:[#allocation6] sm:$0xff] %vm3715_vm12, %v3680_v42 }
 0x2fc   :  { %v1251_v52 = vpop.permute.xlu1 %1250 }
 0x2fd   :  { %1341 = vst.msk [vmem:[#allocation3 + $0x1e0] sm:$0xff] %vm1310_vm3, %v1251_v52  ;;  %v3753_v45 = vpop.permute.xlu0 %3752 }
 0x2fe   :  { %4004 = vrot.lane.b32.xlu1 %v6982_v8, %s5228_s15  ;;  %3789 = vst.msk [vmem:[#allocation6] sm:$0xff] %vm3788_vm13, %v3753_v45  ;;  %v4205_v8 = vld [vmem:[%s7812_s7 + $0xf8] sm:$0xff] }
 0x2ff   :  { %4933 = vmatprep.subr.mxu0 %v4205_v8  ;;  %v2939_v8 = vld [vmem:[#allocation3 + $0x1f0] sm:$0xff] }
 0x300   :  { %v1492_v49 = vpop.permute.xlu1 %1491  ;;  %v2933_v14 = vld [vmem:[#allocation3 + $0x1c0] sm:$0xff] }
 0x301   :  { %1582 = vst.msk [vmem:[#allocation3 + $0x1e0] sm:$0xff] %vm1551_vm4, %v1492_v49  ;;  %3300 = vmatmul.mubr.f32.gmra.mxu1 %v2933_v14  ;;  %v3826_v43 = vpop.permute.xlu0 %3825  ;;  %v4185_v14 = vld [vmem:[%s7812_s7 + $0x58] sm:$0xff] }
 0x302   :  { %4076 = vrot.lane.b32.xlu1 %v7111_v28, %s5231_s17  ;;  %4836 = vmatprep.mubr.msk.f32.mxu1 %vm48_vm2, %v2936_v26  ;;  %3862 = vst.msk [vmem:[#allocation6] sm:$0xff] %vm3861_vm14, %v3826_v43  ;;  %v4189_v28 = vld [vmem:[%s7812_s7 + $0x78] sm:$0xff]  ;;  %v4200_v26 = vld [vmem:[%s7812_s7 + $0xd0] sm:$0xff] }
 0x303   :  { %4934 = vmatpush3.msra.mxu0 %v4189_v28  ;;  %v4184_v43 = vld [vmem:[%s7812_s7 + $0x50] sm:$0xff]  ;;  %v4197_v28 = vld [vmem:[%s7812_s7 + $0xb8] sm:$0xff] }
 0x304   :  { %v1733_v21 = vpop.permute.xlu1 %1732  ;;  %4935 = vmatprep.subr.mxu0 %v4204_v20  ;;  %v4181_v20 = vld [vmem:[%s7812_s7 + $0x38] sm:$0xff] }
 0x305   :  { %1823 = vst.msk [vmem:[#allocation3 + $0x1e0] sm:$0xff] %vm1792_vm5, %v1733_v21  ;;  %v3201_v39 = vpop.f32.mrf.mxu1  ;;  %3305 = vmatmul.mubr.f32.gmra.mxu1 %v2935_v17  ;;  %v3682_v47 = vpop.permute.xlu0 %3681  ;;  %4936 = vmatpush3.msra.mxu0 %v4188_v29  ;;  %v4199_v17 = vld [vmem:[%s7812_s7 + $0xc8] sm:$0xff]  ;;  %v4198_v21 = vld [vmem:[%s7812_s7 + $0xc0] sm:$0xff] }
 0x306   :  { %v3375_v22 = vmul.f32 %v7065_v30, %v3201_v39  ;;  %4014 = vrot.lane.b32.xlu1 %v3980_v10, %s5228_s15  ;;  %4837 = vmatprep.mubr.msk.f32.mxu1 %vm48_vm2, %v2938_v9  ;;  %3717 = vst.msk [vmem:[#allocation6 + $0x18] sm:$0xff] %vm3715_vm12, %v3682_v47  ;;  %v4183_v10 = vld [vmem:[%s7812_s7 + $0x48] sm:$0xff]  ;;  %v4182_v9 = vld [vmem:[%s7812_s7 + $0x40] sm:$0xff]  ;;  %v2942_v47 = vld [vmem:[#allocation3 + $0x208] sm:$0xff] }
 0x307   :  { %v3203_v7 = vpop.f32.mrf.mxu1  ;;  %4937 = vmatprep.subr.mxu0 %v4203_v57 }
 0x308   :  { %v3422_v51 = vadd.f32 %v7073_v48, %v3375_v22  ;;  %v1974_v36 = vpop.permute.xlu1 %1973 }
 0x309   :  { %2064 = vst.msk [vmem:[#allocation3 + $0x1e0] sm:$0xff] %vm2033_vm6, %v1974_v36  ;;  %v3206_v53 = vpop.f32.mrf.mxu1  ;;  %v7282_v24 = vpop.permute.xlu0 %3835  ;;  %v4180_v36 = vld [vmem:[%s7812_s7 + $0x30] sm:$0xff] }
 0x30a   :  { %v3462_v44 = vmax.f32 %v3422_v51, 0.0  ;;  %v3376_v38 = vmul.f32 %v7065_v30, %v3206_v53  ;;  %4086 = vrot.lane.b32.xlu1 %v7081_v11, %s5231_s17  ;;  %v4187_v11 = vld [vmem:[%s7812_s7 + $0x68] sm:$0xff]  ;;  %v4196_v51 = vld [vmem:[%s7812_s7 + $0xb0] sm:$0xff] }
 0x30b   :  { %v3208_v6 = vpop.f32.mrf.mxu1  ;;  %4938 = vmatpush3.msra.mxu0 %v4187_v11  ;;  %v4176_v11 = vld [vmem:[%s7812_s7 + $0x10] sm:$0xff] }
 0x30c   :  { %3502 = vst.msk [vmem:[#allocation4 + $0x40] sm:$0xff] %vm95_vm10, %v3462_v44  ;;  %v3423_v25 = vadd.f32 %v7073_v48, %v3376_v38  ;;  %v2215_v58 = vpop.permute.xlu1 %2214  ;;  %4939 = vmatprep.subr.mxu0 %v4202_v41  ;;  %v4195_v44 = vld [vmem:[%s7812_s7 + $0xa8] sm:$0xff] }
 0x30d   :  { %2305 = vst.msk [vmem:[#allocation3 + $0x1e0] sm:$0xff] %vm2274_vm7, %v2215_v58  ;;  %v3692_v15 = vpop.permute.xlu0 %3691  ;;  %4940 = vmatpush3.msra.mxu0 %v4186_v46  ;;  %v4179_v6 = vld [vmem:[%s7812_s7 + $0x28] sm:$0xff] }
 0x30e   :  { %v3463_v4 = vmax.f32 %v3423_v25, 0.0  ;;  %3944 = vrot.lane.b32.xlu1 %v3909_v1, %s5226_s28  ;;  %3722 = vst.msk [vmem:[#allocation6 + $0x90] sm:$0xff] %vm3715_vm12, %v3692_v15  ;;  %4941 = vmatprep.subr.mxu0 %v4201_v55  ;;  %v4194_v1 = vld [vmem:[%s7812_s7 + $0xa0] sm:$0xff]  ;;  %v4193_v15 = vld [vmem:[%s7812_s7 + $0x98] sm:$0xff]  ;;  %v4191_v46 = vld [vmem:[%s7812_s7 + $0x88] sm:$0xff] }
 0x30f   :  { %4942 = vmatpush3.msra.mxu0 %v4185_v14  ;;  %v4178_v25 = vld [vmem:[%s7812_s7 + $0x20] sm:$0xff] }
 0x310   :  { %3503 = vst.msk [vmem:[#allocation4 + $0x48] sm:$0xff] %vm95_vm10, %v3463_v4  ;;  %v2456_v63 = vpop.permute.xlu1 %2455  ;;  %4943 = vmatprep.subr.mxu0 %v4200_v26  ;;  %v4177_v4 = vld [vmem:[%s7812_s7 + $0x18] sm:$0xff]  ;;  %v4190_v55 = vld [vmem:[%s7812_s7 + $0x80] sm:$0xff] }
 0x311   :  { %2546 = vst.msk [vmem:[#allocation3 + $0x1e0] sm:$0xff] %vm2515_vm8, %v2456_v63  ;;  %v3765_v31 = vpop.permute.xlu0 %3764  ;;  %4944 = vmatpush3.msra.mxu0 %v4184_v43  ;;  %v4192_v63 = vld [vmem:[%s7812_s7 + $0x90] sm:$0xff] }
 0x312   :  { %3922 = vrot.lane.b32.xlu1 %v7217_v37, %s5226_s28  ;;  %3795 = vst.msk [vmem:[#allocation6 + $0x90] sm:$0xff] %vm3788_vm13, %v3765_v31  ;;  %v3567_v37 = vmax.f32 %v3537_v35, %v3553_v0  ;;  %4945 = vmatprep.subr.mxu0 %v4199_v17  ;;  %v4175_v31 = vld [vmem:[%s7812_s7 + $0x8] sm:$0xff] }
 0x313   :  { %4946 = vmatpush3.msra.mxu0 %v4183_v10  ;;  %v2944_v0 = vld [vmem:[#allocation3 + $0x218] sm:$0xff] }
 0x314   :  { %v3211_v13 = vpop.f32.mrf.mxu1  ;;  %v2697_v40 = vpop.permute.xlu1 %2696  ;;  %4947 = vmatprep.subr.mxu0 %v4198_v21 }
 0x315   :  { %v3377_v12 = vmul.f32 %v7065_v30, %v3211_v13  ;;  %2787 = vst.msk [vmem:[#allocation3 + $0x1e0] sm:$0xff] %vm2756_vm9, %v2697_v40  ;;  %v3838_v34 = vpop.permute.xlu0 %3837  ;;  %4948 = vmatpush3.msra.mxu0 %v4182_v9  ;;  %v4174_v13 = vld [vmem:[%s7812_s7] sm:$0xff] }
 0x316   :  { %v3213_v23 = vpop.f32.mrf.mxu1  ;;  %3994 = vrot.lane.b32.xlu1 %v7219_v18, %s5228_s15  ;;  %3868 = vst.msk [vmem:[#allocation6 + $0x90] sm:$0xff] %vm3861_vm14, %v3838_v34  ;;  %4949 = vmatprep.subr.mxu0 %v4197_v28 }
 0x317   :  { %v3424_v59 = vadd.f32 %v7073_v48, %v3377_v12  ;;  %v3577_v62 = vld [vmem:[#allocation4 + $0x40] ss:$2 sm:$0xff]  ;;  %v3593_v50 = vld [vmem:[#allocation4 + $0x41] ss:$2 sm:$0xff]  ;;  %4950 = vmatpush3.msra.mxu0 %v4181_v20  ;;  %v2943_v23 = vld [vmem:[#allocation3 + $0x210] sm:$0xff] }
 0x318   :  { %v3216_v2 = vpop.f32.mrf.mxu1  ;;  %v3607_v54 = vmax.f32 %v3577_v62, %v3593_v50  ;;  %v1255_v32 = vpop.permute.xlu1 %1254  ;;  %4951 = vmatprep.subr.mxu0 %v4196_v51  ;;  %v2946_v62 = vld [vmem:[#allocation3 + $0x228] sm:$0xff] }
 0x319   :  { %v3464_v27 = vmax.f32 %v3424_v59, 0.0  ;;  %v3378_v16 = vmul.f32 %v7065_v30, %v3216_v2  ;;  %1343 = vst.msk [vmem:[#allocation3 + $0x200] sm:$0xff] %vm1310_vm3, %v1255_v32  ;;  %v3694_v60 = vpop.permute.xlu0 %3693  ;;  %4952 = vmatpush3.msra.mxu0 %v4180_v36 }
 0x31a   :  { %v3218_v56 = vpop.f32.mrf.mxu1  ;;  %4066 = vrot.lane.b32.xlu1 %v7221_v5, %s5231_s17  ;;  %v3615_v18 = vmax.f32 %v3567_v37, %v3607_v54  ;;  %3723 = vst.msk [vmem:[#allocation6 + $0xa8] sm:$0xff] %vm3715_vm12, %v3694_v60  ;;  %v2940_v5 = vld [vmem:[#allocation3 + $0x1f8] sm:$0xff]  ;;  %4953 = vmatprep.subr.mxu0 %v4195_v44 }
 0x31b   :  { %3504 = vst.msk [vmem:[#allocation4 + $0x50] sm:$0xff] %vm95_vm10, %v3464_v27  ;;  %v3425_v42 = vadd.f32 %v7073_v48, %v3378_v16  ;;  %4954 = vmatpush3.msra.mxu0 %v4179_v6 }
 0x31c   :  { %v1496_v45 = vpop.permute.xlu1 %1495  ;;  %v2937_v49 = vld [vmem:[#allocation3 + $0x1e0] sm:$0xff]  ;;  %3624 = vst.msk [vmem:[#allocation5 + $0x20] sm:$0xf] %vm3622_vm11, %v3615_v18  ;;  %4955 = vmatprep.subr.mxu0 %v4194_v1  ;;  %v2950_v1 = vld [vmem:[#allocation3 + $0x248] sm:$0xff] }
 0x31d   :  { %v3465_v52 = vmax.f32 %v3425_v42, 0.0  ;;  %1584 = vst.msk [vmem:[#allocation3 + $0x200] sm:$0xff] %vm1551_vm4, %v1496_v45  ;;  %3310 = vmatmul.mubr.f32.gmra.mxu1 %v2937_v49  ;;  %4956 = vmatpush3.msra.mxu0 %v4178_v25 }
 0x31e   :  { %4838 = vmatprep.mubr.msk.f32.mxu1 %vm48_vm2, %v2940_v5  ;;  %4957 = vmatprep.subr.mxu0 %v4193_v15 }
 0x31f   :  { %3505 = vst.msk [vmem:[#allocation4 + $0x58] sm:$0xff] %vm95_vm10, %v3465_v52  ;;  %4958 = vmatpush3.msra.mxu0 %v4177_v4 }
 0x320   :  { %v1737_v39 = vpop.permute.xlu1 %1736  ;;  %4959 = vmatprep.subr.mxu0 %v4192_v63 }
 0x321   :  { %1825 = vst.msk [vmem:[#allocation3 + $0x200] sm:$0xff] %vm1792_vm5, %v1737_v39  ;;  %3315 = vmatmul.mubr.f32.gmra.mxu1 %v2939_v8  ;;  %4960 = vmatpush3.msra.mxu0 %v4176_v11  ;;  %v7442_v11 = vld [vmem:[%s7810_s5] ss:$0 sm:$0xff] }
 0x322   :  { %4839 = vmatprep.mubr.msk.f32.mxu1 %vm48_vm2, %v2942_v47  ;;  %4961 = vmatprep.subr.mxu0 %v4191_v46 }
 0x323   :  { %v3899_v22 = vld [vmem:[#allocation5 + $0x19] sm:$0xff]  ;;  %4962 = vmatpush3.msra.mxu0 %v4175_v31 }
 0x324   :  { %v3971_v29 = vld [vmem:[#allocation5 + $0x1f] sm:$0xff]  ;;  %v1978_v57 = vpop.permute.xlu1 %1977  ;;  %3924 = vrot.lane.b32.xlu1 %v3899_v22, %s5226_s28  ;;  %3756 = vrot.lane.b32.xlu0 %v3899_v22, %s5228_s15 }
 0x325   :  { %v4043_v7 = vld [vmem:[#allocation5 + $0x20] sm:$0xff]  ;;  %3646 = vst.msk [vmem:[#allocation6 + $0x48] sm:$0xff] %vm95_vm10, %v3971_v29  ;;  %4963 = vmatprep.subr.mxu0 %v4190_v55 }
 0x326   :  { %3888 = vst.msk [vmem:[#allocation6 + $0x38] sm:$0xff] %vm95_vm10, %v4043_v7  ;;  %v4114_v53 = vld [vmem:[#allocation5 + $0x19] sm:$0xff]  ;;  %4964 = vmatpush3.msra.mxu0 %v4174_v13 }
 0x327   :  { %2066 = vst.msk [vmem:[#allocation3 + $0x200] sm:$0xff] %vm2033_vm6, %v1978_v57  ;;  %v3539_v26 = vld [vmem:[#allocation4 + $0x50] ss:$2 sm:$0xff]  ;;  %v3555_v5 = vld [vmem:[#allocation4 + $0x51] ss:$2 sm:$0xff] }
 0x328   :  { %4126 = vst.msk [vmem:[#allocation6 + $0x10] sm:$0xff] %vm95_vm10, %v4114_v53  ;;  %v2219_v38 = vpop.permute.xlu1 %2218  ;;  %3996 = vrot.lane.b32.xlu1 %v3971_v29, %s5228_s15  ;;  %3829 = vrot.lane.b32.xlu0 %v3971_v29, %s5231_s17  ;;  %v3568_v39 = vmax.f32 %v3539_v26, %v3555_v5  ;;  %v2948_v57 = vld [vmem:[#allocation3 + $0x238] sm:$0xff] }
 0x329   :  { %2307 = vst.msk [vmem:[#allocation3 + $0x200] sm:$0xff] %vm2274_vm7, %v2219_v38  ;;  %v2947_v38 = vld [vmem:[#allocation3 + $0x230] sm:$0xff] }
 0x32c   :  { %v2460_v58 = vpop.permute.xlu1 %2459  ;;  %4068 = vrot.lane.b32.xlu1 %v4043_v7, %s5231_s17  ;;  %3685 = vrot.lane.b32.xlu0 %v4043_v7, %s5226_s28 }
 0x32d   :  { %2548 = vst.msk [vmem:[#allocation3 + $0x200] sm:$0xff] %vm2515_vm8, %v2460_v58 }
 0x330   :  { %v2701_v41 = vpop.permute.xlu1 %2700 }
 0x331   :  { %2789 = vst.msk [vmem:[#allocation3 + $0x200] sm:$0xff] %vm2756_vm9, %v2701_v41 }
 0x334   :  { %v1259_v12 = vpop.permute.xlu1 %1258 }
 0x335   :  { %1345 = vst.msk [vmem:[#allocation3 + $0x220] sm:$0xff] %vm1310_vm3, %v1259_v12  ;;  %v7453_v12 = vld [vmem:[%s7811_s6] ss:$0 sm:$0xff] }
 0x338   :  { %v1500_v40 = vpop.permute.xlu1 %1499  ;;  %v2941_v35 = vld [vmem:[#allocation3 + $0x200] sm:$0xff] }
 0x339   :  { %1586 = vst.msk [vmem:[#allocation3 + $0x220] sm:$0xff] %vm1551_vm4, %v1500_v40  ;;  %3320 = vmatmul.mubr.f32.gmra.mxu1 %v2941_v35 }
 0x33a   :  { %4840 = vmatprep.mubr.msk.f32.mxu1 %vm48_vm2, %v2944_v0 }
 0x33c   :  { %v1741_v34 = vpop.permute.xlu1 %1740 }
 0x33d   :  { %1827 = vst.msk [vmem:[#allocation3 + $0x220] sm:$0xff] %vm1792_vm5, %v1741_v34  ;;  %v3221_v59 = vpop.f32.mrf.mxu1  ;;  %3325 = vmatmul.mubr.f32.gmra.mxu1 %v2943_v23 }
 0x33e   :  { %v3379_v50 = vmul.f32 %v7065_v30, %v3221_v59  ;;  %4841 = vmatprep.mubr.msk.f32.mxu1 %vm48_vm2, %v2946_v62 }
 0x33f   :  { %v3223_v2 = vpop.f32.mrf.mxu1 }
 0x340   :  { %v3426_v37 = vadd.f32 %v7073_v48, %v3379_v50  ;;  %v1982_v54 = vpop.permute.xlu1 %1981 }
 0x341   :  { %2068 = vst.msk [vmem:[#allocation3 + $0x220] sm:$0xff] %vm2033_vm6, %v1982_v54  ;;  %v3226_v27 = vpop.f32.mrf.mxu1 }
 0x342   :  { %v3466_v16 = vmax.f32 %v3426_v37, 0.0  ;;  %v3380_v32 = vmul.f32 %v7065_v30, %v3226_v27 }
 0x343   :  { %v3228_v56 = vpop.f32.mrf.mxu1 }
 0x344   :  { %3506 = vst.msk [vmem:[#allocation4 + $0x60] sm:$0xff] %vm95_vm10, %v3466_v16  ;;  %v3427_v60 = vadd.f32 %v7073_v48, %v3380_v32  ;;  %v2223_v42 = vpop.permute.xlu1 %2222 }
 0x345   :  { %2309 = vst.msk [vmem:[#allocation3 + $0x220] sm:$0xff] %vm2274_vm7, %v2223_v42 }
 0x346   :  { %v3467_v18 = vmax.f32 %v3427_v60, 0.0 }
 0x348   :  { %3507 = vst.msk [vmem:[#allocation4 + $0x68] sm:$0xff] %vm95_vm10, %v3467_v18  ;;  %v2464_v52 = vpop.permute.xlu1 %2463 }
 0x349   :  { %2550 = vst.msk [vmem:[#allocation3 + $0x220] sm:$0xff] %vm2515_vm8, %v2464_v52 }
 0x34c   :  { %v3231_v45 = vpop.f32.mrf.mxu1  ;;  %v2705_v14 = vpop.permute.xlu1 %2704 }
 0x34d   :  { %v3381_v49 = vmul.f32 %v7065_v30, %v3231_v45  ;;  %2791 = vst.msk [vmem:[#allocation3 + $0x220] sm:$0xff] %vm2756_vm9, %v2705_v14 }
 0x34e   :  { %v3233_v43 = vpop.f32.mrf.mxu1 }
 0x34f   :  { %v3428_v17 = vadd.f32 %v7073_v48, %v3381_v49  ;;  %v3579_v8 = vld [vmem:[#allocation4 + $0x60] ss:$2 sm:$0xff]  ;;  %v3595_v10 = vld [vmem:[#allocation4 + $0x61] ss:$2 sm:$0xff] }
 0x350   :  { %v3236_v21 = vpop.f32.mrf.mxu1  ;;  %v3608_v9 = vmax.f32 %v3579_v8, %v3595_v10  ;;  %v1263_v20 = vpop.permute.xlu1 %1262 }
 0x351   :  { %v3468_v47 = vmax.f32 %v3428_v17, 0.0  ;;  %v3382_v28 = vmul.f32 %v7065_v30, %v3236_v21  ;;  %1347 = vst.msk [vmem:[#allocation3 + $0x240] sm:$0xff] %vm1310_vm3, %v1263_v20 }
 0x352   :  { %v3238_v22 = vpop.f32.mrf.mxu1  ;;  %v3616_v7 = vmax.f32 %v3568_v39, %v3608_v9 }
 0x353   :  { %3508 = vst.msk [vmem:[#allocation4 + $0x70] sm:$0xff] %vm95_vm10, %v3468_v47  ;;  %v3429_v29 = vadd.f32 %v7073_v48, %v3382_v28 }
 0x354   :  { %v1504_v36 = vpop.permute.xlu1 %1503  ;;  %v2945_v53 = vld [vmem:[#allocation3 + $0x220] sm:$0xff]  ;;  %3625 = vst.msk [vmem:[#allocation5 + $0x28] sm:$0xf] %vm3622_vm11, %v3616_v7 }
 0x355   :  { %v3469_v51 = vmax.f32 %v3429_v29, 0.0  ;;  %1588 = vst.msk [vmem:[#allocation3 + $0x240] sm:$0xff] %vm1551_vm4, %v1504_v36  ;;  %3330 = vmatmul.mubr.f32.gmra.mxu1 %v2945_v53 }
 0x356   :  { %v3241_v44 = vpop.f32.mrf.mxu1  ;;  %4842 = vmatprep.mubr.msk.f32.mxu1 %vm48_vm2, %v2948_v57 }
 0x357   :  { %3509 = vst.msk [vmem:[#allocation4 + $0x78] sm:$0xff] %vm95_vm10, %v3469_v51  ;;  %v3383_v6 = vmul.f32 %v7065_v30, %v3241_v44 }
 0x358   :  { %v1745_v25 = vpop.permute.xlu1 %1744  ;;  %v3243_v58 = vpop.f32.mrf.mxu1 }
 0x359   :  { %v3430_v15 = vadd.f32 %v7073_v48, %v3383_v6  ;;  %1829 = vst.msk [vmem:[#allocation3 + $0x240] sm:$0xff] %vm1792_vm5, %v1745_v25  ;;  %3335 = vmatmul.mubr.f32.gmra.mxu1 %v2947_v38 }
 0x35a   :  { %v3246_v4 = vpop.f32.mrf.mxu1  ;;  %4843 = vmatprep.mubr.msk.f32.mxu1 %vm48_vm2, %v2950_v1 }
 0x35b   :  { %v3470_v63 = vmax.f32 %v3430_v15, 0.0  ;;  %v3384_v41 = vmul.f32 %v7442_v11, %v3246_v4  ;;  %v3900_v30 = vld [vmem:[#allocation5 + $0x21] sm:$0xff] }
 0x35c   :  { %v3972_v46 = vld [vmem:[#allocation5 + $0x27] sm:$0xff]  ;;  %v1986_v55 = vpop.permute.xlu1 %1985  ;;  %3926 = vrot.lane.b32.xlu1 %v3900_v30, %s5226_s28  ;;  %3758 = vrot.lane.b32.xlu0 %v3900_v30, %s5228_s15  ;;  %v3248_v48 = vpop.f32.mrf.mxu1 }
 0x35d   :  { %v4044_v31 = vld [vmem:[#allocation5 + $0x28] sm:$0xff]  ;;  %3647 = vst.msk [vmem:[#allocation6 + $0x60] sm:$0xff] %vm95_vm10, %v3972_v46  ;;  %3510 = vst.msk [vmem:[#allocation4 + $0x80] sm:$0xff] %vm95_vm10, %v3470_v63  ;;  %v3431_v40 = vadd.f32 %v7453_v12, %v3384_v41  ;;  %v4138_v48 = vld [vmem:[#allocation6] sm:$0xff] }
 0x35e   :  { %3889 = vst.msk [vmem:[#allocation6 + $0x50] sm:$0xff] %vm95_vm10, %v4044_v31  ;;  %v4115_v13 = vld [vmem:[#allocation5 + $0x21] sm:$0xff]  ;;  %v3755_v35 = vpop.permute.xlu0 %3754  ;;  %v3251_v0 = vpop.f32.mrf.mxu1  ;;  %v3541_v37 = vld [vmem:[#allocation4 + $0x70] ss:$2 sm:$0xff]  ;;  %v3557_v54 = vld [vmem:[#allocation4 + $0x71] ss:$2 sm:$0xff] }
 0x35f   :  { %2070 = vst.msk [vmem:[#allocation3 + $0x240] sm:$0xff] %vm2033_vm6, %v1986_v55  ;;  %v3471_v23 = vmax.f32 %v3431_v40, 0.0  ;;  %v3569_v42 = vmax.f32 %v3541_v37, %v3557_v54 }
 0x360   :  { %4127 = vst.msk [vmem:[#allocation6 + $0x28] sm:$0xff] %vm95_vm10, %v4115_v13  ;;  %v2468_v34 = vpop.permute.xlu1 %2467  ;;  %3998 = vrot.lane.b32.xlu1 %v3972_v46, %s5228_s15  ;;  %3831 = vrot.lane.b32.xlu0 %v3972_v46, %s5231_s17  ;;  %v3253_v59 = vpop.f32.mrf.mxu1 }
 0x361   :  { %2311 = vst.msk [vmem:[#allocation3 + $0x240] sm:$0xff] %vm2274_vm7, %v7236_v33 }
 0x362   :  { %3790 = vst.msk [vmem:[#allocation6 + $0x18] sm:$0xff] %vm3788_vm13, %v3755_v35  ;;  %v3828_v62 = vpop.permute.xlu0 %3827  ;;  %v3256_v33 = vpop.f32.mrf.mxu1 }
 0x363   :  { %3511 = vst.msk [vmem:[#allocation4 + $0x88] sm:$0xff] %vm95_vm10, %v3471_v23 }
 0x364   :  { %2552 = vst.msk [vmem:[#allocation3 + $0x240] sm:$0xff] %vm2515_vm8, %v2468_v34  ;;  %v7468_v50 = vpop.permute.xlu1 %4002  ;;  %4070 = vrot.lane.b32.xlu1 %v4044_v31, %s5231_s17  ;;  %3687 = vrot.lane.b32.xlu0 %v4044_v31, %s5226_s28  ;;  %v3258_v2 = vpop.f32.mrf.mxu1 }
 0x365   :  { %2793 = vst.msk [vmem:[#allocation3 + $0x240] sm:$0xff] %vm2756_vm9, %v7243_v19 }
 0x366   :  { %3863 = vst.msk [vmem:[#allocation6 + $0x18] sm:$0xff] %vm3861_vm14, %v3828_v62  ;;  %v3684_v27 = vpop.permute.xlu0 %3683  ;;  %v3261_v16 = vpop.f32.mrf.mxu1 }
 0x367   :  { %3718 = vst.msk [vmem:[#allocation6 + $0x30] sm:$0xff] %vm3715_vm12, %v3684_v27 }
 0x368   :  { %v7473_v19 = vpop.permute.xlu1 %4074  ;;  %v3263_v60 = vpop.f32.mrf.mxu1 }
 0x36a   :  { %v3581_v32 = vld [vmem:[#allocation4 + $0x80] ss:$2 sm:$0xff]  ;;  %v3597_v56 = vld [vmem:[#allocation4 + $0x81] ss:$2 sm:$0xff]  ;;  %v3266_v45 = vpop.f32.mrf.mxu1 }
 0x36b   :  { %v3609_v18 = vmax.f32 %v3581_v32, %v3597_v56  ;;  %v3880_v32 = vld [vmem:[#allocation5 + $0x40] sm:$0xff] }
 0x36c   :  { %v2949_v52 = vld [vmem:[#allocation3 + $0x240] sm:$0xff]  ;;  %v3933_v14 = vpop.permute.xlu1 %3932  ;;  %v3268_v26 = vpop.f32.mrf.mxu1  ;;  %3892 = vst.msk [vmem:[#allocation6 + $0x98] sm:$0xff] %vm95_vm10, %v3880_v32 }
 0x36d   :  { %3340 = vmatmul.mubr.f32.gmra.mxu1 %v2949_v52  ;;  %v3617_v49 = vmax.f32 %v3569_v42, %v3609_v18  ;;  %3963 = vst.msk [vmem:[#allocation6 + $0x80] sm:$0xff] %vm3715_vm12, %v3933_v14  ;;  %v4141_v18 = vld [vmem:[#allocation6 + $0x18] sm:$0xff] }
 0x36f   :  { %3626 = vst.msk [vmem:[#allocation5 + $0x30] sm:$0xf] %vm3622_vm11, %v3617_v49 }
 0x370   :  { %v3271_v5 = vpop.f32.mrf.mxu1  ;;  %v4005_v17 = vpop.permute.xlu1 %4004 }
 0x371   :  { %v3389_v43 = vmul.f32 %v7442_v11, %v3271_v5  ;;  %4035 = vst.msk [vmem:[#allocation6 + $0x80] sm:$0xff] %vm3788_vm13, %v4005_v17 }
 0x372   :  { %v3273_v8 = vpop.f32.mrf.mxu1 }
 0x373   :  { %v3436_v10 = vadd.f32 %v7453_v12, %v3389_v43 }
 0x374   :  { %v3276_v21 = vpop.f32.mrf.mxu1  ;;  %v4077_v47 = vpop.permute.xlu1 %4076 }
 0x375   :  { %v3476_v39 = vmax.f32 %v3436_v10, 0.0  ;;  %v3390_v9 = vmul.f32 %v7442_v11, %v3276_v21  ;;  %4107 = vst.msk [vmem:[#allocation6 + $0x80] sm:$0xff] %vm3861_vm14, %v4077_v47 }
 0x376   :  { %v3901_v28 = vld [vmem:[#allocation5 + $0x29] sm:$0xff]  ;;  %v3278_v29 = vpop.f32.mrf.mxu1  ;;  %v3902_v7 = vld [vmem:[#allocation5 + $0x31] sm:$0xff] }
 0x377   :  { %v3973_v20 = vld [vmem:[#allocation5 + $0x2f] sm:$0xff]  ;;  %3928 = vrot.lane.b32.xlu1 %v3901_v28, %s5226_s28  ;;  %3760 = vrot.lane.b32.xlu0 %v3901_v28, %s5228_s15  ;;  %4128 = vst.msk [vmem:[#allocation6 + $0x40] sm:$0xff] %vm95_vm10, %v3901_v28  ;;  %3516 = vst.msk [vmem:[#allocation4 + $0xb0] sm:$0xff] %vm95_vm10, %v3476_v39  ;;  %v3437_v57 = vadd.f32 %v7453_v12, %v3390_v9 }
 0x378   :  { %v4045_v22 = vld [vmem:[#allocation5 + $0x30] sm:$0xff]  ;;  %3648 = vst.msk [vmem:[#allocation6 + $0x78] sm:$0xff] %vm95_vm10, %v3973_v20  ;;  %4129 = vst.msk [vmem:[#allocation6 + $0x58] sm:$0xff] %vm95_vm10, %v3902_v7  ;;  %v7490_v36 = vpop.permute.xlu1 %4014 }
 0x379   :  { %3890 = vst.msk [vmem:[#allocation6 + $0x68] sm:$0xff] %vm95_vm10, %v4045_v22  ;;  %v3477_v51 = vmax.f32 %v3437_v57, 0.0 }
 0x37b   :  { %4000 = vrot.lane.b32.xlu1 %v3973_v20, %s5228_s15  ;;  %3833 = vrot.lane.b32.xlu0 %v3973_v20, %s5231_s17  ;;  %3517 = vst.msk [vmem:[#allocation4 + $0xb8] sm:$0xff] %vm95_vm10, %v3477_v51 }
 0x37c   :  { %v7495_v53 = vpop.permute.xlu1 %4086 }
 0x37f   :  { %4072 = vrot.lane.b32.xlu1 %v4045_v22, %s5231_s17  ;;  %3689 = vrot.lane.b32.xlu0 %v4045_v22, %s5226_s28 }
 0x380   :  { %v3945_v44 = vpop.permute.xlu1 %3944 }
 0x381   :  { %3969 = vst.msk [vmem:[#allocation6 + $0x110] sm:$0xff] %vm3715_vm12, %v3945_v44 }
 0x382   :  { %v3543_v0 = vld [vmem:[#allocation4 + $0xb0] ss:$2 sm:$0xff]  ;;  %v3559_v23 = vld [vmem:[#allocation4 + $0xb1] ss:$2 sm:$0xff] }
 0x383   :  { %3930 = vrot.lane.b32.xlu1 %v3902_v7, %s5226_s28  ;;  %3762 = vrot.lane.b32.xlu0 %v3902_v7, %s5228_s15  ;;  %v3570_v2 = vmax.f32 %v3543_v0, %v3559_v23 }
 0x384   :  { %v3923_v38 = vpop.permute.xlu1 %3922 }
 0x385   :  { %3958 = vst.msk [vmem:[#allocation6 + $0x8] sm:$0xff] %vm3715_vm12, %v3923_v38 }
 0x388   :  { %v3995_v6 = vpop.permute.xlu1 %3994 }
 0x389   :  { %4030 = vst.msk [vmem:[#allocation6 + $0x8] sm:$0xff] %vm3788_vm13, %v3995_v6  ;;  %v3281_v1 = vpop.f32.mrf.mxu1 }
 0x38a   :  { %v3391_v25 = vmul.f32 %v7442_v11, %v3281_v1 }
 0x38b   :  { %v3283_v58 = vpop.f32.mrf.mxu1 }
 0x38c   :  { %v3438_v15 = vadd.f32 %v7453_v12, %v3391_v25  ;;  %v4067_v4 = vpop.permute.xlu1 %4066 }
 0x38d   :  { %4102 = vst.msk [vmem:[#allocation6 + $0x8] sm:$0xff] %vm3861_vm14, %v4067_v4  ;;  %v3286_v63 = vpop.f32.mrf.mxu1 }
 0x38e   :  { %v3478_v41 = vmax.f32 %v3438_v15, 0.0  ;;  %v3392_v30 = vmul.f32 %v7442_v11, %v3286_v63 }
 0x38f   :  { %v3288_v46 = vpop.f32.mrf.mxu1 }
 0x390   :  { %3518 = vst.msk [vmem:[#allocation4 + $0xc0] sm:$0xff] %vm95_vm10, %v3478_v41  ;;  %v3439_v31 = vadd.f32 %v7453_v12, %v3392_v30 }
 0x392   :  { %v3479_v55 = vmax.f32 %v3439_v31, 0.0 }
 0x394   :  { %3519 = vst.msk [vmem:[#allocation4 + $0xc8] sm:$0xff] %vm95_vm10, %v3479_v55  ;;  %v4139_v13 = vld [vmem:[#allocation6 + $0x8] sm:$0xff] }
 0x395   :  { %4310 = vmatprep.mubr.f32.mxu0 %v4139_v13 }
 0x396   :  { %v3925_v40 = vpop.permute.xlu1 %3924  ;;  %v3757_v35 = vpop.permute.xlu0 %3756  ;;  %4311 = vmatmul.mubr.f32.vlgmr.msra.gmra.mxu0 %v4138_v48 }
 0x397   :  { %3959 = vst.msk [vmem:[#allocation6 + $0x20] sm:$0xff] %vm3715_vm12, %v3925_v40 }
 0x398   :  { %3791 = vst.msk [vmem:[#allocation6 + $0x30] sm:$0xff] %vm3788_vm13, %v3757_v35 }
 0x39a   :  { %v3997_v34 = vpop.permute.xlu1 %3996  ;;  %v3830_v59 = vpop.permute.xlu0 %3829 }
 0x39b   :  { %v3583_v62 = vld [vmem:[#allocation4 + $0xc0] ss:$2 sm:$0xff]  ;;  %v3599_v33 = vld [vmem:[#allocation4 + $0xc1] ss:$2 sm:$0xff]  ;;  %4031 = vst.msk [vmem:[#allocation6 + $0x20] sm:$0xff] %vm3788_vm13, %v3997_v34 }
 0x39c   :  { %3864 = vst.msk [vmem:[#allocation6 + $0x30] sm:$0xff] %vm3861_vm14, %v3830_v59  ;;  %v3610_v37 = vmax.f32 %v3583_v62, %v3599_v33 }
 0x39e   :  { %v4069_v54 = vpop.permute.xlu1 %4068  ;;  %v3686_v27 = vpop.permute.xlu0 %3685  ;;  %v3618_v16 = vmax.f32 %v3570_v2, %v3610_v37 }
 0x39f   :  { %4103 = vst.msk [vmem:[#allocation6 + $0x20] sm:$0xff] %vm3861_vm14, %v4069_v54 }
 0x3a0   :  { %3719 = vst.msk [vmem:[#allocation6 + $0x48] sm:$0xff] %vm3715_vm12, %v3686_v27 }
 0x3a1   :  { %3627 = vst.msk [vmem:[#allocation5 + $0x48] sm:$0xf] %vm3622_vm11, %v3618_v16 }
 0x3a3   :  { %v4144_v40 = vld [vmem:[#allocation6 + $0x30] sm:$0xff] }
 0x3a5   :  { %v3291_v56 = vpop.f32.mrf.mxu1 }
 0x3a6   :  { %v3393_v60 = vmul.f32 %v7442_v11, %v3291_v56  ;;  %v4142_v42 = vld [vmem:[#allocation6 + $0x20] sm:$0xff] }
 0x3a7   :  { %v3293_v52 = vpop.f32.mrf.mxu1  ;;  %4314 = vmatprep.mubr.f32.mxu0 %v4142_v42 }
 0x3a8   :  { %v3904_v45 = vld [vmem:[#allocation5 + $0x41] sm:$0xff]  ;;  %v3440_v26 = vadd.f32 %v7453_v12, %v3393_v60  ;;  %4315 = vmatmul.mubr.f32.gmra.mxu0 %v4141_v18 }
 0x3a9   :  { %v3976_v49 = vld [vmem:[#allocation5 + $0x47] sm:$0xff]  ;;  %3934 = vrot.lane.b32.xlu1 %v3904_v45, %s5226_s28  ;;  %4131 = vst.msk [vmem:[#allocation6 + $0x88] sm:$0xff] %vm95_vm10, %v3904_v45  ;;  %3766 = vrot.lane.b32.xlu0 %v3904_v45, %s5228_s15  ;;  %v3296_v5 = vpop.f32.mrf.mxu1 }
 0x3aa   :  { %v4048_v14 = vld [vmem:[#allocation5 + $0x48] sm:$0xff]  ;;  %3651 = vst.msk [vmem:[#allocation6 + $0xc0] sm:$0xff] %vm95_vm10, %v3976_v49  ;;  %v3480_v43 = vmax.f32 %v3440_v26, 0.0  ;;  %v3394_v17 = vmul.f32 %v7442_v11, %v3296_v5 }
 0x3ab   :  { %3893 = vst.msk [vmem:[#allocation6 + $0xb0] sm:$0xff] %vm95_vm10, %v4048_v14  ;;  %v3298_v8 = vpop.f32.mrf.mxu1 }
 0x3ac   :  { %3520 = vst.msk [vmem:[#allocation4 + $0xd0] sm:$0xff] %vm95_vm10, %v3480_v43  ;;  %v3441_v10 = vadd.f32 %v7453_v12, %v3394_v17 }
 0x3ad   :  { %4006 = vrot.lane.b32.xlu1 %v3976_v49, %s5228_s15  ;;  %3839 = vrot.lane.b32.xlu0 %v3976_v49, %s5231_s17 }
 0x3ae   :  { %v3481_v21 = vmax.f32 %v3441_v10, 0.0 }
 0x3b0   :  { %3521 = vst.msk [vmem:[#allocation4 + $0xd8] sm:$0xff] %vm95_vm10, %v3481_v21  ;;  %v4154_v21 = vld [vmem:[#allocation6 + $0x80] sm:$0xff] }
 0x3b1   :  { %4078 = vrot.lane.b32.xlu1 %v4048_v14, %s5231_s17  ;;  %3695 = vrot.lane.b32.xlu0 %v4048_v14, %s5226_s28 }
 0x3b7   :  { %v3545_v6 = vld [vmem:[#allocation4 + $0xd0] ss:$2 sm:$0xff]  ;;  %v3561_v1 = vld [vmem:[#allocation4 + $0xd1] ss:$2 sm:$0xff] }
 0x3b8   :  { %v3571_v63 = vmax.f32 %v3545_v6, %v3561_v1 }
 0x3c1   :  { %v3301_v39 = vpop.f32.mrf.mxu1 }
 0x3c2   :  { %v3395_v9 = vmul.f32 %v7442_v11, %v3301_v39 }
 0x3c3   :  { %v3303_v47 = vpop.f32.mrf.mxu1 }
 0x3c4   :  { %v3442_v28 = vadd.f32 %v7453_v12, %v3395_v9 }
 0x3c5   :  { %v3306_v20 = vpop.f32.mrf.mxu1 }
 0x3c6   :  { %v3482_v22 = vmax.f32 %v3442_v28, 0.0  ;;  %v3396_v29 = vmul.f32 %v7442_v11, %v3306_v20 }
 0x3c7   :  { %v3308_v7 = vpop.f32.mrf.mxu1 }
 0x3c8   :  { %3522 = vst.msk [vmem:[#allocation4 + $0xe0] sm:$0xff] %vm95_vm10, %v3482_v22  ;;  %v3443_v57 = vadd.f32 %v7453_v12, %v3396_v29 }
 0x3ca   :  { %v3483_v51 = vmax.f32 %v3443_v57, 0.0 }
 0x3cc   :  { %3523 = vst.msk [vmem:[#allocation4 + $0xe8] sm:$0xff] %vm95_vm10, %v3483_v51 }
 0x3ce   :  { %v3927_v44 = vpop.permute.xlu1 %3926  ;;  %v3759_v38 = vpop.permute.xlu0 %3758 }
 0x3cf   :  { %3960 = vst.msk [vmem:[#allocation6 + $0x38] sm:$0xff] %vm3715_vm12, %v3927_v44 }
 0x3d0   :  { %3792 = vst.msk [vmem:[#allocation6 + $0x48] sm:$0xff] %vm3788_vm13, %v3759_v38 }
 0x3d2   :  { %v3999_v25 = vpop.permute.xlu1 %3998  ;;  %v3832_v58 = vpop.permute.xlu0 %3831 }
 0x3d3   :  { %v3585_v15 = vld [vmem:[#allocation4 + $0xe0] ss:$2 sm:$0xff]  ;;  %v3601_v4 = vld [vmem:[#allocation4 + $0xe1] ss:$2 sm:$0xff]  ;;  %4032 = vst.msk [vmem:[#allocation6 + $0x38] sm:$0xff] %vm3788_vm13, %v3999_v25 }
 0x3d4   :  { %3865 = vst.msk [vmem:[#allocation6 + $0x48] sm:$0xff] %vm3861_vm14, %v3832_v58  ;;  %v3611_v41 = vmax.f32 %v3585_v15, %v3601_v4 }
 0x3d6   :  { %v4071_v30 = vpop.permute.xlu1 %4070  ;;  %v3688_v46 = vpop.permute.xlu0 %3687  ;;  %v3619_v31 = vmax.f32 %v3571_v63, %v3611_v41 }
 0x3d7   :  { %4104 = vst.msk [vmem:[#allocation6 + $0x38] sm:$0xff] %vm3861_vm14, %v4071_v30 }
 0x3d8   :  { %3720 = vst.msk [vmem:[#allocation6 + $0x60] sm:$0xff] %vm3715_vm12, %v3688_v46 }
 0x3d9   :  { %3628 = vst.msk [vmem:[#allocation5 + $0x50] sm:$0xf] %vm3622_vm11, %v3619_v31 }
 0x3db   :  { %v4147_v14 = vld [vmem:[#allocation6 + $0x48] sm:$0xff] }
 0x3dd   :  { %v3311_v55 = vpop.f32.mrf.mxu1 }
 0x3de   :  { %v3397_v48 = vmul.f32 %v7442_v11, %v3311_v55  ;;  %v4145_v13 = vld [vmem:[#allocation6 + $0x38] sm:$0xff] }
 0x3df   :  { %v3313_v35 = vpop.f32.mrf.mxu1  ;;  %4319 = vmatprep.mubr.f32.mxu0 %v4145_v13 }
 0x3e0   :  { %v3905_v0 = vld [vmem:[#allocation5 + $0x49] sm:$0xff]  ;;  %v3444_v59 = vadd.f32 %v7453_v12, %v3397_v48  ;;  %4320 = vmatmul.mubr.f32.gmra.mxu0 %v4144_v40 }
 0x3e1   :  { %v3977_v23 = vld [vmem:[#allocation5 + $0x4f] sm:$0xff]  ;;  %3936 = vrot.lane.b32.xlu1 %v3905_v0, %s5226_s28  ;;  %4132 = vst.msk [vmem:[#allocation6 + $0xa0] sm:$0xff] %vm95_vm10, %v3905_v0  ;;  %3768 = vrot.lane.b32.xlu0 %v3905_v0, %s5228_s15  ;;  %v3316_v62 = vpop.f32.mrf.mxu1  ;;  %v4208_v0 = vld [vmem:[%s7812_s7 + $0x110] sm:$0xff] }
 0x3e2   :  { %v4049_v34 = vld [vmem:[#allocation5 + $0x50] sm:$0xff]  ;;  %3652 = vst.msk [vmem:[#allocation6 + $0xd8] sm:$0xff] %vm95_vm10, %v3977_v23  ;;  %v3484_v33 = vmax.f32 %v3444_v59, 0.0  ;;  %v3398_v2 = vmul.f32 %v7442_v11, %v3316_v62  ;;  %v4209_v35 = vld [vmem:[%s7812_s7 + $0x118] sm:$0xff] }
 0x3e3   :  { %3894 = vst.msk [vmem:[#allocation6 + $0xc8] sm:$0xff] %vm95_vm10, %v4049_v34  ;;  %v3318_v37 = vpop.f32.mrf.mxu1  ;;  %5131 = vmatprep.subr.mxu0 %v4209_v35 }
 0x3e4   :  { %3524 = vst.msk [vmem:[#allocation4 + $0xf0] sm:$0xff] %vm95_vm10, %v3484_v33  ;;  %v3445_v54 = vadd.f32 %v7453_v12, %v3398_v2  ;;  %5132 = vmatpush3.msra.mxu0 %v4209_v35  ;;  %v4556_v35 = vld [vmem:[%s7815_s10 + $0x30] sm:$0xff] }
 0x3e5   :  { %4008 = vrot.lane.b32.xlu1 %v3977_v23, %s5228_s15  ;;  %3841 = vrot.lane.b32.xlu0 %v3977_v23, %s5231_s17  ;;  %v4156_v23 = vld [vmem:[#allocation6 + $0x90] sm:$0xff] }
 0x3e6   :  { %v3485_v27 = vmax.f32 %v3445_v54, 0.0  ;;  %5133 = vmatprep.subr.mxu0 %v4208_v0 }
 0x3e7   :  { %5134 = vmatpush3.msra.mxu0 %v4208_v0  ;;  %v2113_v0 = vld [vmem:[#allocation2 + $0x151] sm:$0xff] }
 0x3e8   :  { %3525 = vst.msk [vmem:[#allocation4 + $0xf8] sm:$0xff] %vm95_vm10, %v3485_v27 }
 0x3e9   :  { %v3929_v16 = vpop.permute.xlu1 %3928  ;;  %v3761_v32 = vpop.permute.xlu0 %3760  ;;  %4080 = vrot.lane.b32.xlu1 %v4049_v34, %s5231_s17  ;;  %3697 = vrot.lane.b32.xlu0 %v4049_v34, %s5226_s28  ;;  %2874 = vst.msk [vmem:[#allocation3 + $0x258] sm:$0xff] %vm48_vm2, %v2113_v0 }
 0x3ea   :  { %3961 = vst.msk [vmem:[#allocation6 + $0x50] sm:$0xff] %vm3715_vm12, %v3929_v16 }
 0x3eb   :  { %3793 = vst.msk [vmem:[#allocation6 + $0x60] sm:$0xff] %vm3788_vm13, %v3761_v32 }
 0x3ed   :  { %v4001_v56 = vpop.permute.xlu1 %4000  ;;  %v3834_v60 = vpop.permute.xlu0 %3833 }
 0x3ee   :  { %4033 = vst.msk [vmem:[#allocation6 + $0x50] sm:$0xff] %vm3788_vm13, %v4001_v56 }
 0x3ef   :  { %3866 = vst.msk [vmem:[#allocation6 + $0x60] sm:$0xff] %vm3861_vm14, %v3834_v60  ;;  %v3547_v20 = vld [vmem:[#allocation4 + $0xf0] ss:$2 sm:$0xff]  ;;  %v3563_v22 = vld [vmem:[#allocation4 + $0xf1] ss:$2 sm:$0xff] }
 0x3f0   :  { %v3572_v57 = vmax.f32 %v3547_v20, %v3563_v22  ;;  %v1148_v22 = vld [vmem:[#allocation2 + $0x138] sm:$0xff] }
 0x3f1   :  { %v4073_v42 = vpop.permute.xlu1 %4072  ;;  %v3690_v18 = vpop.permute.xlu0 %3689 }
 0x3f2   :  { %4105 = vst.msk [vmem:[#allocation6 + $0x50] sm:$0xff] %vm3861_vm14, %v4073_v42 }
 0x3f3   :  { %3721 = vst.msk [vmem:[#allocation6 + $0x78] sm:$0xff] %vm3715_vm12, %v3690_v18 }
 0x3f5   :  { %v3931_v52 = vpop.permute.xlu1 %3930  ;;  %v3763_v45 = vpop.permute.xlu0 %3762 }
 0x3f6   :  { %3962 = vst.msk [vmem:[#allocation6 + $0x68] sm:$0xff] %vm3715_vm12, %v3931_v52 }
 0x3f7   :  { %3794 = vst.msk [vmem:[#allocation6 + $0x78] sm:$0xff] %vm3788_vm13, %v3763_v45  ;;  %4034 = vst.msk [vmem:[#allocation6 + $0x68] sm:$0xff] %vm3788_vm13, %v7468_v50 }
 0x3f8   :  { %3867 = vst.msk [vmem:[#allocation6 + $0x78] sm:$0xff] %vm3861_vm14, %v7282_v24  ;;  %4106 = vst.msk [vmem:[#allocation6 + $0x68] sm:$0xff] %vm3861_vm14, %v7473_v19  ;;  %v4150_v24 = vld [vmem:[#allocation6 + $0x60] sm:$0xff] }
 0x3f9   :  { %v4148_v49 = vld [vmem:[#allocation6 + $0x50] sm:$0xff]  ;;  %v3321_v26 = vpop.f32.mrf.mxu1 }
 0x3fa   :  { %4324 = vmatprep.mubr.f32.mxu0 %v4148_v49  ;;  %v3399_v5 = vmul.f32 %v7442_v11, %v3321_v26  ;;  %v4206_v49 = vld [vmem:[%s7812_s7 + $0x100] sm:$0xff] }
 0x3fb   :  { %4325 = vmatmul.mubr.f32.gmra.mxu0 %v4147_v14  ;;  %v3323_v43 = vpop.f32.mrf.mxu1  ;;  %v3981_v26 = vld [vmem:[#allocation5 + $0x6f] sm:$0xff] }
 0x3fc   :  { %v3446_v17 = vadd.f32 %v7453_v12, %v3399_v5  ;;  %v3812_v5 = vld [vmem:[#allocation5 + $0x67] sm:$0xff] }
 0x3fd   :  { %v3326_v8 = vpop.f32.mrf.mxu1 }
 0x3fe   :  { %v3486_v50 = vmax.f32 %v3446_v17, 0.0  ;;  %v3400_v39 = vmul.f32 %v7442_v11, %v3326_v8  ;;  %v4053_v8 = vld [vmem:[#allocation5 + $0x70] sm:$0xff] }
 0x3ff   :  { %v4151_v10 = vld [vmem:[#allocation6 + $0x68] sm:$0xff]  ;;  %v3328_v19 = vpop.f32.mrf.mxu1  ;;  %v4153_v47 = vld [vmem:[#allocation6 + $0x78] sm:$0xff] }
 0x400   :  { %4329 = vmatprep.mubr.f32.mxu0 %v4151_v10  ;;  %3526 = vst.msk [vmem:[#allocation4 + $0x100] sm:$0xff] %vm95_vm10, %v3486_v50  ;;  %v3447_v9 = vadd.f32 %v7453_v12, %v3400_v39  ;;  %v1388_v50 = vld [vmem:[#allocation2 + $0x131] sm:$0xff] }
 0x401   :  { %4330 = vmatmul.mubr.f32.gmra.mxu0 %v4150_v24  ;;  %v1147_v19 = vld [vmem:[#allocation2 + $0x130] sm:$0xff] }
 0x402   :  { %4334 = vmatprep.mubr.f32.mxu0 %v4154_v21  ;;  %v3487_v28 = vmax.f32 %v3447_v9, 0.0 }
 0x404   :  { %3527 = vst.msk [vmem:[#allocation4 + $0x108] sm:$0xff] %vm95_vm10, %v3487_v28 }
 0x405   :  { %4335 = vmatmul.mubr.f32.gmra.mxu0 %v4153_v47  ;;  %v4118_v47 = vld [vmem:[#allocation5 + $0x39] sm:$0xff] }
 0x406   :  { %4130 = vst.msk [vmem:[#allocation6 + $0x70] sm:$0xff] %vm95_vm10, %v4118_v47 }
 0x40b   :  { %v3587_v29 = vld [vmem:[#allocation4 + $0x100] ss:$2 sm:$0xff]  ;;  %v3603_v7 = vld [vmem:[#allocation4 + $0x101] ss:$2 sm:$0xff] }
 0x40c   :  { %v3612_v51 = vmax.f32 %v3587_v29, %v3603_v7  ;;  %v1389_v7 = vld [vmem:[#allocation2 + $0x139] sm:$0xff] }
 0x40e   :  { %v3620_v44 = vmax.f32 %v3572_v57, %v3612_v51  ;;  %v4124_v57 = vld [vmem:[#allocation5 + $0x69] sm:$0xff] }
 0x40f   :  { %4136 = vst.msk [vmem:[#allocation6 + $0x100] sm:$0xff] %vm95_vm10, %v4124_v57  ;;  %v4152_v57 = vld [vmem:[#allocation6 + $0x70] sm:$0xff] }
 0x410   :  { %3629 = vst.msk [vmem:[#allocation5 + $0x58] sm:$0xf] %vm3622_vm11, %v3620_v44  ;;  %v4125_v44 = vld [vmem:[#allocation5 + $0x71] sm:$0xff] }
 0x411   :  { %4137 = vst.msk [vmem:[#allocation6 + $0x118] sm:$0xff] %vm95_vm10, %v4125_v44  ;;  %v4554_v44 = vld [vmem:[%s7815_s10 + $0x20] sm:$0xff] }
 0x415   :  { %v3331_v38 = vpop.f32.mrf.mxu1 }
 0x416   :  { %v3401_v6 = vmul.f32 %v7442_v11, %v3331_v38 }
 0x417   :  { %v3333_v1 = vpop.f32.mrf.mxu1  ;;  %v3906_v25 = vld [vmem:[#allocation5 + $0x51] sm:$0xff] }
 0x418   :  { %v3978_v58 = vld [vmem:[#allocation5 + $0x57] sm:$0xff]  ;;  %v3448_v4 = vadd.f32 %v7453_v12, %v3401_v6  ;;  %3938 = vrot.lane.b32.xlu1 %v3906_v25, %s5226_s28  ;;  %3770 = vrot.lane.b32.xlu0 %v3906_v25, %s5228_s15  ;;  %4133 = vst.msk [vmem:[#allocation6 + $0xb8] sm:$0xff] %vm95_vm10, %v3906_v25 }
 0x419   :  { %v4050_v15 = vld [vmem:[#allocation5 + $0x58] sm:$0xff]  ;;  %3653 = vst.msk [vmem:[#allocation6 + $0xf0] sm:$0xff] %vm95_vm10, %v3978_v58  ;;  %v3336_v63 = vpop.f32.mrf.mxu1 }
 0x41a   :  { %3895 = vst.msk [vmem:[#allocation6 + $0xe0] sm:$0xff] %vm95_vm10, %v4050_v15  ;;  %v3488_v41 = vmax.f32 %v3448_v4, 0.0 }
 0x41b   :  { %v3935_v30 = vpop.permute.xlu1 %3934  ;;  %v3767_v46 = vpop.permute.xlu0 %3766 }
 0x41c   :  { %3964 = vst.msk [vmem:[#allocation6 + $0x98] sm:$0xff] %vm3715_vm12, %v3935_v30  ;;  %v3338_v31 = vpop.f32.mrf.mxu1  ;;  %4010 = vrot.lane.b32.xlu1 %v3978_v58, %s5228_s15  ;;  %3843 = vrot.lane.b32.xlu0 %v3978_v58, %s5231_s17 }
 0x41d   :  { %3528 = vst.msk [vmem:[#allocation4 + $0x110] sm:$0xff] %vm95_vm10, %v3488_v41  ;;  %v1870_v31 = vld [vmem:[#allocation2 + $0x140] sm:$0xff] }
 0x41e   :  { %3796 = vst.msk [vmem:[#allocation6 + $0xa8] sm:$0xff] %vm3788_vm13, %v3767_v46 }
 0x41f   :  { %v4007_v55 = vpop.permute.xlu1 %4006  ;;  %v3840_v48 = vpop.permute.xlu0 %3839 }
 0x420   :  { %4036 = vst.msk [vmem:[#allocation6 + $0x98] sm:$0xff] %vm3788_vm13, %v4007_v55  ;;  %4082 = vrot.lane.b32.xlu1 %v4050_v15, %s5231_s17  ;;  %3699 = vrot.lane.b32.xlu0 %v4050_v15, %s5226_s28  ;;  %v4557_v55 = vld [vmem:[%s7815_s10 + $0x38] sm:$0xff] }
 0x421   :  { %3869 = vst.msk [vmem:[#allocation6 + $0xa8] sm:$0xff] %vm3861_vm14, %v3840_v48  ;;  %5158 = vmatpush3.msra.mxu1 %v4557_v55  ;;  %v1630_v48 = vld [vmem:[#allocation2 + $0x147] sm:$0xff] }
 0x422   :  { %5159 = vmatprep.subr.mxu1 %v7849_v3 }
 0x423   :  { %v4079_v13 = vpop.permute.xlu1 %4078  ;;  %v3696_v40 = vpop.permute.xlu0 %3695  ;;  %5160 = vmatpush3.msra.mxu1 %v4556_v35 }
 0x424   :  { %4108 = vst.msk [vmem:[#allocation6 + $0x98] sm:$0xff] %vm3861_vm14, %v4079_v13  ;;  %v3549_v54 = vld [vmem:[#allocation4 + $0x110] ss:$2 sm:$0xf]  ;;  %5161 = vmatprep.subr.mxu1 %v7849_v3 }
 0x425   :  { %3724 = vst.msk [vmem:[#allocation6 + $0xc0] sm:$0xff] %vm3715_vm12, %v3696_v40  ;;  %v3565_v27 = vld [vmem:[#allocation4 + $0x111] ss:$2 sm:$0xf]  ;;  %v1871_v40 = vld [vmem:[#allocation2 + $0x148] sm:$0xff] }
 0x426   :  { %v3573_v56 = vmax.f32 %v3549_v54, %v3565_v27  ;;  %v2111_v13 = vld [vmem:[#allocation2 + $0x141] sm:$0xff] }
 0x428   :  { %v4159_v20 = vld [vmem:[#allocation6 + $0xa8] sm:$0xff] }
 0x42b   :  { %v4157_v59 = vld [vmem:[#allocation6 + $0x98] sm:$0xff] }
 0x42c   :  { %4338 = vmatprep.mubr.f32.mxu0 %v4157_v59  ;;  %v2112_v59 = vld [vmem:[#allocation2 + $0x149] sm:$0xff] }
 0x42d   :  { %v3341_v34 = vpop.f32.mrf.mxu1  ;;  %4339 = vmatmul.mubr.f32.gmra.mxu0 %v4156_v23  ;;  %v4555_v23 = vld [vmem:[%s7815_s10 + $0x28] sm:$0xff] }
 0x42e   :  { %v3403_v62 = vmul.f32 %v7442_v11, %v3341_v34  ;;  %v4207_v11 = vld [vmem:[%s7812_s7 + $0x108] sm:$0xff]  ;;  %5162 = vmatpush3.msra.mxu1 %v4555_v23 }
 0x42f   :  { %v3343_v33 = vpop.f32.mrf.mxu1  ;;  %5135 = vmatprep.subr.mxu0 %v4207_v11  ;;  %v2352_v34 = vld [vmem:[#allocation2 + $0x14f] sm:$0xff]  ;;  %5163 = vmatprep.subr.mxu1 %v7849_v3 }
 0x430   :  { %v3450_v2 = vadd.f32 %v7453_v12, %v3403_v62  ;;  %5136 = vmatpush3.msra.mxu0 %v4207_v11  ;;  %v2593_v62 = vld [vmem:[#allocation2 + $0x150] sm:$0xff]  ;;  %5164 = vmatpush3.msra.mxu1 %v4554_v44 }
 0x431   :  { %5137 = vmatprep.subr.mxu0 %v4206_v49  ;;  %v2353_v33 = vld [vmem:[#allocation2 + $0x157] sm:$0xff]  ;;  %5165 = vmatprep.subr.mxu1 %v7849_v3 }
 0x432   :  { %v3490_v37 = vmax.f32 %v3450_v2, 0.0  ;;  %5138 = vmatpush3.msra.mxu0 %v4206_v49  ;;  %v2594_v2 = vld [vmem:[#allocation2 + $0x158] sm:$0xff] }
 0x433   :  { %5176 = vmatprep.subr.mxu0 %v7849_v3 }
 0x434   :  { %3530 = vst.msk [vmem:[#allocation4 + $0x120] sm:$0xff] %vm95_vm10, %v3490_v37 }
 0x43b   :  { %v3589_v16 = vld [vmem:[#allocation4 + $0x120] ss:$2 sm:$0xf]  ;;  %v3605_v32 = vld [vmem:[#allocation4 + $0x121] ss:$2 sm:$0xf] }
 0x43c   :  { %v3613_v60 = vmax.f32 %v3589_v16, %v3605_v32 }
 0x43e   :  { %v3621_v42 = vmax.f32 %v3573_v56, %v3613_v60 }
 0x440   :  { %3630 = vst.msk [vmem:[#allocation5 + $0x60] sm:$0xf] %vm3622_vm11, %v3621_v42  ;;  %v2595_v42 = vld [vmem:[#allocation2 + $0x160] sm:$0xff] }
 0x447   :  { %v3907_v18 = vld [vmem:[#allocation5 + $0x59] sm:$0xff]  ;;  %v3908_v45 = vld [vmem:[#allocation5 + $0x61] sm:$0xff] }
 0x448   :  { %v3979_v12 = vld [vmem:[#allocation5 + $0x5f] sm:$0xff]  ;;  %3940 = vrot.lane.b32.xlu1 %v3907_v18, %s5226_s28  ;;  %3772 = vrot.lane.b32.xlu0 %v3907_v18, %s5228_s15  ;;  %4134 = vst.msk [vmem:[#allocation6 + $0xd0] sm:$0xff] %vm95_vm10, %v3907_v18  ;;  %4135 = vst.msk [vmem:[#allocation6 + $0xe8] sm:$0xff] %vm95_vm10, %v3908_v45 }
 0x449   :  { %v4051_v52 = vld [vmem:[#allocation5 + $0x60] sm:$0xff]  ;;  %3654 = vst.msk [vmem:[#allocation6 + $0x108] sm:$0xff] %vm95_vm10, %v3979_v12 }
 0x44a   :  { %3896 = vst.msk [vmem:[#allocation6 + $0xf8] sm:$0xff] %vm95_vm10, %v4051_v52 }
 0x44c   :  { %4012 = vrot.lane.b32.xlu1 %v3979_v12, %s5228_s15  ;;  %3845 = vrot.lane.b32.xlu0 %v3979_v12, %s5231_s17 }
 0x450   :  { %4084 = vrot.lane.b32.xlu1 %v4051_v52, %s5231_s17  ;;  %3701 = vrot.lane.b32.xlu0 %v4051_v52, %s5226_s28 }
 0x453   :  { %v3937_v14 = vpop.permute.xlu1 %3936  ;;  %v3769_v43 = vpop.permute.xlu0 %3768 }
 0x454   :  { %3942 = vrot.lane.b32.xlu1 %v3908_v45, %s5226_s28  ;;  %3774 = vrot.lane.b32.xlu0 %v3908_v45, %s5228_s15  ;;  %3965 = vst.msk [vmem:[#allocation6 + $0xb0] sm:$0xff] %vm3715_vm12, %v3937_v14 }
 0x455   :  { %3797 = vst.msk [vmem:[#allocation6 + $0xc0] sm:$0xff] %vm3788_vm13, %v3769_v43  ;;  %v2354_v43 = vld [vmem:[#allocation2 + $0x15f] sm:$0xff] }
 0x456   :  { %v4965_v10 = vpop.f32.mrf.mxu0 }
 0x457   :  { %v4009_v17 = vpop.permute.xlu1 %4008  ;;  %v3842_v21 = vpop.permute.xlu0 %3841 }
 0x458   :  { %4016 = vrot.lane.b32.xlu1 %v3981_v26, %s5228_s15  ;;  %3847 = vrot.lane.b32.xlu0 %v3812_v5, %s5231_s17  ;;  %4037 = vst.msk [vmem:[#allocation6 + $0xb0] sm:$0xff] %vm3788_vm13, %v4009_v17  ;;  %v4966_v39 = vpop.f32.mrf.mxu0 }
 0x459   :  { %3870 = vst.msk [vmem:[#allocation6 + $0xc0] sm:$0xff] %vm3861_vm14, %v3842_v21 }
 0x45b   :  { %v4081_v24 = vpop.permute.xlu1 %4080  ;;  %v3698_v9 = vpop.permute.xlu0 %3697 }
 0x45c   :  { %4088 = vrot.lane.b32.xlu1 %v4053_v8, %s5231_s17  ;;  %1505 = vrot.lane.b32.xlu0 %v1388_v50, %s5226_s28  ;;  %4109 = vst.msk [vmem:[#allocation6 + $0xb0] sm:$0xff] %vm3861_vm14, %v4081_v24 }
 0x45d   :  { %3725 = vst.msk [vmem:[#allocation6 + $0xd8] sm:$0xff] %vm3715_vm12, %v3698_v9 }
 0x460   :  { %1264 = vrot.lane.b32.xlu1 %v1147_v19, %s5225_s23  ;;  %v4162_v63 = vld [vmem:[#allocation6 + $0xc0] sm:$0xff]  ;;  %1987 = vrot.lane.b32.xlu0 %v1870_v31, %s5228_s15 }
 0x463   :  { %v4160_v28 = vld [vmem:[#allocation6 + $0xb0] sm:$0xff] }
 0x464   :  { %1746 = vrot.lane.b32.xlu1 %v6473_v61, %s5227_s25  ;;  %4342 = vmatprep.mubr.f32.mxu0 %v4160_v28  ;;  %v4140_v28 = vld [vmem:[#allocation6 + $0x10] sm:$0xff] }
 0x465   :  { %4343 = vmatmul.mubr.f32.gmra.mxu0 %v4159_v20  ;;  %2228 = vrot.lane.b32.xlu0 %v2111_v13, %s5230_s18 }
 0x468   :  { %1266 = vrot.lane.b32.xlu1 %v1148_v22, %s5225_s23  ;;  %v4968_v29 = vpop.f32.mrf.mxu0  ;;  %v4143_v22 = vld [vmem:[#allocation6 + $0x28] sm:$0xff] }
 0x469   :  { %2469 = vrot.lane.b32.xlu0 %v2352_v34, %s5231_s17 }
 0x46a   :  { %v4969_v51 = vpop.f32.mrf.mxu0 }
 0x46b   :  { %v7647_v38 = vadd.f32 %v4969_v51, %v4968_v29  ;;  %v4146_v29 = vld [vmem:[#allocation6 + $0x40] sm:$0xff]  ;;  %v4149_v51 = vld [vmem:[#allocation6 + $0x58] sm:$0xff] }
 0x46c   :  { %1507 = vrot.lane.b32.xlu1 %v1389_v7, %s5226_s28 }
 0x46d   :  { %2710 = vrot.lane.b32.xlu0 %v2593_v62, %s5229_s20 }
 0x470   :  { %1748 = vrot.lane.b32.xlu1 %v1630_v48, %s5227_s25 }
 0x471   :  { %1268 = vrot.lane.b32.xlu0 %v1870_v31, %s5225_s23  ;;  %v4552_v31 = vld [vmem:[%s7815_s10 + $0x10] sm:$0xff]  ;;  %s5202_s23 = scalar_lea.vmem %s4733_s16, 32 }
 0x472   :  { %p5203_p0 = scmp.ne.s32.totalorder %s4733_s16, %s5202_s23  ;;  %p5208_p2 = scmp.lt.s32.totalorder %s5202_s23, %s5202_s23 }
 0x474   :  { %1989 = vrot.lane.b32.xlu1 %v1871_v40, %s5228_s15  ;;  %p5209_p3 = por %p5208_p2, %p5207_p1 }
 0x475   :  { %1509 = vrot.lane.b32.xlu0 %v2111_v13, %s5226_s28  ;;  %v4551_v13 = vld [vmem:[%s7815_s10 + $0x8] sm:$0xff] }
 0x476   :  { %p5210_p4 = pnand %p5209_p3, %p5203_p0 }
 0x478   :  { %2230 = vrot.lane.b32.xlu1 %v2112_v59, %s5230_s18 }
 0x479   :  { %1750 = vrot.lane.b32.xlu0 %v2352_v34, %s5227_s25  ;;  %v2952_v34 = vld [vmem:[#allocation3 + $0x258] sm:$0xff] }
 0x47a   :  { %4844 = vmatprep.mubr.msk.f32.mxu1 %vm48_vm2, %v2952_v34 }
 0x47c   :  { %2471 = vrot.lane.b32.xlu1 %v2353_v33, %s5231_s17 }
 0x47d   :  { %1991 = vrot.lane.b32.xlu0 %v2593_v62, %s5228_s15 }
 0x480   :  { %2712 = vrot.lane.b32.xlu1 %v2594_v2, %s5229_s20 }
 0x481   :  { %2473 = vrot.lane.b32.xlu0 %v2354_v43, %s5231_s17 }
 0x484   :  { %2232 = vrot.lane.b32.xlu1 %v2113_v0, %s5230_s18 }
 0x488   :  { %2714 = vrot.lane.b32.xlu1 %v2595_v42, %s5229_s20 }
 0x48a   :  { %v3939_v61 = vpop.permute.xlu1 %3938  ;;  %v3771_v6 = vpop.permute.xlu0 %3770 }
 0x48b   :  { %3966 = vst.msk [vmem:[#allocation6 + $0xc8] sm:$0xff] %vm3715_vm12, %v3939_v61  ;;  %v4553_v61 = vld [vmem:[%s7815_s10 + $0x18] sm:$0xff] }
 0x48c   :  { %3798 = vst.msk [vmem:[#allocation6 + $0xd8] sm:$0xff] %vm3788_vm13, %v3771_v6  ;;  %v4155_v6 = vld [vmem:[#allocation6 + $0x88] sm:$0xff]  ;;  %5166 = vmatpush3.msra.mxu1 %v4553_v61 }
 0x48d   :  { %5167 = vmatprep.subr.mxu1 %v7849_v3 }
 0x48e   :  { %v4011_v1 = vpop.permute.xlu1 %4010  ;;  %v3844_v25 = vpop.permute.xlu0 %3843  ;;  %5168 = vmatpush3.msra.mxu1 %v4552_v31 }
 0x48f   :  { %4038 = vst.msk [vmem:[#allocation6 + $0xc8] sm:$0xff] %vm3788_vm13, %v4011_v1  ;;  %v4158_v1 = vld [vmem:[#allocation6 + $0xa0] sm:$0xff]  ;;  %5169 = vmatprep.subr.mxu1 %v7849_v3 }
 0x490   :  { %3871 = vst.msk [vmem:[#allocation6 + $0xd8] sm:$0xff] %vm3861_vm14, %v3844_v25  ;;  %v4161_v25 = vld [vmem:[#allocation6 + $0xb8] sm:$0xff]  ;;  %5170 = vmatpush3.msra.mxu1 %v4551_v13 }
 0x491   :  { %5171 = vmatprep.subr.mxu1 %v7849_v3 }
 0x492   :  { %v4083_v58 = vpop.permute.xlu1 %4082  ;;  %v3700_v15 = vpop.permute.xlu0 %3699 }
 0x493   :  { %4110 = vst.msk [vmem:[#allocation6 + $0xc8] sm:$0xff] %vm3861_vm14, %v4083_v58  ;;  %v4164_v58 = vld [vmem:[#allocation6 + $0xd0] sm:$0xff] }
 0x494   :  { %3726 = vst.msk [vmem:[#allocation6 + $0xf0] sm:$0xff] %vm3715_vm12, %v3700_v15  ;;  %v4170_v15 = vld [vmem:[#allocation6 + $0x100] sm:$0xff] }
 0x497   :  { %v4165_v21 = vld [vmem:[#allocation6 + $0xd8] sm:$0xff] }
 0x49a   :  { %v4163_v4 = vld [vmem:[#allocation6 + $0xc8] sm:$0xff] }
 0x49b   :  { %4347 = vmatprep.mubr.f32.mxu0 %v4163_v4  ;;  %v4167_v4 = vld [vmem:[#allocation6 + $0xe8] sm:$0xff] }
 0x49c   :  { %4348 = vmatmul.mubr.f32.gmra.mxu0 %v4162_v63  ;;  %v4173_v63 = vld [vmem:[#allocation6 + $0x118] sm:$0xff] }
 0x4a0   :  { %v4971_v41 = vpop.f32.mrf.mxu0 }
 0x4a2   :  { %v4972_v30 = vpop.f32.mrf.mxu0 }
 0x4a3   :  { %v7656_v46 = vadd.f32 %v4972_v30, %v4971_v41 }
 0x4ba   :  { %v3941_v37 = vpop.permute.xlu1 %3940  ;;  %v3773_v54 = vpop.permute.xlu0 %3772 }
 0x4bb   :  { %3967 = vst.msk [vmem:[#allocation6 + $0xe0] sm:$0xff] %vm3715_vm12, %v3941_v37  ;;  %v4974_v27 = vpop.f32.mrf.mxu0 }
 0x4bc   :  { %3799 = vst.msk [vmem:[#allocation6 + $0xf0] sm:$0xff] %vm3788_vm13, %v3773_v54 }
 0x4bd   :  { %v4975_v16 = vpop.f32.mrf.mxu0 }
 0x4be   :  { %v4013_v32 = vpop.permute.xlu1 %4012  ;;  %v7683_v56 = vadd.f32 %v4975_v16, %v4974_v27  ;;  %v3846_v60 = vpop.permute.xlu0 %3845  ;;  %v4550_v16 = vld [vmem:[%s7815_s10] sm:$0xff] }
 0x4bf   :  { %4039 = vst.msk [vmem:[#allocation6 + $0xe0] sm:$0xff] %vm3788_vm13, %v4013_v32  ;;  %v2835_v32 = vld [vmem:[#allocation2 + $0x159] sm:$0xff]  ;;  %5172 = vmatpush3.msra.mxu1 %v4550_v16 }
 0x4c0   :  { %3872 = vst.msk [vmem:[#allocation6 + $0xf0] sm:$0xff] %vm3861_vm14, %v3846_v60  ;;  %v2836_v60 = vld [vmem:[#allocation2 + $0x161] sm:$0xff] }
 0x4c1   :  { %v4977_v11 = vpop.f32.mrf.mxu0  ;;  %2875 = vst.msk [vmem:[#allocation3 + $0x268] sm:$0xff] %vm48_vm2, %v2835_v32  ;;  %2876 = vst.msk [vmem:[#allocation3 + $0x278] sm:$0xff] %vm48_vm2, %v2836_v60 }
 0x4c2   :  { %v4085_v18 = vpop.permute.xlu1 %4084  ;;  %v3702_v12 = vpop.permute.xlu0 %3701 }
 0x4c3   :  { %4111 = vst.msk [vmem:[#allocation6 + $0xe0] sm:$0xff] %vm3861_vm14, %v4085_v18  ;;  %v4978_v52 = vpop.f32.mrf.mxu0 }
 0x4c4   :  { %3727 = vst.msk [vmem:[#allocation6 + $0x108] sm:$0xff] %vm3715_vm12, %v3702_v12  ;;  %v7693_v45 = vadd.f32 %v4978_v52, %v4977_v11 }
 0x4c5   :  { %v4980_v14 = vpop.f32.mrf.mxu0 }
 0x4c6   :  { %v3943_v49 = vpop.permute.xlu1 %3942  ;;  %v3775_v26 = vpop.permute.xlu0 %3774 }
 0x4c7   :  { %3968 = vst.msk [vmem:[#allocation6 + $0xf8] sm:$0xff] %vm3715_vm12, %v3943_v49  ;;  %v4981_v5 = vpop.f32.mrf.mxu0  ;;  %v4168_v39 = vld [vmem:[#allocation6 + $0xf0] sm:$0xff] }
 0x4c8   :  { %4040 = vst.msk [vmem:[#allocation6 + $0xf8] sm:$0xff] %vm3788_vm13, %v7490_v36  ;;  %3800 = vst.msk [vmem:[#allocation6 + $0x108] sm:$0xff] %vm3788_vm13, %v3775_v26  ;;  %v2954_v52 = vld [vmem:[#allocation3 + $0x268] sm:$0xff]  ;;  %v2956_v14 = vld [vmem:[#allocation3 + $0x278] sm:$0xff] }
 0x4c9   :  { %4112 = vst.msk [vmem:[#allocation6 + $0xf8] sm:$0xff] %vm3861_vm14, %v7495_v53 }
 0x4ca   :  { %v4017_v17 = vpop.permute.xlu1 %4016  ;;  %v4166_v8 = vld [vmem:[#allocation6 + $0xe0] sm:$0xff]  ;;  %v3848_v10 = vpop.permute.xlu0 %3847 }
 0x4cb   :  { %4041 = vst.msk [vmem:[#allocation6 + $0x110] sm:$0xff] %vm3788_vm13, %v4017_v17  ;;  %4352 = vmatprep.mubr.f32.mxu0 %v4166_v8 }
 0x4cc   :  { %3873 = vst.msk [vmem:[#allocation6 + $0x108] sm:$0xff] %vm3861_vm14, %v3848_v10  ;;  %4353 = vmatmul.mubr.f32.gmra.mxu0 %v4165_v21  ;;  %v4643_v10 = vld [vmem:[%s7817_s12 + $0x18] sm:$0xff] }
 0x4ce   :  { %v4089_v36 = vpop.permute.xlu1 %4088  ;;  %v1506_v53 = vpop.permute.xlu0 %1505 }
 0x4cf   :  { %4113 = vst.msk [vmem:[#allocation6 + $0x110] sm:$0xff] %vm3861_vm14, %v4089_v36 }
 0x4d0   :  { %v4169_v50 = vld [vmem:[#allocation6 + $0xf8] sm:$0xff] }
 0x4d1   :  { %4357 = vmatprep.mubr.f32.mxu0 %v4169_v50 }
 0x4d2   :  { %v1265_v24 = vpop.permute.xlu1 %1264  ;;  %4358 = vmatmul.mubr.f32.gmra.mxu0 %v4168_v39  ;;  %v1988_v55 = vpop.permute.xlu0 %1987 }
 0x4d3   :  { %1348 = vst.msk [vmem:[#allocation3 + $0x250] sm:$0xff] %vm1310_vm3, %v1265_v24  ;;  %v4171_v19 = vld [vmem:[#allocation6 + $0x108] sm:$0xff]  ;;  %v4642_v24 = vld [vmem:[%s7817_s12 + $0x10] sm:$0xff] }
 0x4d4   :  { %1589 = vst.msk [vmem:[#allocation3 + $0x250] sm:$0xff] %vm1551_vm4, %v1506_v53  ;;  %v4641_v53 = vld [vmem:[%s7817_s12 + $0x8] sm:$0xff] }
 0x4d6   :  { %v1747_v9 = vpop.permute.xlu1 %1746  ;;  %v4172_v47 = vld [vmem:[#allocation6 + $0x110] sm:$0xff] }
 0x4d7   :  { %1830 = vst.msk [vmem:[#allocation3 + $0x250] sm:$0xff] %vm1792_vm5, %v1747_v9  ;;  %4362 = vmatprep.mubr.f32.mxu0 %v4172_v47  ;;  %v2229_v48 = vpop.permute.xlu0 %2228 }
 0x4d8   :  { %4363 = vmatmul.mubr.f32.gmra.mxu0 %v4171_v19  ;;  %2071 = vst.msk [vmem:[#allocation3 + $0x250] sm:$0xff] %vm2033_vm6, %v1988_v55 }
 0x4d9   :  { %5139 = vmatprep.mubr.msk.f32.mxu0 %vm95_vm10, %v4140_v28  ;;  %2312 = vst.msk [vmem:[#allocation3 + $0x250] sm:$0xff] %vm2274_vm7, %v2229_v48 }
 0x4da   :  { %v1267_v20 = vpop.permute.xlu1 %1266 }
 0x4db   :  { %1349 = vst.msk [vmem:[#allocation3 + $0x260] sm:$0xff] %vm1310_vm3, %v1267_v20  ;;  %v2470_v40 = vpop.permute.xlu0 %2469  ;;  %v4861_v20 = vld [vmem:[%s7813_s8] ss:$0 sm:$0xff] }
 0x4dc   :  { %5140 = vmatmul.mubr.msk.f32.vlgmr.msra.gmra.mxu0 %vm95_vm10, %v4143_v22  ;;  %2553 = vst.msk [vmem:[#allocation3 + $0x250] sm:$0xff] %vm2515_vm8, %v2470_v40 }
 0x4dd   :  { %5142 = vmatprep.mubr.msk.f32.mxu0 %vm95_vm10, %v4146_v29  ;;  %5177 = vmatpush3.msra.mxu0 %v4643_v10  ;;  %v4640_v29 = vld [vmem:[%s7817_s12] sm:$0xff] }
 0x4de   :  { %v1508_v7 = vpop.permute.xlu1 %1507  ;;  %5178 = vmatprep.subr.mxu0 %v7849_v3 }
 0x4df   :  { %1590 = vst.msk [vmem:[#allocation3 + $0x260] sm:$0xff] %vm1551_vm4, %v1508_v7  ;;  %v2711_v0 = vpop.permute.xlu0 %2710  ;;  %5179 = vmatpush3.msra.mxu0 %v4642_v24 }
 0x4e0   :  { %5143 = vmatmul.mubr.msk.f32.gmra.mxu0 %vm95_vm10, %v4149_v51  ;;  %2794 = vst.msk [vmem:[#allocation3 + $0x250] sm:$0xff] %vm2756_vm9, %v2711_v0  ;;  %5180 = vmatprep.subr.mxu0 %v7849_v3 }
 0x4e1   :  { %5145 = vmatprep.mubr.msk.f32.mxu0 %vm95_vm10, %v4152_v57  ;;  %5181 = vmatpush3.msra.mxu0 %v4641_v53 }
 0x4e2   :  { %v1749_v35 = vpop.permute.xlu1 %1748  ;;  %5182 = vmatprep.subr.mxu0 %v7849_v3 }
 0x4e3   :  { %1831 = vst.msk [vmem:[#allocation3 + $0x260] sm:$0xff] %vm1792_vm5, %v1749_v35  ;;  %v1269_v59 = vpop.permute.xlu0 %1268  ;;  %5183 = vmatpush3.msra.mxu0 %v4640_v29 }
 0x4e4   :  { %5146 = vmatmul.mubr.msk.f32.gmra.mxu0 %vm95_vm10, %v4155_v6  ;;  %1350 = vst.msk [vmem:[#allocation3 + $0x270] sm:$0xff] %vm1310_vm3, %v1269_v59 }
 0x4e5   :  { %5148 = vmatprep.mubr.msk.f32.mxu0 %vm95_vm10, %v4158_v1 }
 0x4e6   :  { %v1990_v23 = vpop.permute.xlu1 %1989 }
 0x4e7   :  { %2072 = vst.msk [vmem:[#allocation3 + $0x260] sm:$0xff] %vm2033_vm6, %v1990_v23  ;;  %v1510_v33 = vpop.permute.xlu0 %1509  ;;  %v2951_v37 = vld [vmem:[#allocation3 + $0x250] sm:$0xff] }
 0x4e8   :  { %5149 = vmatmul.mubr.msk.f32.gmra.mxu0 %vm95_vm10, %v4161_v25  ;;  %1591 = vst.msk [vmem:[#allocation3 + $0x270] sm:$0xff] %vm1551_vm4, %v1510_v33  ;;  %3345 = vmatmul.mubr.f32.gmra.mxu1 %v2951_v37 }
 0x4e9   :  { %5151 = vmatprep.mubr.msk.f32.mxu0 %vm95_vm10, %v4164_v58  ;;  %4845 = vmatprep.mubr.msk.f32.mxu1 %vm48_vm2, %v2954_v52 }
 0x4ea   :  { %v2231_v62 = vpop.permute.xlu1 %2230 }
 0x4eb   :  { %2313 = vst.msk [vmem:[#allocation3 + $0x260] sm:$0xff] %vm2274_vm7, %v2231_v62  ;;  %v1751_v54 = vpop.permute.xlu0 %1750 }
 0x4ec   :  { %5152 = vmatmul.mubr.msk.f32.gmra.mxu0 %vm95_vm10, %v4167_v4  ;;  %1832 = vst.msk [vmem:[#allocation3 + $0x270] sm:$0xff] %vm1792_vm5, %v1751_v54 }
 0x4ed   :  { %5154 = vmatprep.mubr.msk.f32.mxu0 %vm95_vm10, %v4170_v15  ;;  %v4983_v41 = vpop.f32.mrf.mxu0 }
 0x4ee   :  { %v2472_v2 = vpop.permute.xlu1 %2471 }
 0x4ef   :  { %v4984_v30 = vpop.f32.mrf.mxu0  ;;  %2554 = vst.msk [vmem:[#allocation3 + $0x260] sm:$0xff] %vm2515_vm8, %v2472_v2  ;;  %v1992_v42 = vpop.permute.xlu0 %1991 }
 0x4f0   :  { %5155 = vmatmul.mubr.msk.f32.gmra.mxu0 %vm95_vm10, %v4173_v63  ;;  %2073 = vst.msk [vmem:[#allocation3 + $0x270] sm:$0xff] %vm2033_vm6, %v1992_v42 }
 0x4f1   :  { %5184 = vmatprep.mubr.msk.f32.mxu0 %vm5232_vm15, %v7849_v3 }
 0x4f2   :  { %v2713_v27 = vpop.permute.xlu1 %2712 }
 0x4f3   :  { %2795 = vst.msk [vmem:[#allocation3 + $0x260] sm:$0xff] %vm2756_vm9, %v2713_v27  ;;  %v2474_v18 = vpop.permute.xlu0 %2473 }
 0x4f6   :  { %v2233_v11 = vpop.permute.xlu1 %2232 }
 0x4f7   :  { %2314 = vst.msk [vmem:[#allocation3 + $0x270] sm:$0xff] %vm2274_vm7, %v2233_v11 }
 0x4f8   :  { %2555 = vst.msk [vmem:[#allocation3 + $0x270] sm:$0xff] %vm2515_vm8, %v2474_v18 }
 0x4fa   :  { %v2715_v12 = vpop.permute.xlu1 %2714  ;;  %v2953_v49 = vld [vmem:[#allocation3 + $0x260] sm:$0xff] }
 0x4fb   :  { %2796 = vst.msk [vmem:[#allocation3 + $0x270] sm:$0xff] %vm2756_vm9, %v2715_v12  ;;  %3350 = vmatmul.mubr.f32.gmra.mxu1 %v2953_v49 }
 0x4fc   :  { %4846 = vmatprep.mubr.msk.f32.mxu1 %vm48_vm2, %v2956_v14  ;;  %vm4565_vm2 = vcmask 523264  }
 0x502   :  { %v2955_v26 = vld [vmem:[#allocation3 + $0x270] sm:$0xff] }
 0x503   :  { %3355 = vmatmul.mubr.f32.gmra.mxu1 %v2955_v26 }
 0x504   :  { %5173 = vmatprep.mubr.msk.f32.mxu1 %vm5232_vm15, %v7849_v3  ;;  %v4862_v3 = vld [vmem:[%s7814_s9] ss:$0 sm:$0xff] }
 0x525   :  { %v4986_v5 = vpop.f32.mrf.mxu0 }
 0x527   :  { %v4987_v43 = vpop.f32.mrf.mxu0 }
 0x528   :  { %v4988_v15 = vadd.f32 %v4987_v43, %v4986_v5 }
 0x55c   :  { %v4989_v17 = vpop.f32.mrf.mxu0 }
 0x55e   :  { %v4990_v8 = vpop.f32.mrf.mxu0 }
 0x58c   :  { %v4992_v21 = vpop.f32.mrf.mxu0 }
 0x58e   :  { %v4993_v36 = vpop.f32.mrf.mxu0 }
 0x58f   :  { %v4994_v40 = vadd.f32 %v4993_v36, %v4992_v21 }
 0x592   :  { %v4995_v50 = vpop.f32.mrf.mxu0 }
 0x594   :  { %v4996_v39 = vpop.f32.mrf.mxu0 }
 0x595   :  { %v4997_v32 = vadd.f32 %v4996_v39, %v4995_v50 }
 0x598   :  { %v4998_v19 = vpop.f32.mrf.mxu0 }
 0x59a   :  { %v4999_v9 = vpop.f32.mrf.mxu0 }
 0x59c   :  { %v5141_v47 = vpop.f32.mrf.mxu0 }
 0x59d   :  { %v4438_v28 = vadd.f32 %v5141_v47, %v7647_v38 }
 0x59e   :  { %v4433_v22 = vpop.f32.mrf.mxu0 }
 0x59f   :  { %v4495_v57 = vmul.f32 %v4861_v20, %v4438_v28 }
 0x5a0   :  { %v5144_v7 = vpop.f32.mrf.mxu0 }
 0x5a1   :  { %v4448_v51 = vadd.f32 %v5144_v7, %v7683_v56  ;;  %v4510_v1 = vadd.f32 %v4862_v3, %v4495_v57 }
 0x5a2   :  { %v4442_v44 = vpop.f32.mrf.mxu0 }
 0x5a3   :  { %v4497_v38 = vmul.f32 %v4861_v20, %v4448_v51  ;;  %v4443_v61 = vadd.f32 %v7656_v46, %v4442_v44  ;;  %v4518_v31 = vmax.f32 %v4510_v1, 0.0  ;;  %v4991_v46 = vadd.f32 %v4990_v8, %v4989_v17 }
 0x5a4   :  { %v5147_v6 = vpop.f32.mrf.mxu0 }
 0x5a5   :  { %v4496_v25 = vmul.f32 %v4861_v20, %v4443_v61  ;;  %v4512_v4 = vadd.f32 %v4862_v3, %v4497_v38 }
 0x5a6   :  { %v4452_v58 = vpop.f32.mrf.mxu0 }
 0x5a7   :  { %v4511_v63 = vadd.f32 %v4862_v3, %v4496_v25  ;;  %v4453_v41 = vadd.f32 %v7693_v45, %v4452_v58  ;;  %v4520_v35 = vmax.f32 %v4512_v4, 0.0 }
 0x5a8   :  { %v5150_v30 = vpop.f32.mrf.mxu0  ;;  %v3346_v38 = vpop.f32.mrf.mxu1 }
 0x5a9   :  { %v4519_v56 = vmax.f32 %v4511_v63, 0.0  ;;  %v4498_v55 = vmul.f32 %v4861_v20, %v4453_v41  ;;  %v4466_v48 = vadd.f32 %v5150_v30, %v4988_v15  ;;  %v4863_v15 = vld [vmem:[%s7816_s11] ss:$0 sm:$0xff] }
 0x5aa   :  { %v4461_v13 = vpop.f32.mrf.mxu0  ;;  %v3348_v61 = vpop.f32.mrf.mxu1 }
 0x5ab   :  { %v4526_v0 = vadd.f32 %v4519_v56, %v4518_v31  ;;  %v4513_v23 = vadd.f32 %v4862_v3, %v4498_v55  ;;  %v4499_v33 = vmul.f32 %v4861_v20, %v4466_v48  ;;  %v4865_v31 = vld [vmem:[%s7818_s13] ss:$0 sm:$0xff] }
 0x5ac   :  { %v5153_v34 = vpop.f32.mrf.mxu0 }
 0x5ad   :  { %v4521_v59 = vmax.f32 %v4513_v23, 0.0  ;;  %v4527_v62 = vadd.f32 %v4526_v0, %v4520_v35  ;;  %v4476_v2 = vadd.f32 %v5153_v34, %v4994_v40  ;;  %v4514_v42 = vadd.f32 %v4862_v3, %v4499_v33 }
 0x5ae   :  { %v4470_v37 = vpop.f32.mrf.mxu0 }
 0x5af   :  { %v4528_v54 = vadd.f32 %v4527_v62, %v4521_v59  ;;  %v4501_v45 = vmul.f32 %v4861_v20, %v4476_v2  ;;  %v4471_v27 = vadd.f32 %v4991_v46, %v4470_v37  ;;  %v4522_v26 = vmax.f32 %v4514_v42, 0.0 }
 0x5b0   :  { %v5156_v16 = vpop.f32.mrf.mxu0 }
 0x5b1   :  { %v4530_v60 = vsel %vm4529_vm1, %v4528_v54, 0.0  ;;  %v4500_v11 = vmul.f32 %v4861_v20, %v4471_v27  ;;  %v4516_v52 = vadd.f32 %v4862_v3, %v4501_v45 }
 0x5b2   :  { %v4531_v18 = vrot.slane %v4530_v60, 4  ;;  %v4480_v12 = vpop.f32.mrf.mxu0 }
 0x5b3   :  { %v4515_v49 = vadd.f32 %v4862_v3, %v4500_v11  ;;  %v4481_v14 = vadd.f32 %v4997_v32, %v4480_v12  ;;  %v4524_v8 = vmax.f32 %v4516_v52, 0.0 }
 0x5b4   :  { %v4532_v17 = vadd.f32 %v4531_v18, %v4530_v60 }
 0x5b5   :  { %v4523_v5 = vmax.f32 %v4515_v49, 0.0  ;;  %v4502_v43 = vmul.f32 %v4861_v20, %v4481_v14 }
 0x5b6   :  { %v4533_v53 = vrot.slane %v4532_v17, 2 }
 0x5b7   :  { %v4538_v10 = vadd.f32 %v4523_v5, %v4522_v26  ;;  %v4517_v21 = vadd.f32 %v4862_v3, %v4502_v43 }
 0x5b8   :  { %v4534_v19 = vadd.f32 %v4533_v53, %v4532_v17 }
 0x5b9   :  { %v4525_v36 = vmax.f32 %v4517_v21, 0.0  ;;  %v4539_v24 = vadd.f32 %v4538_v10, %v4524_v8 }
 0x5ba   :  { %v4535_v28 = vrot.slane %v4534_v19, 1 }
 0x5bb   :  { %v4540_v50 = vadd.f32 %v4539_v24, %v4525_v36  ;;  %v3351_v6 = vpop.f32.mrf.mxu1 }
 0x5bc   :  { %v4536_v57 = vadd.f32 %v4535_v28, %v4534_v19 }
 0x5bd   :  { %v4541_v39 = vsel %vm4529_vm1, %v4540_v50, 0.0  ;;  %v3353_v1 = vpop.f32.mrf.mxu1 }
 0x5be   :  { %v4542_v9 = vrot.slane %v4541_v39, 4  ;;  %v4537_v20 = vmul.f32 0.0625, %v4536_v57 }
 0x5c0   :  { %v4543_v47 = vadd.f32 %v4542_v9, %v4541_v39 }
 0x5c2   :  { %v4544_v22 = vrot.slane %v4543_v47, 2 }
 0x5c3   :  { %v3356_v25 = vpop.f32.mrf.mxu1 }
 0x5c4   :  { %v4545_v29 = vadd.f32 %v4544_v22, %v4543_v47 }
 0x5c5   :  { %v3358_v58 = vpop.f32.mrf.mxu1 }
 0x5c6   :  { %v4546_v7 = vrot.slane %v4545_v29, 1 }
 0x5c8   :  { %v4547_v51 = vadd.f32 %v4546_v7, %v4545_v29 }
 0x5ca   :  { %v4548_v44 = vmul.f32 0.0625, %v4547_v51 }
 0x5cc   :  { %v4549_v3 = vsel %vm371_vm0, %v4537_v20, %v4548_v44  ;;  %vm4724_vm0 = vcmask 9216  }
 0x5cd   :  { %5174 = vmatmul.mubr.msk.f32.vlgmr.msra.gmra.mxu1 %vm4565_vm2, %v4549_v3 }
 0x68d   :  { %v4635_v4 = vpop.f32.mrf.mxu1 }
 0x68e   :  { %v4636_v63 = vadd.f32 %v4863_v15, %v4635_v4 }
 0x68f   :  { %v5175_v41 = vpop.f32.mrf.mxu1 }
 0x690   :  { %v4639_v30 = vmax.f32 %v4636_v63, 0.0 }
 0x692   :  { %5185 = vmatmul.mubr.msk.f32.vlgmr.msra.gmra.mxu0 %vm95_vm10, %v4639_v30 }
 0x752   :  { %v4720_v56 = vpop.f32.mrf.mxu0 }
 0x753   :  { %v4721_v55 = vadd.f32 %v4865_v31, %v4720_v56 }
 0x754   :  { %v5186_v48 = vpop.f32.mrf.mxu0 }
 0x755   :  { %4725 = vst.msk [vmem:[#allocation7] sm:$0x3] %vm4724_vm0, %v4721_v55 }
 0x756   :  { %5213 = shalt.err (!%p5210_p4)
}
 0x757   :  { %4735 = dma.vmem_to_hbm [thread:$0]  %s4733_s16, 32, %s7819_s14, [#allocation8]  }
 0x758   :  { %5222 = dma.done.wait [#allocation8], 32  }
 0x759   :  { %5223 = vsyncadd [#allocation8], 4294967264 }
 0x75a   :  { %4739 = vsyncpa [#allocation8], 1 }

</bundles_post_ra>
